<compile_context>
chip_gen: v7x
topology: tpu7x:2x2x1
jax: 0.10.0
libtpu: 0.0.40
codegen_flags: <defaults>
</compile_context>

<pallas_src>
import functools
import math

import jax
import jax.numpy as jnp
from jax.experimental import pallas as pl
from jax.experimental.pallas import tpu as pltpu

BASE_WIDTH = 8              # resnet50 uses 64; scaled down for small synthetic shapes
EXPANSION = 4               # bottleneck expansion (same as resnet50)
BLOCK_COUNTS = (3, 4, 6, 3) # resnet50 layer depths
OUT_DIM = 32                # VisnModel `dim`
BN_EPS = 1e-5
LANE = 128                  # output-channel padding granularity -> lane-dense stores


def _round_up(x, m):
    return ((x + m - 1) // m) * m


def _cpad(c):
    return _round_up(c, LANE)


# ---------------------------------------------------------------------------
# Pallas kernels
# ---------------------------------------------------------------------------
def _matmul_epilogue_kernel(*refs, relu, has_identity):
    """K-tiled matmul (bf16 MXU, f32 accumulate) + shift (+ residual) (+ ReLU)."""
    if has_identity:
        a_ref, b_ref, s_ref, id_ref, o_ref, acc_ref = refs
    else:
        a_ref, b_ref, s_ref, o_ref, acc_ref = refs
        id_ref = None
    k = pl.program_id(2)

    @pl.when(k == 0)
    def _():
        acc_ref[...] = jnp.zeros_like(acc_ref)

    acc_ref[...] += jnp.dot(a_ref[...], b_ref[...],
                            preferred_element_type=jnp.float32)

    @pl.when(k == pl.num_programs(2) - 1)
    def _():
        y = acc_ref[...] + s_ref[...]            # folded-BN shift / linear bias (f32)
        if id_ref is not None:
            y = y + id_ref[...].astype(jnp.float32)   # fused residual (bf16 -> f32)
        if relu:
            y = jnp.maximum(y, 0.0)
        o_ref[...] = y.astype(o_ref.dtype)       # cast only on store (bf16 activations)


def matmul_affine(a, b, shift, relu, identity=None, out_dtype=jnp.bfloat16):
    """a:(M,K), b:(K,N), shift:(N,) -> relu?(a@b + shift [+ identity]), N % 128 == 0."""
    M, K = a.shape
    Kb, N = b.shape
    assert K == Kb and N % LANE == 0

    # K tiling: pad once to a lane multiple; tile at 512 when K is large (v7x VMEM).
    Kp = _round_up(K, LANE)
    if Kp <= 512:
        tk = Kp
    else:
        tk = 512
        Kp = _round_up(K, tk)

    # M tiling: multiples of 16 rows (bf16 sublane packing), <= 256-row tiles.
    tm = 256 if M >= 256 else _round_up(M, 16)
    Mp = _round_up(M, tm)

    # N tiling: keep >= 2 parallel grid steps where possible (v7x has 2 TensorCores).
    if (Mp // tm) >= 2 and N % 256 == 0:
        tn = 256
    else:
        tn = 128

    a_p = a if a.dtype == jnp.bfloat16 else a.astype(jnp.bfloat16)
    a_p = jnp.pad(a_p, ((0, Mp - M), (0, Kp - K)))
    b_p = jnp.pad(b.astype(jnp.bfloat16), ((0, Kp - K), (0, 0)))
    shift2 = shift.reshape(1, N).astype(jnp.float32)

    in_specs = [
        pl.BlockSpec((tm, tk), lambda i, j, k: (i, k)),
        pl.BlockSpec((tk, tn), lambda i, j, k: (k, j)),
        pl.BlockSpec((1, tn), lambda i, j, k: (0, j)),
    ]
    args = [a_p, b_p, shift2]
    if identity is not None:
        id_p = identity if identity.dtype == jnp.bfloat16 else identity.astype(jnp.bfloat16)
        id_p = jnp.pad(id_p, ((0, Mp - M), (0, 0)))
        in_specs.append(pl.BlockSpec((tm, tn), lambda i, j, k: (i, j)))
        args.append(id_p)

    out_itemsize = jnp.dtype(out_dtype).itemsize
    bytes_accessed = (a_p.size * 2 + b_p.size * 2 + shift2.size * 4
                      + Mp * N * out_itemsize
                      + (Mp * N * 2 if identity is not None else 0))
    cost = pl.CostEstimate(flops=2 * Mp * Kp * N, transcendentals=0,
                           bytes_accessed=int(bytes_accessed))

    out = pl.pallas_call(
        functools.partial(_matmul_epilogue_kernel, relu=relu,
                          has_identity=identity is not None),
        out_shape=jax.ShapeDtypeStruct((Mp, N), out_dtype),
        grid=(Mp // tm, N // tn, Kp // tk),
        in_specs=in_specs,
        out_specs=pl.BlockSpec((tm, tn), lambda i, j, k: (i, j)),
        scratch_shapes=[pltpu.VMEM((tm, tn), jnp.float32)],
        compiler_params=pltpu.CompilerParams(
            dimension_semantics=("parallel", "parallel", "arbitrary"),
            vmem_limit_bytes=32 * 1024 * 1024),
        cost_estimate=cost,
    )(*args)
    return out[:M]


def _maxpool9_kernel(*refs):
    """9 tap tiles -> elementwise max tree (pure VPU, no cross-sublane reduction)."""
    o_ref = refs[-1]
    m = refs[0][...]
    for r in refs[1:-1]:
        m = jnp.maximum(m, r[...])
    o_ref[...] = m


def _mean_reduce_kernel(x_ref, o_ref):
    o_ref[...] = jnp.mean(x_ref[...].astype(jnp.float32), axis=1)


def global_avg_pool(x):
    """x: (N, H, W, C) -> (N, C) f32, mean over spatial dims (resnet.avgpool + flatten)."""
    N, H, W, C = x.shape
    x3 = x.reshape(N, H * W, C)
    # Tiny at this point of the network; a single block is fine on all generations.
    return pl.pallas_call(
        _mean_reduce_kernel,
        out_shape=jax.ShapeDtypeStruct((N, C), jnp.float32),
        grid=(1,),
        in_specs=[pl.BlockSpec((N, H * W, C), lambda i: (0, 0, 0))],
        out_specs=pl.BlockSpec((N, C), lambda i: (0, 0)),
    )(x3)


# ---------------------------------------------------------------------------
# Glue: im2col patch extraction (reshape/slice only; compute stays in Pallas)
# ---------------------------------------------------------------------------
def _im2col(x, kh, kw, stride, pad):
    N, H, W, C = x.shape
    xp = jnp.pad(x, ((0, 0), (pad, pad), (pad, pad), (0, 0)))
    Hp, Wp = H + 2 * pad, W + 2 * pad
    Ho = (Hp - kh) // stride + 1
    Wo = (Wp - kw) // stride + 1
    cols = []
    for i in range(kh):
        for j in range(kw):
            cols.append(xp[:, i:i + stride * (Ho - 1) + 1:stride,
                            j:j + stride * (Wo - 1) + 1:stride, :])
    patches = jnp.concatenate(cols, axis=-1)  # (N, Ho, Wo, kh*kw*C), (i,j)-major, C-minor
    return patches, Ho, Wo


def conv_bn_act(x, w, shift, *, stride, pad, relu, identity=None,
                out_dtype=jnp.bfloat16):
    """Conv2d (no bias) + FrozenBatchNorm2d (scale folded into w) [+ residual] + ReLU."""
    kh, kw, cin, cout_p = w.shape
    x = x[..., :cin]                           # compact K: drop lane-padding channels
    patches, Ho, Wo = _im2col(x, kh, kw, stride, pad)
    N = x.shape[0]
    a = patches.reshape(N * Ho * Wo, kh * kw * cin)
    b = w.reshape(kh * kw * cin, cout_p)       # matches (i,j)-major, C-minor patch order
    id2 = None if identity is None else identity.reshape(N * Ho * Wo, cout_p)
    y = matmul_affine(a, b, shift, relu, identity=id2, out_dtype=out_dtype)
    return y.reshape(N, Ho, Wo, cout_p)


def max_pool_3x3_s2(x, real_c):
    """3x3 / stride-2 / pad-1 max pool over the REAL channels only (compact output)."""
    N, H, W, _ = x.shape
    x = x[..., :real_c]
    xp = jnp.pad(x, ((0, 0), (1, 1), (1, 1), (0, 0)), constant_values=-jnp.inf)
    Hp, Wp = H + 2, W + 2
    Ho = (Hp - 3) // 2 + 1
    Wo = (Wp - 3) // 2 + 1
    M = N * Ho * Wo
    taps = []
    for i in range(3):
        for j in range(3):
            t = xp[:, i:i + 2 * (Ho - 1) + 1:2, j:j + 2 * (Wo - 1) + 1:2, :]
            taps.append(t.reshape(M, real_c))
    tm = 256 if M >= 256 else _round_up(M, 16)
    Mp = _round_up(M, tm)
    taps = [jnp.pad(t, ((0, Mp - M), (0, 0)), constant_values=-jnp.inf) for t in taps]
    out = pl.pallas_call(
        _maxpool9_kernel,
        out_shape=jax.ShapeDtypeStruct((Mp, real_c), x.dtype),
        grid=(Mp // tm,),
        in_specs=[pl.BlockSpec((tm, real_c), lambda i: (i, 0)) for _ in range(9)],
        out_specs=pl.BlockSpec((tm, real_c), lambda i: (i, 0)),
        compiler_params=pltpu.CompilerParams(dimension_semantics=("parallel",)),
    )(*taps)
    return out[:M].reshape(N, Ho, Wo, real_c)


# ---------------------------------------------------------------------------
# Deterministic synthetic parameters (resnet50 bottleneck layout).  Conv weights keep
# their REAL cin (compact K); only cout is padded to a multiple of 128 so stores stay
# lane-dense.  Frozen-BN scale is folded into the weights; only the shift remains.
# TODO(synk): loading torchvision pretrained ResNet-50 weights is out of scope.
# ---------------------------------------------------------------------------
class _ParamGen:
    def __init__(self, seed):
        self._key = jax.random.PRNGKey(seed)

    def key(self):
        self._key, sub = jax.random.split(self._key)
        return sub


def _conv_bn(pg, k, cin, cout):
    cout_p = _cpad(cout)
    std = math.sqrt(2.0 / (k * k * cin))
    w = std * jax.random.normal(pg.key(), (k, k, cin, cout), jnp.float32)
    gamma = 1.0 + 0.1 * jax.random.normal(pg.key(), (cout,), jnp.float32)
    beta = 0.1 * jax.random.normal(pg.key(), (cout,), jnp.float32)
    mean = 0.1 * jax.random.normal(pg.key(), (cout,), jnp.float32)
    var = 1.0 + 0.1 * jnp.abs(jax.random.normal(pg.key(), (cout,), jnp.float32))
    scale = gamma * jax.lax.rsqrt(var + BN_EPS)          # FrozenBatchNorm2d -> affine
    shift = beta - mean * scale
    w_folded = w * scale[None, None, None, :]            # fold BN scale into the conv
    w_folded = jnp.pad(w_folded,
                       ((0, 0), (0, 0), (0, 0), (0, cout_p - cout))).astype(jnp.bfloat16)
    shift = jnp.pad(shift, (0, cout_p - cout)).astype(jnp.float32)
    return w_folded, shift


def _bottleneck_params(pg, cin, planes, stride):
    out_c = planes * EXPANSION
    p = {
        'conv1': _conv_bn(pg, 1, cin, planes),
        'conv2': _conv_bn(pg, 3, planes, planes),
        'conv3': _conv_bn(pg, 1, planes, out_c),
        'stride': stride,
    }
    if stride != 1 or cin != out_c:
        p['down'] = _conv_bn(pg, 1, cin, out_c)
    return p


def make_visn_params(seed=0, dim=OUT_DIM):
    pg = _ParamGen(seed)
    params = {'stem': _conv_bn(pg, 7, 3, BASE_WIDTH)}
    cin = BASE_WIDTH
    layers = []
    for stage, nblocks in enumerate(BLOCK_COUNTS):
        planes = BASE_WIDTH * (2 ** stage)
        stride = 1 if stage == 0 else 2
        blocks = [_bottleneck_params(pg, cin, planes, stride)]
        cin = planes * EXPANSION
        for _ in range(1, nblocks):
            blocks.append(_bottleneck_params(pg, cin, planes, 1))
        layers.append(blocks)
    params['layers'] = layers
    backbone_dim = cin                                   # resnet.fc.in_features analogue
    dim_p = _cpad(dim)
    fc_w = (math.sqrt(1.0 / backbone_dim)
            * jax.random.normal(pg.key(), (backbone_dim, dim), jnp.float32))
    params['fc_w'] = jnp.pad(fc_w, ((0, 0), (0, dim_p - dim))).astype(jnp.bfloat16)
    params['fc_b'] = jnp.pad(0.01 * jax.random.normal(pg.key(), (dim,), jnp.float32),
                             (0, dim_p - dim)).astype(jnp.float32)
    params['out_dim'] = dim
    return params


# ---------------------------------------------------------------------------
# Forward pass (mirrors VisnModel.forward for the resnet branch, eval mode)
# ---------------------------------------------------------------------------
def _bottleneck_fwd(x, p):
    stride = p['stride']
    if 'down' in p:
        identity = conv_bn_act(x, *p['down'], stride=stride, pad=0, relu=False)
    else:
        identity = x
    out = conv_bn_act(x, *p['conv1'], stride=1, pad=0, relu=True)
    out = conv_bn_act(out, *p['conv2'], stride=stride, pad=1, relu=True)
    # residual add + ReLU fused into conv3's matmul epilogue
    out = conv_bn_act(out, *p['conv3'], stride=1, pad=0, relu=True, identity=identity)
    return out


def visn_model_forward(img, params):
    """img: (N, H, W, 3) float32 -> (N, OUT_DIM) float32."""
    # backbone (frozen, no-grad in PyTorch; inference math is identical)
    x = conv_bn_act(img, *params['stem'], stride=2, pad=3, relu=True)
    x = max_pool_3x3_s2(x, real_c=BASE_WIDTH)
    for blocks in params['layers']:
        for p in blocks:
            x = _bottleneck_fwd(x, p)
    x = global_avg_pool(x)                       # resnet avgpool + flatten, fc=Identity
    # mlp = nn.Sequential(nn.Dropout(0.3), nn.Linear(backbone_dim, dim))
    # TODO(synk): nn.Dropout(0.3) is identity at inference; training-mode RNG masking not implemented.
    x = matmul_affine(x, params['fc_w'], params['fc_b'], relu=False,
                      out_dtype=jnp.float32)
    return x[:, :params['out_dim']]              # drop the lane-padding columns


if __name__ == "__main__":
    key = jax.random.PRNGKey(0)
    img = jax.random.normal(key, (2, 16, 16, 3), jnp.float32)   # NHWC, small shapes
    params = make_visn_params(seed=0, dim=OUT_DIM)
    forward = jax.jit(lambda im: visn_model_forward(im, params))
    out = jax.block_until_ready(forward(img))
    assert out.shape == (2, OUT_DIM), out.shape
    assert bool(jnp.all(jnp.isfinite(out)))
    print("KERNEL_OK")
</pallas_src>

<mosaic_0001>
module attributes {stable_mosaic.version = 11 : i64} {
  func.func @_matmul_epilogue_kernel(%arg0: i32, %arg1: i32, %arg2: i32, %arg3: memref<128x256xbf16, #tpu.memory_space<vmem>>, %arg4: memref<256x128xbf16, #tpu.memory_space<vmem>>, %arg5: memref<1x128xf32, #tpu.memory_space<vmem>>, %arg6: memref<128x128xbf16, #tpu.memory_space<vmem>>, %arg7: memref<128x128xf32, #tpu.memory_space<vmem>>) attributes {dimension_semantics = [#tpu.dimension_semantics<parallel>, #tpu.dimension_semantics<parallel>, #tpu.dimension_semantics<arbitrary>], iteration_bounds = array<i64: 1, 1, 1>, scalar_prefetch = 0 : i64, scratch_operands = 1 : i64, tpu.core_type = #tpu.core_type<tc>, window_params = [{transform_indices = @transform_0, window_bounds = array<i64: 128, 256>}, {transform_indices = @transform_1, window_bounds = array<i64: 256, 128>}, {transform_indices = @transform_2, window_bounds = array<i64: 1, 128>}, {transform_indices = @transform_3, window_bounds = array<i64: 128, 128>}]} {
    %c0_i32 = arith.constant 0 : i32
    %0 = arith.cmpi eq, %arg2, %c0_i32 : i32
    %1 = arith.extui %0 : i1 to i32
    %c0_i32_0 = arith.constant 0 : i32
    %2 = arith.cmpi ne, %1, %c0_i32_0 : i32
    scf.if %2 {
      %cst_10 = arith.constant 0.000000e+00 : f32
      %12 = vector.broadcast %cst_10 : f32 to vector<128x128xf32>
      %c0_11 = arith.constant 0 : index
      %c0_12 = arith.constant 0 : index
      %13 = vector.load %arg7[%c0_11, %c0_12] : memref<128x128xf32, #tpu.memory_space<vmem>>, vector<128x128xf32>
      tpu.vector_store %arg7[%c0_11, %c0_12], %12 {strides = array<i32>} : memref<128x128xf32, #tpu.memory_space<vmem>>, vector<128x128xf32>,
    } else {
    }
    %c0 = arith.constant 0 : index
    %c0_1 = arith.constant 0 : index
    %3 = vector.load %arg7[%c0, %c0_1] : memref<128x128xf32, #tpu.memory_space<vmem>>, vector<128x128xf32>
    %c0_2 = arith.constant 0 : index
    %c0_3 = arith.constant 0 : index
    %4 = vector.load %arg3[%c0_2, %c0_3] : memref<128x256xbf16, #tpu.memory_space<vmem>>, vector<128x256xbf16>
    %c0_4 = arith.constant 0 : index
    %c0_5 = arith.constant 0 : index
    %5 = vector.load %arg4[%c0_4, %c0_5] : memref<256x128xbf16, #tpu.memory_space<vmem>>, vector<256x128xbf16>
    %cst = arith.constant dense<0.000000e+00> : vector<128x128xf32>
    %6 = tpu.matmul %4, %5, %cst {dimension_numbers = #tpu.dot_dimension_numbers<[1], [0], [0], [1], [0, 0, 1, 1], [], []>} : vector<128x256xbf16>, vector<256x128xbf16>, vector<128x128xf32> -> vector<128x128xf32>
    %7 = arith.addf %3, %6 : vector<128x128xf32>
    %c0_6 = arith.constant 0 : index
    %c0_7 = arith.constant 0 : index
    %8 = vector.load %arg7[%c0_6, %c0_7] : memref<128x128xf32, #tpu.memory_space<vmem>>, vector<128x128xf32>
    tpu.vector_store %arg7[%c0_6, %c0_7], %7 {strides = array<i32>} : memref<128x128xf32, #tpu.memory_space<vmem>>, vector<128x128xf32>,
    %c0_i32_8 = arith.constant 0 : i32
    %9 = arith.cmpi eq, %arg2, %c0_i32_8 : i32
    %10 = arith.extui %9 : i1 to i32
    %c0_i32_9 = arith.constant 0 : i32
    %11 = arith.cmpi ne, %10, %c0_i32_9 : i32
    scf.if %11 {
      %c0_10 = arith.constant 0 : index
      %c0_11 = arith.constant 0 : index
      %12 = vector.load %arg7[%c0_10, %c0_11] : memref<128x128xf32, #tpu.memory_space<vmem>>, vector<128x128xf32>
      %c0_12 = arith.constant 0 : index
      %c0_13 = arith.constant 0 : index
      %13 = vector.load %arg5[%c0_12, %c0_13] : memref<1x128xf32, #tpu.memory_space<vmem>>, vector<1x128xf32>
      %14 = vector.broadcast %13 : vector<1x128xf32> to vector<128x128xf32>
      %15 = arith.addf %12, %14 : vector<128x128xf32>
      %cst_14 = arith.constant 0.000000e+00 : f32
      %16 = vector.broadcast %cst_14 : f32 to vector<128x128xf32>
      %17 = arith.maximumf %15, %16 : vector<128x128xf32>
      %18 = arith.truncf %17 : vector<128x128xf32> to vector<128x128xbf16>
      %c0_15 = arith.constant 0 : index
      %c0_16 = arith.constant 0 : index
      %19 = vector.load %arg6[%c0_15, %c0_16] : memref<128x128xbf16, #tpu.memory_space<vmem>>, vector<128x128xbf16>
      tpu.vector_store %arg6[%c0_15, %c0_16], %18 {strides = array<i32>} : memref<128x128xbf16, #tpu.memory_space<vmem>>, vector<128x128xbf16>,
    } else {
    }
    return
  }
  func.func @transform_0(%arg0: i32, %arg1: i32, %arg2: i32) -> (i32, i32) {
    %c0_i32 = arith.constant 0 : i32
    return %arg0, %arg2 : i32, i32
  }
  func.func @transform_1(%arg0: i32, %arg1: i32, %arg2: i32) -> (i32, i32) {
    %c0_i32 = arith.constant 0 : i32
    return %arg2, %arg1 : i32, i32
  }
  func.func @transform_2(%arg0: i32, %arg1: i32, %arg2: i32) -> (i32, i32) {
    %c0_i32 = arith.constant 0 : i32
    %c0_i32_0 = arith.constant 0 : i32
    return %c0_i32, %arg1 : i32, i32
  }
  func.func @transform_3(%arg0: i32, %arg1: i32, %arg2: i32) -> (i32, i32) {
    %c0_i32 = arith.constant 0 : i32
    return %arg0, %arg1 : i32, i32
  }
}

module attributes {stable_mosaic.version = 11 : i64} {
  func.func @_matmul_epilogue_kernel(%arg0: i32, %arg1: i32, %arg2: i32, %arg3: memref<32x128xbf16, #tpu.memory_space<vmem>>, %arg4: memref<128x128xbf16, #tpu.memory_space<vmem>>, %arg5: memref<1x128xf32, #tpu.memory_space<vmem>>, %arg6: memref<32x128xbf16, #tpu.memory_space<vmem>>, %arg7: memref<32x128xf32, #tpu.memory_space<vmem>>) attributes {dimension_semantics = [#tpu.dimension_semantics<parallel>, #tpu.dimension_semantics<parallel>, #tpu.dimension_semantics<arbitrary>], iteration_bounds = array<i64: 1, 1, 1>, scalar_prefetch = 0 : i64, scratch_operands = 1 : i64, tpu.core_type = #tpu.core_type<tc>, window_params = [{transform_indices = @transform_0, window_bounds = array<i64: 32, 128>}, {transform_indices = @transform_1, window_bounds = array<i64: 128, 128>}, {transform_indices = @transform_2, window_bounds = array<i64: 1, 128>}, {transform_indices = @transform_3, window_bounds = array<i64: 32, 128>}]} {
    %c0_i32 = arith.constant 0 : i32
    %0 = arith.cmpi eq, %arg2, %c0_i32 : i32
    %1 = arith.extui %0 : i1 to i32
    %c0_i32_0 = arith.constant 0 : i32
    %2 = arith.cmpi ne, %1, %c0_i32_0 : i32
    scf.if %2 {
      %cst_10 = arith.constant 0.000000e+00 : f32
      %12 = vector.broadcast %cst_10 : f32 to vector<32x128xf32>
      %c0_11 = arith.constant 0 : index
      %c0_12 = arith.constant 0 : index
      %13 = vector.load %arg7[%c0_11, %c0_12] : memref<32x128xf32, #tpu.memory_space<vmem>>, vector<32x128xf32>
      tpu.vector_store %arg7[%c0_11, %c0_12], %12 {strides = array<i32>} : memref<32x128xf32, #tpu.memory_space<vmem>>, vector<32x128xf32>,
    } else {
    }
    %c0 = arith.constant 0 : index
    %c0_1 = arith.constant 0 : index
    %3 = vector.load %arg7[%c0, %c0_1] : memref<32x128xf32, #tpu.memory_space<vmem>>, vector<32x128xf32>
    %c0_2 = arith.constant 0 : index
    %c0_3 = arith.constant 0 : index
    %4 = vector.load %arg3[%c0_2, %c0_3] : memref<32x128xbf16, #tpu.memory_space<vmem>>, vector<32x128xbf16>
    %c0_4 = arith.constant 0 : index
    %c0_5 = arith.constant 0 : index
    %5 = vector.load %arg4[%c0_4, %c0_5] : memref<128x128xbf16, #tpu.memory_space<vmem>>, vector<128x128xbf16>
    %cst = arith.constant dense<0.000000e+00> : vector<32x128xf32>
    %6 = tpu.matmul %4, %5, %cst {dimension_numbers = #tpu.dot_dimension_numbers<[1], [0], [0], [1], [0, 0, 1, 1], [], []>} : vector<32x128xbf16>, vector<128x128xbf16>, vector<32x128xf32> -> vector<32x128xf32>
    %7 = arith.addf %3, %6 : vector<32x128xf32>
    %c0_6 = arith.constant 0 : index
    %c0_7 = arith.constant 0 : index
    %8 = vector.load %arg7[%c0_6, %c0_7] : memref<32x128xf32, #tpu.memory_space<vmem>>, vector<32x128xf32>
    tpu.vector_store %arg7[%c0_6, %c0_7], %7 {strides = array<i32>} : memref<32x128xf32, #tpu.memory_space<vmem>>, vector<32x128xf32>,
    %c0_i32_8 = arith.constant 0 : i32
    %9 = arith.cmpi eq, %arg2, %c0_i32_8 : i32
    %10 = arith.extui %9 : i1 to i32
    %c0_i32_9 = arith.constant 0 : i32
    %11 = arith.cmpi ne, %10, %c0_i32_9 : i32
    scf.if %11 {
      %c0_10 = arith.constant 0 : index
      %c0_11 = arith.constant 0 : index
      %12 = vector.load %arg7[%c0_10, %c0_11] : memref<32x128xf32, #tpu.memory_space<vmem>>, vector<32x128xf32>
      %c0_12 = arith.constant 0 : index
      %c0_13 = arith.constant 0 : index
      %13 = vector.load %arg5[%c0_12, %c0_13] : memref<1x128xf32, #tpu.memory_space<vmem>>, vector<1x128xf32>
      %14 = vector.broadcast %13 : vector<1x128xf32> to vector<32x128xf32>
      %15 = arith.addf %12, %14 : vector<32x128xf32>
      %cst_14 = arith.constant 0.000000e+00 : f32
      %16 = vector.broadcast %cst_14 : f32 to vector<32x128xf32>
      %17 = arith.maximumf %15, %16 : vector<32x128xf32>
      %18 = arith.truncf %17 : vector<32x128xf32> to vector<32x128xbf16>
      %c0_15 = arith.constant 0 : index
      %c0_16 = arith.constant 0 : index
      %19 = vector.load %arg6[%c0_15, %c0_16] : memref<32x128xbf16, #tpu.memory_space<vmem>>, vector<32x128xbf16>
      tpu.vector_store %arg6[%c0_15, %c0_16], %18 {strides = array<i32>} : memref<32x128xbf16, #tpu.memory_space<vmem>>, vector<32x128xbf16>,
    } else {
    }
    return
  }
  func.func @transform_0(%arg0: i32, %arg1: i32, %arg2: i32) -> (i32, i32) {
    %c0_i32 = arith.constant 0 : i32
    return %arg0, %arg2 : i32, i32
  }
  func.func @transform_1(%arg0: i32, %arg1: i32, %arg2: i32) -> (i32, i32) {
    %c0_i32 = arith.constant 0 : i32
    return %arg2, %arg1 : i32, i32
  }
  func.func @transform_2(%arg0: i32, %arg1: i32, %arg2: i32) -> (i32, i32) {
    %c0_i32 = arith.constant 0 : i32
    %c0_i32_0 = arith.constant 0 : i32
    return %c0_i32, %arg1 : i32, i32
  }
  func.func @transform_3(%arg0: i32, %arg1: i32, %arg2: i32) -> (i32, i32) {
    %c0_i32 = arith.constant 0 : i32
    return %arg0, %arg1 : i32, i32
  }
}

module attributes {stable_mosaic.version = 11 : i64} {
  func.func @_maxpool9_kernel(%arg0: i32, %arg1: memref<32x8xbf16, #tpu.memory_space<vmem>>, %arg2: memref<32x8xbf16, #tpu.memory_space<vmem>>, %arg3: memref<32x8xbf16, #tpu.memory_space<vmem>>, %arg4: memref<32x8xbf16, #tpu.memory_space<vmem>>, %arg5: memref<32x8xbf16, #tpu.memory_space<vmem>>, %arg6: memref<32x8xbf16, #tpu.memory_space<vmem>>, %arg7: memref<32x8xbf16, #tpu.memory_space<vmem>>, %arg8: memref<32x8xbf16, #tpu.memory_space<vmem>>, %arg9: memref<32x8xbf16, #tpu.memory_space<vmem>>, %arg10: memref<32x8xbf16, #tpu.memory_space<vmem>>) attributes {dimension_semantics = [#tpu.dimension_semantics<parallel>], iteration_bounds = array<i64: 1>, scalar_prefetch = 0 : i64, scratch_operands = 0 : i64, tpu.core_type = #tpu.core_type<tc>, window_params = [{transform_indices = @transform_0, window_bounds = array<i64: 32, 8>}, {transform_indices = @transform_1, window_bounds = array<i64: 32, 8>}, {transform_indices = @transform_2, window_bounds = array<i64: 32, 8>}, {transform_indices = @transform_3, window_bounds = array<i64: 32, 8>}, {transform_indices = @transform_4, window_bounds = array<i64: 32, 8>}, {transform_indices = @transform_5, window_bounds = array<i64: 32, 8>}, {transform_indices = @transform_6, window_bounds = array<i64: 32, 8>}, {transform_indices = @transform_7, window_bounds = array<i64: 32, 8>}, {transform_indices = @transform_8, window_bounds = array<i64: 32, 8>}, {transform_indices = @transform_9, window_bounds = array<i64: 32, 8>}]} {
    %c0 = arith.constant 0 : index
    %c0_0 = arith.constant 0 : index
    %0 = vector.load %arg1[%c0, %c0_0] : memref<32x8xbf16, #tpu.memory_space<vmem>>, vector<32x8xbf16>
    %c0_1 = arith.constant 0 : index
    %c0_2 = arith.constant 0 : index
    %1 = vector.load %arg2[%c0_1, %c0_2] : memref<32x8xbf16, #tpu.memory_space<vmem>>, vector<32x8xbf16>
    %2 = arith.maximumf %0, %1 : vector<32x8xbf16>
    %c0_3 = arith.constant 0 : index
    %c0_4 = arith.constant 0 : index
    %3 = vector.load %arg3[%c0_3, %c0_4] : memref<32x8xbf16, #tpu.memory_space<vmem>>, vector<32x8xbf16>
    %4 = arith.maximumf %2, %3 : vector<32x8xbf16>
    %c0_5 = arith.constant 0 : index
    %c0_6 = arith.constant 0 : index
    %5 = vector.load %arg4[%c0_5, %c0_6] : memref<32x8xbf16, #tpu.memory_space<vmem>>, vector<32x8xbf16>
    %6 = arith.maximumf %4, %5 : vector<32x8xbf16>
    %c0_7 = arith.constant 0 : index
    %c0_8 = arith.constant 0 : index
    %7 = vector.load %arg5[%c0_7, %c0_8] : memref<32x8xbf16, #tpu.memory_space<vmem>>, vector<32x8xbf16>
    %8 = arith.maximumf %6, %7 : vector<32x8xbf16>
    %c0_9 = arith.constant 0 : index
    %c0_10 = arith.constant 0 : index
    %9 = vector.load %arg6[%c0_9, %c0_10] : memref<32x8xbf16, #tpu.memory_space<vmem>>, vector<32x8xbf16>
    %10 = arith.maximumf %8, %9 : vector<32x8xbf16>
    %c0_11 = arith.constant 0 : index
    %c0_12 = arith.constant 0 : index
    %11 = vector.load %arg7[%c0_11, %c0_12] : memref<32x8xbf16, #tpu.memory_space<vmem>>, vector<32x8xbf16>
    %12 = arith.maximumf %10, %11 : vector<32x8xbf16>
    %c0_13 = arith.constant 0 : index
    %c0_14 = arith.constant 0 : index
    %13 = vector.load %arg8[%c0_13, %c0_14] : memref<32x8xbf16, #tpu.memory_space<vmem>>, vector<32x8xbf16>
    %14 = arith.maximumf %12, %13 : vector<32x8xbf16>
    %c0_15 = arith.constant 0 : index
    %c0_16 = arith.constant 0 : index
    %15 = vector.load %arg9[%c0_15, %c0_16] : memref<32x8xbf16, #tpu.memory_space<vmem>>, vector<32x8xbf16>
    %16 = arith.maximumf %14, %15 : vector<32x8xbf16>
    %c0_17 = arith.constant 0 : index
    %c0_18 = arith.constant 0 : index
    %17 = vector.load %arg10[%c0_17, %c0_18] : memref<32x8xbf16, #tpu.memory_space<vmem>>, vector<32x8xbf16>
    tpu.vector_store %arg10[%c0_17, %c0_18], %16 {strides = array<i32>} : memref<32x8xbf16, #tpu.memory_space<vmem>>, vector<32x8xbf16>,
    return
  }
  func.func @transform_0(%arg0: i32) -> (i32, i32) {
    %c0_i32 = arith.constant 0 : i32
    %c0_i32_0 = arith.constant 0 : i32
    return %arg0, %c0_i32 : i32, i32
  }
  func.func @transform_1(%arg0: i32) -> (i32, i32) {
    %c0_i32 = arith.constant 0 : i32
    %c0_i32_0 = arith.constant 0 : i32
    return %arg0, %c0_i32 : i32, i32
  }
  func.func @transform_2(%arg0: i32) -> (i32, i32) {
    %c0_i32 = arith.constant 0 : i32
    %c0_i32_0 = arith.constant 0 : i32
    return %arg0, %c0_i32 : i32, i32
  }
  func.func @transform_3(%arg0: i32) -> (i32, i32) {
    %c0_i32 = arith.constant 0 : i32
    %c0_i32_0 = arith.constant 0 : i32
    return %arg0, %c0_i32 : i32, i32
  }
  func.func @transform_4(%arg0: i32) -> (i32, i32) {
    %c0_i32 = arith.constant 0 : i32
    %c0_i32_0 = arith.constant 0 : i32
    return %arg0, %c0_i32 : i32, i32
  }
  func.func @transform_5(%arg0: i32) -> (i32, i32) {
    %c0_i32 = arith.constant 0 : i32
    %c0_i32_0 = arith.constant 0 : i32
    return %arg0, %c0_i32 : i32, i32
  }
  func.func @transform_6(%arg0: i32) -> (i32, i32) {
    %c0_i32 = arith.constant 0 : i32
    %c0_i32_0 = arith.constant 0 : i32
    return %arg0, %c0_i32 : i32, i32
  }
  func.func @transform_7(%arg0: i32) -> (i32, i32) {
    %c0_i32 = arith.constant 0 : i32
    %c0_i32_0 = arith.constant 0 : i32
    return %arg0, %c0_i32 : i32, i32
  }
  func.func @transform_8(%arg0: i32) -> (i32, i32) {
    %c0_i32 = arith.constant 0 : i32
    %c0_i32_0 = arith.constant 0 : i32
    return %arg0, %c0_i32 : i32, i32
  }
  func.func @transform_9(%arg0: i32) -> (i32, i32) {
    %c0_i32 = arith.constant 0 : i32
    %c0_i32_0 = arith.constant 0 : i32
    return %arg0, %c0_i32 : i32, i32
  }
}

module attributes {stable_mosaic.version = 11 : i64} {
  func.func @_matmul_epilogue_kernel(%arg0: i32, %arg1: i32, %arg2: i32, %arg3: memref<32x128xbf16, #tpu.memory_space<vmem>>, %arg4: memref<128x128xbf16, #tpu.memory_space<vmem>>, %arg5: memref<1x128xf32, #tpu.memory_space<vmem>>, %arg6: memref<32x128xbf16, #tpu.memory_space<vmem>>, %arg7: memref<32x128xf32, #tpu.memory_space<vmem>>) attributes {dimension_semantics = [#tpu.dimension_semantics<parallel>, #tpu.dimension_semantics<parallel>, #tpu.dimension_semantics<arbitrary>], iteration_bounds = array<i64: 1, 1, 1>, scalar_prefetch = 0 : i64, scratch_operands = 1 : i64, tpu.core_type = #tpu.core_type<tc>, window_params = [{transform_indices = @transform_0, window_bounds = array<i64: 32, 128>}, {transform_indices = @transform_1, window_bounds = array<i64: 128, 128>}, {transform_indices = @transform_2, window_bounds = array<i64: 1, 128>}, {transform_indices = @transform_3, window_bounds = array<i64: 32, 128>}]} {
    %c0_i32 = arith.constant 0 : i32
    %0 = arith.cmpi eq, %arg2, %c0_i32 : i32
    %1 = arith.extui %0 : i1 to i32
    %c0_i32_0 = arith.constant 0 : i32
    %2 = arith.cmpi ne, %1, %c0_i32_0 : i32
    scf.if %2 {
      %cst_10 = arith.constant 0.000000e+00 : f32
      %12 = vector.broadcast %cst_10 : f32 to vector<32x128xf32>
      %c0_11 = arith.constant 0 : index
      %c0_12 = arith.constant 0 : index
      %13 = vector.load %arg7[%c0_11, %c0_12] : memref<32x128xf32, #tpu.memory_space<vmem>>, vector<32x128xf32>
      tpu.vector_store %arg7[%c0_11, %c0_12], %12 {strides = array<i32>} : memref<32x128xf32, #tpu.memory_space<vmem>>, vector<32x128xf32>,
    } else {
    }
    %c0 = arith.constant 0 : index
    %c0_1 = arith.constant 0 : index
    %3 = vector.load %arg7[%c0, %c0_1] : memref<32x128xf32, #tpu.memory_space<vmem>>, vector<32x128xf32>
    %c0_2 = arith.constant 0 : index
    %c0_3 = arith.constant 0 : index
    %4 = vector.load %arg3[%c0_2, %c0_3] : memref<32x128xbf16, #tpu.memory_space<vmem>>, vector<32x128xbf16>
    %c0_4 = arith.constant 0 : index
    %c0_5 = arith.constant 0 : index
    %5 = vector.load %arg4[%c0_4, %c0_5] : memref<128x128xbf16, #tpu.memory_space<vmem>>, vector<128x128xbf16>
    %cst = arith.constant dense<0.000000e+00> : vector<32x128xf32>
    %6 = tpu.matmul %4, %5, %cst {dimension_numbers = #tpu.dot_dimension_numbers<[1], [0], [0], [1], [0, 0, 1, 1], [], []>} : vector<32x128xbf16>, vector<128x128xbf16>, vector<32x128xf32> -> vector<32x128xf32>
    %7 = arith.addf %3, %6 : vector<32x128xf32>
    %c0_6 = arith.constant 0 : index
    %c0_7 = arith.constant 0 : index
    %8 = vector.load %arg7[%c0_6, %c0_7] : memref<32x128xf32, #tpu.memory_space<vmem>>, vector<32x128xf32>
    tpu.vector_store %arg7[%c0_6, %c0_7], %7 {strides = array<i32>} : memref<32x128xf32, #tpu.memory_space<vmem>>, vector<32x128xf32>,
    %c0_i32_8 = arith.constant 0 : i32
    %9 = arith.cmpi eq, %arg2, %c0_i32_8 : i32
    %10 = arith.extui %9 : i1 to i32
    %c0_i32_9 = arith.constant 0 : i32
    %11 = arith.cmpi ne, %10, %c0_i32_9 : i32
    scf.if %11 {
      %c0_10 = arith.constant 0 : index
      %c0_11 = arith.constant 0 : index
      %12 = vector.load %arg7[%c0_10, %c0_11] : memref<32x128xf32, #tpu.memory_space<vmem>>, vector<32x128xf32>
      %c0_12 = arith.constant 0 : index
      %c0_13 = arith.constant 0 : index
      %13 = vector.load %arg5[%c0_12, %c0_13] : memref<1x128xf32, #tpu.memory_space<vmem>>, vector<1x128xf32>
      %14 = vector.broadcast %13 : vector<1x128xf32> to vector<32x128xf32>
      %15 = arith.addf %12, %14 : vector<32x128xf32>
      %16 = arith.truncf %15 : vector<32x128xf32> to vector<32x128xbf16>
      %c0_14 = arith.constant 0 : index
      %c0_15 = arith.constant 0 : index
      %17 = vector.load %arg6[%c0_14, %c0_15] : memref<32x128xbf16, #tpu.memory_space<vmem>>, vector<32x128xbf16>
      tpu.vector_store %arg6[%c0_14, %c0_15], %16 {strides = array<i32>} : memref<32x128xbf16, #tpu.memory_space<vmem>>, vector<32x128xbf16>,
    } else {
    }
    return
  }
  func.func @transform_0(%arg0: i32, %arg1: i32, %arg2: i32) -> (i32, i32) {
    %c0_i32 = arith.constant 0 : i32
    return %arg0, %arg2 : i32, i32
  }
  func.func @transform_1(%arg0: i32, %arg1: i32, %arg2: i32) -> (i32, i32) {
    %c0_i32 = arith.constant 0 : i32
    return %arg2, %arg1 : i32, i32
  }
  func.func @transform_2(%arg0: i32, %arg1: i32, %arg2: i32) -> (i32, i32) {
    %c0_i32 = arith.constant 0 : i32
    %c0_i32_0 = arith.constant 0 : i32
    return %c0_i32, %arg1 : i32, i32
  }
  func.func @transform_3(%arg0: i32, %arg1: i32, %arg2: i32) -> (i32, i32) {
    %c0_i32 = arith.constant 0 : i32
    return %arg0, %arg1 : i32, i32
  }
}

module attributes {stable_mosaic.version = 11 : i64} {
  func.func @_matmul_epilogue_kernel(%arg0: i32, %arg1: i32, %arg2: i32, %arg3: memref<32x128xbf16, #tpu.memory_space<vmem>>, %arg4: memref<128x128xbf16, #tpu.memory_space<vmem>>, %arg5: memref<1x128xf32, #tpu.memory_space<vmem>>, %arg6: memref<32x128xbf16, #tpu.memory_space<vmem>>, %arg7: memref<32x128xbf16, #tpu.memory_space<vmem>>, %arg8: memref<32x128xf32, #tpu.memory_space<vmem>>) attributes {dimension_semantics = [#tpu.dimension_semantics<parallel>, #tpu.dimension_semantics<parallel>, #tpu.dimension_semantics<arbitrary>], iteration_bounds = array<i64: 1, 1, 1>, scalar_prefetch = 0 : i64, scratch_operands = 1 : i64, tpu.core_type = #tpu.core_type<tc>, window_params = [{transform_indices = @transform_0, window_bounds = array<i64: 32, 128>}, {transform_indices = @transform_1, window_bounds = array<i64: 128, 128>}, {transform_indices = @transform_2, window_bounds = array<i64: 1, 128>}, {transform_indices = @transform_3, window_bounds = array<i64: 32, 128>}, {transform_indices = @transform_4, window_bounds = array<i64: 32, 128>}]} {
    %c0_i32 = arith.constant 0 : i32
    %0 = arith.cmpi eq, %arg2, %c0_i32 : i32
    %1 = arith.extui %0 : i1 to i32
    %c0_i32_0 = arith.constant 0 : i32
    %2 = arith.cmpi ne, %1, %c0_i32_0 : i32
    scf.if %2 {
      %cst_10 = arith.constant 0.000000e+00 : f32
      %12 = vector.broadcast %cst_10 : f32 to vector<32x128xf32>
      %c0_11 = arith.constant 0 : index
      %c0_12 = arith.constant 0 : index
      %13 = vector.load %arg8[%c0_11, %c0_12] : memref<32x128xf32, #tpu.memory_space<vmem>>, vector<32x128xf32>
      tpu.vector_store %arg8[%c0_11, %c0_12], %12 {strides = array<i32>} : memref<32x128xf32, #tpu.memory_space<vmem>>, vector<32x128xf32>,
    } else {
    }
    %c0 = arith.constant 0 : index
    %c0_1 = arith.constant 0 : index
    %3 = vector.load %arg8[%c0, %c0_1] : memref<32x128xf32, #tpu.memory_space<vmem>>, vector<32x128xf32>
    %c0_2 = arith.constant 0 : index
    %c0_3 = arith.constant 0 : index
    %4 = vector.load %arg3[%c0_2, %c0_3] : memref<32x128xbf16, #tpu.memory_space<vmem>>, vector<32x128xbf16>
    %c0_4 = arith.constant 0 : index
    %c0_5 = arith.constant 0 : index
    %5 = vector.load %arg4[%c0_4, %c0_5] : memref<128x128xbf16, #tpu.memory_space<vmem>>, vector<128x128xbf16>
    %cst = arith.constant dense<0.000000e+00> : vector<32x128xf32>
    %6 = tpu.matmul %4, %5, %cst {dimension_numbers = #tpu.dot_dimension_numbers<[1], [0], [0], [1], [0, 0, 1, 1], [], []>} : vector<32x128xbf16>, vector<128x128xbf16>, vector<32x128xf32> -> vector<32x128xf32>
    %7 = arith.addf %3, %6 : vector<32x128xf32>
    %c0_6 = arith.constant 0 : index
    %c0_7 = arith.constant 0 : index
    %8 = vector.load %arg8[%c0_6, %c0_7] : memref<32x128xf32, #tpu.memory_space<vmem>>, vector<32x128xf32>
    tpu.vector_store %arg8[%c0_6, %c0_7], %7 {strides = array<i32>} : memref<32x128xf32, #tpu.memory_space<vmem>>, vector<32x128xf32>,
    %c0_i32_8 = arith.constant 0 : i32
    %9 = arith.cmpi eq, %arg2, %c0_i32_8 : i32
    %10 = arith.extui %9 : i1 to i32
    %c0_i32_9 = arith.constant 0 : i32
    %11 = arith.cmpi ne, %10, %c0_i32_9 : i32
    scf.if %11 {
      %c0_10 = arith.constant 0 : index
      %c0_11 = arith.constant 0 : index
      %12 = vector.load %arg8[%c0_10, %c0_11] : memref<32x128xf32, #tpu.memory_space<vmem>>, vector<32x128xf32>
      %c0_12 = arith.constant 0 : index
      %c0_13 = arith.constant 0 : index
      %13 = vector.load %arg5[%c0_12, %c0_13] : memref<1x128xf32, #tpu.memory_space<vmem>>, vector<1x128xf32>
      %14 = vector.broadcast %13 : vector<1x128xf32> to vector<32x128xf32>
      %15 = arith.addf %12, %14 : vector<32x128xf32>
      %c0_14 = arith.constant 0 : index
      %c0_15 = arith.constant 0 : index
      %16 = vector.load %arg6[%c0_14, %c0_15] : memref<32x128xbf16, #tpu.memory_space<vmem>>, vector<32x128xbf16>
      %17 = arith.extf %16 : vector<32x128xbf16> to vector<32x128xf32>
      %18 = arith.addf %15, %17 : vector<32x128xf32>
      %cst_16 = arith.constant 0.000000e+00 : f32
      %19 = vector.broadcast %cst_16 : f32 to vector<32x128xf32>
      %20 = arith.maximumf %18, %19 : vector<32x128xf32>
      %21 = arith.truncf %20 : vector<32x128xf32> to vector<32x128xbf16>
      %c0_17 = arith.constant 0 : index
      %c0_18 = arith.constant 0 : index
      %22 = vector.load %arg7[%c0_17, %c0_18] : memref<32x128xbf16, #tpu.memory_space<vmem>>, vector<32x128xbf16>
      tpu.vector_store %arg7[%c0_17, %c0_18], %21 {strides = array<i32>} : memref<32x128xbf16, #tpu.memory_space<vmem>>, vector<32x128xbf16>,
    } else {
    }
    return
  }
  func.func @transform_0(%arg0: i32, %arg1: i32, %arg2: i32) -> (i32, i32) {
    %c0_i32 = arith.constant 0 : i32
    return %arg0, %arg2 : i32, i32
  }
  func.func @transform_1(%arg0: i32, %arg1: i32, %arg2: i32) -> (i32, i32) {
    %c0_i32 = arith.constant 0 : i32
    return %arg2, %arg1 : i32, i32
  }
  func.func @transform_2(%arg0: i32, %arg1: i32, %arg2: i32) -> (i32, i32) {
    %c0_i32 = arith.constant 0 : i32
    %c0_i32_0 = arith.constant 0 : i32
    return %c0_i32, %arg1 : i32, i32
  }
  func.func @transform_3(%arg0: i32, %arg1: i32, %arg2: i32) -> (i32, i32) {
    %c0_i32 = arith.constant 0 : i32
    return %arg0, %arg1 : i32, i32
  }
  func.func @transform_4(%arg0: i32, %arg1: i32, %arg2: i32) -> (i32, i32) {
    %c0_i32 = arith.constant 0 : i32
    return %arg0, %arg1 : i32, i32
  }
}

module attributes {stable_mosaic.version = 11 : i64} {
  func.func @_matmul_epilogue_kernel(%arg0: i32, %arg1: i32, %arg2: i32, %arg3: memref<16x256xbf16, #tpu.memory_space<vmem>>, %arg4: memref<256x128xbf16, #tpu.memory_space<vmem>>, %arg5: memref<1x128xf32, #tpu.memory_space<vmem>>, %arg6: memref<16x128xbf16, #tpu.memory_space<vmem>>, %arg7: memref<16x128xf32, #tpu.memory_space<vmem>>) attributes {dimension_semantics = [#tpu.dimension_semantics<parallel>, #tpu.dimension_semantics<parallel>, #tpu.dimension_semantics<arbitrary>], iteration_bounds = array<i64: 1, 1, 1>, scalar_prefetch = 0 : i64, scratch_operands = 1 : i64, tpu.core_type = #tpu.core_type<tc>, window_params = [{transform_indices = @transform_0, window_bounds = array<i64: 16, 256>}, {transform_indices = @transform_1, window_bounds = array<i64: 256, 128>}, {transform_indices = @transform_2, window_bounds = array<i64: 1, 128>}, {transform_indices = @transform_3, window_bounds = array<i64: 16, 128>}]} {
    %c0_i32 = arith.constant 0 : i32
    %0 = arith.cmpi eq, %arg2, %c0_i32 : i32
    %1 = arith.extui %0 : i1 to i32
    %c0_i32_0 = arith.constant 0 : i32
    %2 = arith.cmpi ne, %1, %c0_i32_0 : i32
    scf.if %2 {
      %cst_10 = arith.constant 0.000000e+00 : f32
      %12 = vector.broadcast %cst_10 : f32 to vector<16x128xf32>
      %c0_11 = arith.constant 0 : index
      %c0_12 = arith.constant 0 : index
      %13 = vector.load %arg7[%c0_11, %c0_12] : memref<16x128xf32, #tpu.memory_space<vmem>>, vector<16x128xf32>
      tpu.vector_store %arg7[%c0_11, %c0_12], %12 {strides = array<i32>} : memref<16x128xf32, #tpu.memory_space<vmem>>, vector<16x128xf32>,
    } else {
    }
    %c0 = arith.constant 0 : index
    %c0_1 = arith.constant 0 : index
    %3 = vector.load %arg7[%c0, %c0_1] : memref<16x128xf32, #tpu.memory_space<vmem>>, vector<16x128xf32>
    %c0_2 = arith.constant 0 : index
    %c0_3 = arith.constant 0 : index
    %4 = vector.load %arg3[%c0_2, %c0_3] : memref<16x256xbf16, #tpu.memory_space<vmem>>, vector<16x256xbf16>
    %c0_4 = arith.constant 0 : index
    %c0_5 = arith.constant 0 : index
    %5 = vector.load %arg4[%c0_4, %c0_5] : memref<256x128xbf16, #tpu.memory_space<vmem>>, vector<256x128xbf16>
    %cst = arith.constant dense<0.000000e+00> : vector<16x128xf32>
    %6 = tpu.matmul %4, %5, %cst {dimension_numbers = #tpu.dot_dimension_numbers<[1], [0], [0], [1], [0, 0, 1, 1], [], []>} : vector<16x256xbf16>, vector<256x128xbf16>, vector<16x128xf32> -> vector<16x128xf32>
    %7 = arith.addf %3, %6 : vector<16x128xf32>
    %c0_6 = arith.constant 0 : index
    %c0_7 = arith.constant 0 : index
    %8 = vector.load %arg7[%c0_6, %c0_7] : memref<16x128xf32, #tpu.memory_space<vmem>>, vector<16x128xf32>
    tpu.vector_store %arg7[%c0_6, %c0_7], %7 {strides = array<i32>} : memref<16x128xf32, #tpu.memory_space<vmem>>, vector<16x128xf32>,
    %c0_i32_8 = arith.constant 0 : i32
    %9 = arith.cmpi eq, %arg2, %c0_i32_8 : i32
    %10 = arith.extui %9 : i1 to i32
    %c0_i32_9 = arith.constant 0 : i32
    %11 = arith.cmpi ne, %10, %c0_i32_9 : i32
    scf.if %11 {
      %c0_10 = arith.constant 0 : index
      %c0_11 = arith.constant 0 : index
      %12 = vector.load %arg7[%c0_10, %c0_11] : memref<16x128xf32, #tpu.memory_space<vmem>>, vector<16x128xf32>
      %c0_12 = arith.constant 0 : index
      %c0_13 = arith.constant 0 : index
      %13 = vector.load %arg5[%c0_12, %c0_13] : memref<1x128xf32, #tpu.memory_space<vmem>>, vector<1x128xf32>
      %14 = vector.broadcast %13 : vector<1x128xf32> to vector<16x128xf32>
      %15 = arith.addf %12, %14 : vector<16x128xf32>
      %cst_14 = arith.constant 0.000000e+00 : f32
      %16 = vector.broadcast %cst_14 : f32 to vector<16x128xf32>
      %17 = arith.maximumf %15, %16 : vector<16x128xf32>
      %18 = arith.truncf %17 : vector<16x128xf32> to vector<16x128xbf16>
      %c0_15 = arith.constant 0 : index
      %c0_16 = arith.constant 0 : index
      %19 = vector.load %arg6[%c0_15, %c0_16] : memref<16x128xbf16, #tpu.memory_space<vmem>>, vector<16x128xbf16>
      tpu.vector_store %arg6[%c0_15, %c0_16], %18 {strides = array<i32>} : memref<16x128xbf16, #tpu.memory_space<vmem>>, vector<16x128xbf16>,
    } else {
    }
    return
  }
  func.func @transform_0(%arg0: i32, %arg1: i32, %arg2: i32) -> (i32, i32) {
    %c0_i32 = arith.constant 0 : i32
    return %arg0, %arg2 : i32, i32
  }
  func.func @transform_1(%arg0: i32, %arg1: i32, %arg2: i32) -> (i32, i32) {
    %c0_i32 = arith.constant 0 : i32
    return %arg2, %arg1 : i32, i32
  }
  func.func @transform_2(%arg0: i32, %arg1: i32, %arg2: i32) -> (i32, i32) {
    %c0_i32 = arith.constant 0 : i32
    %c0_i32_0 = arith.constant 0 : i32
    return %c0_i32, %arg1 : i32, i32
  }
  func.func @transform_3(%arg0: i32, %arg1: i32, %arg2: i32) -> (i32, i32) {
    %c0_i32 = arith.constant 0 : i32
    return %arg0, %arg1 : i32, i32
  }
}

module attributes {stable_mosaic.version = 11 : i64} {
  func.func @_matmul_epilogue_kernel(%arg0: i32, %arg1: i32, %arg2: i32, %arg3: memref<16x128xbf16, #tpu.memory_space<vmem>>, %arg4: memref<128x128xbf16, #tpu.memory_space<vmem>>, %arg5: memref<1x128xf32, #tpu.memory_space<vmem>>, %arg6: memref<16x128xbf16, #tpu.memory_space<vmem>>, %arg7: memref<16x128xbf16, #tpu.memory_space<vmem>>, %arg8: memref<16x128xf32, #tpu.memory_space<vmem>>) attributes {dimension_semantics = [#tpu.dimension_semantics<parallel>, #tpu.dimension_semantics<parallel>, #tpu.dimension_semantics<arbitrary>], iteration_bounds = array<i64: 1, 1, 1>, scalar_prefetch = 0 : i64, scratch_operands = 1 : i64, tpu.core_type = #tpu.core_type<tc>, window_params = [{transform_indices = @transform_0, window_bounds = array<i64: 16, 128>}, {transform_indices = @transform_1, window_bounds = array<i64: 128, 128>}, {transform_indices = @transform_2, window_bounds = array<i64: 1, 128>}, {transform_indices = @transform_3, window_bounds = array<i64: 16, 128>}, {transform_indices = @transform_4, window_bounds = array<i64: 16, 128>}]} {
    %c0_i32 = arith.constant 0 : i32
    %0 = arith.cmpi eq, %arg2, %c0_i32 : i32
    %1 = arith.extui %0 : i1 to i32
    %c0_i32_0 = arith.constant 0 : i32
    %2 = arith.cmpi ne, %1, %c0_i32_0 : i32
    scf.if %2 {
      %cst_10 = arith.constant 0.000000e+00 : f32
      %12 = vector.broadcast %cst_10 : f32 to vector<16x128xf32>
      %c0_11 = arith.constant 0 : index
      %c0_12 = arith.constant 0 : index
      %13 = vector.load %arg8[%c0_11, %c0_12] : memref<16x128xf32, #tpu.memory_space<vmem>>, vector<16x128xf32>
      tpu.vector_store %arg8[%c0_11, %c0_12], %12 {strides = array<i32>} : memref<16x128xf32, #tpu.memory_space<vmem>>, vector<16x128xf32>,
    } else {
    }
    %c0 = arith.constant 0 : index
    %c0_1 = arith.constant 0 : index
    %3 = vector.load %arg8[%c0, %c0_1] : memref<16x128xf32, #tpu.memory_space<vmem>>, vector<16x128xf32>
    %c0_2 = arith.constant 0 : index
    %c0_3 = arith.constant 0 : index
    %4 = vector.load %arg3[%c0_2, %c0_3] : memref<16x128xbf16, #tpu.memory_space<vmem>>, vector<16x128xbf16>
    %c0_4 = arith.constant 0 : index
    %c0_5 = arith.constant 0 : index
    %5 = vector.load %arg4[%c0_4, %c0_5] : memref<128x128xbf16, #tpu.memory_space<vmem>>, vector<128x128xbf16>
    %cst = arith.constant dense<0.000000e+00> : vector<16x128xf32>
    %6 = tpu.matmul %4, %5, %cst {dimension_numbers = #tpu.dot_dimension_numbers<[1], [0], [0], [1], [0, 0, 1, 1], [], []>} : vector<16x128xbf16>, vector<128x128xbf16>, vector<16x128xf32> -> vector<16x128xf32>
    %7 = arith.addf %3, %6 : vector<16x128xf32>
    %c0_6 = arith.constant 0 : index
    %c0_7 = arith.constant 0 : index
    %8 = vector.load %arg8[%c0_6, %c0_7] : memref<16x128xf32, #tpu.memory_space<vmem>>, vector<16x128xf32>
    tpu.vector_store %arg8[%c0_6, %c0_7], %7 {strides = array<i32>} : memref<16x128xf32, #tpu.memory_space<vmem>>, vector<16x128xf32>,
    %c0_i32_8 = arith.constant 0 : i32
    %9 = arith.cmpi eq, %arg2, %c0_i32_8 : i32
    %10 = arith.extui %9 : i1 to i32
    %c0_i32_9 = arith.constant 0 : i32
    %11 = arith.cmpi ne, %10, %c0_i32_9 : i32
    scf.if %11 {
      %c0_10 = arith.constant 0 : index
      %c0_11 = arith.constant 0 : index
      %12 = vector.load %arg8[%c0_10, %c0_11] : memref<16x128xf32, #tpu.memory_space<vmem>>, vector<16x128xf32>
      %c0_12 = arith.constant 0 : index
      %c0_13 = arith.constant 0 : index
      %13 = vector.load %arg5[%c0_12, %c0_13] : memref<1x128xf32, #tpu.memory_space<vmem>>, vector<1x128xf32>
      %14 = vector.broadcast %13 : vector<1x128xf32> to vector<16x128xf32>
      %15 = arith.addf %12, %14 : vector<16x128xf32>
      %c0_14 = arith.constant 0 : index
      %c0_15 = arith.constant 0 : index
      %16 = vector.load %arg6[%c0_14, %c0_15] : memref<16x128xbf16, #tpu.memory_space<vmem>>, vector<16x128xbf16>
      %17 = arith.extf %16 : vector<16x128xbf16> to vector<16x128xf32>
      %18 = arith.addf %15, %17 : vector<16x128xf32>
      %cst_16 = arith.constant 0.000000e+00 : f32
      %19 = vector.broadcast %cst_16 : f32 to vector<16x128xf32>
      %20 = arith.maximumf %18, %19 : vector<16x128xf32>
      %21 = arith.truncf %20 : vector<16x128xf32> to vector<16x128xbf16>
      %c0_17 = arith.constant 0 : index
      %c0_18 = arith.constant 0 : index
      %22 = vector.load %arg7[%c0_17, %c0_18] : memref<16x128xbf16, #tpu.memory_space<vmem>>, vector<16x128xbf16>
      tpu.vector_store %arg7[%c0_17, %c0_18], %21 {strides = array<i32>} : memref<16x128xbf16, #tpu.memory_space<vmem>>, vector<16x128xbf16>,
    } else {
    }
    return
  }
  func.func @transform_0(%arg0: i32, %arg1: i32, %arg2: i32) -> (i32, i32) {
    %c0_i32 = arith.constant 0 : i32
    return %arg0, %arg2 : i32, i32
  }
  func.func @transform_1(%arg0: i32, %arg1: i32, %arg2: i32) -> (i32, i32) {
    %c0_i32 = arith.constant 0 : i32
    return %arg2, %arg1 : i32, i32
  }
  func.func @transform_2(%arg0: i32, %arg1: i32, %arg2: i32) -> (i32, i32) {
    %c0_i32 = arith.constant 0 : i32
    %c0_i32_0 = arith.constant 0 : i32
    return %c0_i32, %arg1 : i32, i32
  }
  func.func @transform_3(%arg0: i32, %arg1: i32, %arg2: i32) -> (i32, i32) {
    %c0_i32 = arith.constant 0 : i32
    return %arg0, %arg1 : i32, i32
  }
  func.func @transform_4(%arg0: i32, %arg1: i32, %arg2: i32) -> (i32, i32) {
    %c0_i32 = arith.constant 0 : i32
    return %arg0, %arg1 : i32, i32
  }
}

module attributes {stable_mosaic.version = 11 : i64} {
  func.func @_matmul_epilogue_kernel(%arg0: i32, %arg1: i32, %arg2: i32, %arg3: memref<16x128xbf16, #tpu.memory_space<vmem>>, %arg4: memref<128x128xbf16, #tpu.memory_space<vmem>>, %arg5: memref<1x128xf32, #tpu.memory_space<vmem>>, %arg6: memref<16x128xbf16, #tpu.memory_space<vmem>>, %arg7: memref<16x128xf32, #tpu.memory_space<vmem>>) attributes {dimension_semantics = [#tpu.dimension_semantics<parallel>, #tpu.dimension_semantics<parallel>, #tpu.dimension_semantics<arbitrary>], iteration_bounds = array<i64: 1, 1, 1>, scalar_prefetch = 0 : i64, scratch_operands = 1 : i64, tpu.core_type = #tpu.core_type<tc>, window_params = [{transform_indices = @transform_0, window_bounds = array<i64: 16, 128>}, {transform_indices = @transform_1, window_bounds = array<i64: 128, 128>}, {transform_indices = @transform_2, window_bounds = array<i64: 1, 128>}, {transform_indices = @transform_3, window_bounds = array<i64: 16, 128>}]} {
    %c0_i32 = arith.constant 0 : i32
    %0 = arith.cmpi eq, %arg2, %c0_i32 : i32
    %1 = arith.extui %0 : i1 to i32
    %c0_i32_0 = arith.constant 0 : i32
    %2 = arith.cmpi ne, %1, %c0_i32_0 : i32
    scf.if %2 {
      %cst_10 = arith.constant 0.000000e+00 : f32
      %12 = vector.broadcast %cst_10 : f32 to vector<16x128xf32>
      %c0_11 = arith.constant 0 : index
      %c0_12 = arith.constant 0 : index
      %13 = vector.load %arg7[%c0_11, %c0_12] : memref<16x128xf32, #tpu.memory_space<vmem>>, vector<16x128xf32>
      tpu.vector_store %arg7[%c0_11, %c0_12], %12 {strides = array<i32>} : memref<16x128xf32, #tpu.memory_space<vmem>>, vector<16x128xf32>,
    } else {
    }
    %c0 = arith.constant 0 : index
    %c0_1 = arith.constant 0 : index
    %3 = vector.load %arg7[%c0, %c0_1] : memref<16x128xf32, #tpu.memory_space<vmem>>, vector<16x128xf32>
    %c0_2 = arith.constant 0 : index
    %c0_3 = arith.constant 0 : index
    %4 = vector.load %arg3[%c0_2, %c0_3] : memref<16x128xbf16, #tpu.memory_space<vmem>>, vector<16x128xbf16>
    %c0_4 = arith.constant 0 : index
    %c0_5 = arith.constant 0 : index
    %5 = vector.load %arg4[%c0_4, %c0_5] : memref<128x128xbf16, #tpu.memory_space<vmem>>, vector<128x128xbf16>
    %cst = arith.constant dense<0.000000e+00> : vector<16x128xf32>
    %6 = tpu.matmul %4, %5, %cst {dimension_numbers = #tpu.dot_dimension_numbers<[1], [0], [0], [1], [0, 0, 1, 1], [], []>} : vector<16x128xbf16>, vector<128x128xbf16>, vector<16x128xf32> -> vector<16x128xf32>
    %7 = arith.addf %3, %6 : vector<16x128xf32>
    %c0_6 = arith.constant 0 : index
    %c0_7 = arith.constant 0 : index
    %8 = vector.load %arg7[%c0_6, %c0_7] : memref<16x128xf32, #tpu.memory_space<vmem>>, vector<16x128xf32>
    tpu.vector_store %arg7[%c0_6, %c0_7], %7 {strides = array<i32>} : memref<16x128xf32, #tpu.memory_space<vmem>>, vector<16x128xf32>,
    %c0_i32_8 = arith.constant 0 : i32
    %9 = arith.cmpi eq, %arg2, %c0_i32_8 : i32
    %10 = arith.extui %9 : i1 to i32
    %c0_i32_9 = arith.constant 0 : i32
    %11 = arith.cmpi ne, %10, %c0_i32_9 : i32
    scf.if %11 {
      %c0_10 = arith.constant 0 : index
      %c0_11 = arith.constant 0 : index
      %12 = vector.load %arg7[%c0_10, %c0_11] : memref<16x128xf32, #tpu.memory_space<vmem>>, vector<16x128xf32>
      %c0_12 = arith.constant 0 : index
      %c0_13 = arith.constant 0 : index
      %13 = vector.load %arg5[%c0_12, %c0_13] : memref<1x128xf32, #tpu.memory_space<vmem>>, vector<1x128xf32>
      %14 = vector.broadcast %13 : vector<1x128xf32> to vector<16x128xf32>
      %15 = arith.addf %12, %14 : vector<16x128xf32>
      %16 = arith.truncf %15 : vector<16x128xf32> to vector<16x128xbf16>
      %c0_14 = arith.constant 0 : index
      %c0_15 = arith.constant 0 : index
      %17 = vector.load %arg6[%c0_14, %c0_15] : memref<16x128xbf16, #tpu.memory_space<vmem>>, vector<16x128xbf16>
      tpu.vector_store %arg6[%c0_14, %c0_15], %16 {strides = array<i32>} : memref<16x128xbf16, #tpu.memory_space<vmem>>, vector<16x128xbf16>,
    } else {
    }
    return
  }
  func.func @transform_0(%arg0: i32, %arg1: i32, %arg2: i32) -> (i32, i32) {
    %c0_i32 = arith.constant 0 : i32
    return %arg0, %arg2 : i32, i32
  }
  func.func @transform_1(%arg0: i32, %arg1: i32, %arg2: i32) -> (i32, i32) {
    %c0_i32 = arith.constant 0 : i32
    return %arg2, %arg1 : i32, i32
  }
  func.func @transform_2(%arg0: i32, %arg1: i32, %arg2: i32) -> (i32, i32) {
    %c0_i32 = arith.constant 0 : i32
    %c0_i32_0 = arith.constant 0 : i32
    return %c0_i32, %arg1 : i32, i32
  }
  func.func @transform_3(%arg0: i32, %arg1: i32, %arg2: i32) -> (i32, i32) {
    %c0_i32 = arith.constant 0 : i32
    return %arg0, %arg1 : i32, i32
  }
}

module attributes {stable_mosaic.version = 11 : i64} {
  func.func @_matmul_epilogue_kernel(%arg0: i32, %arg1: i32, %arg2: i32, %arg3: memref<16x128xbf16, #tpu.memory_space<vmem>>, %arg4: memref<128x128xbf16, #tpu.memory_space<vmem>>, %arg5: memref<1x128xf32, #tpu.memory_space<vmem>>, %arg6: memref<16x128xbf16, #tpu.memory_space<vmem>>, %arg7: memref<16x128xf32, #tpu.memory_space<vmem>>) attributes {dimension_semantics = [#tpu.dimension_semantics<parallel>, #tpu.dimension_semantics<parallel>, #tpu.dimension_semantics<arbitrary>], iteration_bounds = array<i64: 1, 1, 1>, scalar_prefetch = 0 : i64, scratch_operands = 1 : i64, tpu.core_type = #tpu.core_type<tc>, window_params = [{transform_indices = @transform_0, window_bounds = array<i64: 16, 128>}, {transform_indices = @transform_1, window_bounds = array<i64: 128, 128>}, {transform_indices = @transform_2, window_bounds = array<i64: 1, 128>}, {transform_indices = @transform_3, window_bounds = array<i64: 16, 128>}]} {
    %c0_i32 = arith.constant 0 : i32
    %0 = arith.cmpi eq, %arg2, %c0_i32 : i32
    %1 = arith.extui %0 : i1 to i32
    %c0_i32_0 = arith.constant 0 : i32
    %2 = arith.cmpi ne, %1, %c0_i32_0 : i32
    scf.if %2 {
      %cst_10 = arith.constant 0.000000e+00 : f32
      %12 = vector.broadcast %cst_10 : f32 to vector<16x128xf32>
      %c0_11 = arith.constant 0 : index
      %c0_12 = arith.constant 0 : index
      %13 = vector.load %arg7[%c0_11, %c0_12] : memref<16x128xf32, #tpu.memory_space<vmem>>, vector<16x128xf32>
      tpu.vector_store %arg7[%c0_11, %c0_12], %12 {strides = array<i32>} : memref<16x128xf32, #tpu.memory_space<vmem>>, vector<16x128xf32>,
    } else {
    }
    %c0 = arith.constant 0 : index
    %c0_1 = arith.constant 0 : index
    %3 = vector.load %arg7[%c0, %c0_1] : memref<16x128xf32, #tpu.memory_space<vmem>>, vector<16x128xf32>
    %c0_2 = arith.constant 0 : index
    %c0_3 = arith.constant 0 : index
    %4 = vector.load %arg3[%c0_2, %c0_3] : memref<16x128xbf16, #tpu.memory_space<vmem>>, vector<16x128xbf16>
    %c0_4 = arith.constant 0 : index
    %c0_5 = arith.constant 0 : index
    %5 = vector.load %arg4[%c0_4, %c0_5] : memref<128x128xbf16, #tpu.memory_space<vmem>>, vector<128x128xbf16>
    %cst = arith.constant dense<0.000000e+00> : vector<16x128xf32>
    %6 = tpu.matmul %4, %5, %cst {dimension_numbers = #tpu.dot_dimension_numbers<[1], [0], [0], [1], [0, 0, 1, 1], [], []>} : vector<16x128xbf16>, vector<128x128xbf16>, vector<16x128xf32> -> vector<16x128xf32>
    %7 = arith.addf %3, %6 : vector<16x128xf32>
    %c0_6 = arith.constant 0 : index
    %c0_7 = arith.constant 0 : index
    %8 = vector.load %arg7[%c0_6, %c0_7] : memref<16x128xf32, #tpu.memory_space<vmem>>, vector<16x128xf32>
    tpu.vector_store %arg7[%c0_6, %c0_7], %7 {strides = array<i32>} : memref<16x128xf32, #tpu.memory_space<vmem>>, vector<16x128xf32>,
    %c0_i32_8 = arith.constant 0 : i32
    %9 = arith.cmpi eq, %arg2, %c0_i32_8 : i32
    %10 = arith.extui %9 : i1 to i32
    %c0_i32_9 = arith.constant 0 : i32
    %11 = arith.cmpi ne, %10, %c0_i32_9 : i32
    scf.if %11 {
      %c0_10 = arith.constant 0 : index
      %c0_11 = arith.constant 0 : index
      %12 = vector.load %arg7[%c0_10, %c0_11] : memref<16x128xf32, #tpu.memory_space<vmem>>, vector<16x128xf32>
      %c0_12 = arith.constant 0 : index
      %c0_13 = arith.constant 0 : index
      %13 = vector.load %arg5[%c0_12, %c0_13] : memref<1x128xf32, #tpu.memory_space<vmem>>, vector<1x128xf32>
      %14 = vector.broadcast %13 : vector<1x128xf32> to vector<16x128xf32>
      %15 = arith.addf %12, %14 : vector<16x128xf32>
      %cst_14 = arith.constant 0.000000e+00 : f32
      %16 = vector.broadcast %cst_14 : f32 to vector<16x128xf32>
      %17 = arith.maximumf %15, %16 : vector<16x128xf32>
      %18 = arith.truncf %17 : vector<16x128xf32> to vector<16x128xbf16>
      %c0_15 = arith.constant 0 : index
      %c0_16 = arith.constant 0 : index
      %19 = vector.load %arg6[%c0_15, %c0_16] : memref<16x128xbf16, #tpu.memory_space<vmem>>, vector<16x128xbf16>
      tpu.vector_store %arg6[%c0_15, %c0_16], %18 {strides = array<i32>} : memref<16x128xbf16, #tpu.memory_space<vmem>>, vector<16x128xbf16>,
    } else {
    }
    return
  }
  func.func @transform_0(%arg0: i32, %arg1: i32, %arg2: i32) -> (i32, i32) {
    %c0_i32 = arith.constant 0 : i32
    return %arg0, %arg2 : i32, i32
  }
  func.func @transform_1(%arg0: i32, %arg1: i32, %arg2: i32) -> (i32, i32) {
    %c0_i32 = arith.constant 0 : i32
    return %arg2, %arg1 : i32, i32
  }
  func.func @transform_2(%arg0: i32, %arg1: i32, %arg2: i32) -> (i32, i32) {
    %c0_i32 = arith.constant 0 : i32
    %c0_i32_0 = arith.constant 0 : i32
    return %c0_i32, %arg1 : i32, i32
  }
  func.func @transform_3(%arg0: i32, %arg1: i32, %arg2: i32) -> (i32, i32) {
    %c0_i32 = arith.constant 0 : i32
    return %arg0, %arg1 : i32, i32
  }
}

module attributes {stable_mosaic.version = 11 : i64} {
  func.func @_matmul_epilogue_kernel(%arg0: i32, %arg1: i32, %arg2: i32, %arg3: memref<16x384xbf16, #tpu.memory_space<vmem>>, %arg4: memref<384x128xbf16, #tpu.memory_space<vmem>>, %arg5: memref<1x128xf32, #tpu.memory_space<vmem>>, %arg6: memref<16x128xbf16, #tpu.memory_space<vmem>>, %arg7: memref<16x128xf32, #tpu.memory_space<vmem>>) attributes {dimension_semantics = [#tpu.dimension_semantics<parallel>, #tpu.dimension_semantics<parallel>, #tpu.dimension_semantics<arbitrary>], iteration_bounds = array<i64: 1, 1, 1>, scalar_prefetch = 0 : i64, scratch_operands = 1 : i64, tpu.core_type = #tpu.core_type<tc>, window_params = [{transform_indices = @transform_0, window_bounds = array<i64: 16, 384>}, {transform_indices = @transform_1, window_bounds = array<i64: 384, 128>}, {transform_indices = @transform_2, window_bounds = array<i64: 1, 128>}, {transform_indices = @transform_3, window_bounds = array<i64: 16, 128>}]} {
    %c0_i32 = arith.constant 0 : i32
    %0 = arith.cmpi eq, %arg2, %c0_i32 : i32
    %1 = arith.extui %0 : i1 to i32
    %c0_i32_0 = arith.constant 0 : i32
    %2 = arith.cmpi ne, %1, %c0_i32_0 : i32
    scf.if %2 {
      %cst_10 = arith.constant 0.000000e+00 : f32
      %12 = vector.broadcast %cst_10 : f32 to vector<16x128xf32>
      %c0_11 = arith.constant 0 : index
      %c0_12 = arith.constant 0 : index
      %13 = vector.load %arg7[%c0_11, %c0_12] : memref<16x128xf32, #tpu.memory_space<vmem>>, vector<16x128xf32>
      tpu.vector_store %arg7[%c0_11, %c0_12], %12 {strides = array<i32>} : memref<16x128xf32, #tpu.memory_space<vmem>>, vector<16x128xf32>,
    } else {
    }
    %c0 = arith.constant 0 : index
    %c0_1 = arith.constant 0 : index
    %3 = vector.load %arg7[%c0, %c0_1] : memref<16x128xf32, #tpu.memory_space<vmem>>, vector<16x128xf32>
    %c0_2 = arith.constant 0 : index
    %c0_3 = arith.constant 0 : index
    %4 = vector.load %arg3[%c0_2, %c0_3] : memref<16x384xbf16, #tpu.memory_space<vmem>>, vector<16x384xbf16>
    %c0_4 = arith.constant 0 : index
    %c0_5 = arith.constant 0 : index
    %5 = vector.load %arg4[%c0_4, %c0_5] : memref<384x128xbf16, #tpu.memory_space<vmem>>, vector<384x128xbf16>
    %cst = arith.constant dense<0.000000e+00> : vector<16x128xf32>
    %6 = tpu.matmul %4, %5, %cst {dimension_numbers = #tpu.dot_dimension_numbers<[1], [0], [0], [1], [0, 0, 1, 1], [], []>} : vector<16x384xbf16>, vector<384x128xbf16>, vector<16x128xf32> -> vector<16x128xf32>
    %7 = arith.addf %3, %6 : vector<16x128xf32>
    %c0_6 = arith.constant 0 : index
    %c0_7 = arith.constant 0 : index
    %8 = vector.load %arg7[%c0_6, %c0_7] : memref<16x128xf32, #tpu.memory_space<vmem>>, vector<16x128xf32>
    tpu.vector_store %arg7[%c0_6, %c0_7], %7 {strides = array<i32>} : memref<16x128xf32, #tpu.memory_space<vmem>>, vector<16x128xf32>,
    %c0_i32_8 = arith.constant 0 : i32
    %9 = arith.cmpi eq, %arg2, %c0_i32_8 : i32
    %10 = arith.extui %9 : i1 to i32
    %c0_i32_9 = arith.constant 0 : i32
    %11 = arith.cmpi ne, %10, %c0_i32_9 : i32
    scf.if %11 {
      %c0_10 = arith.constant 0 : index
      %c0_11 = arith.constant 0 : index
      %12 = vector.load %arg7[%c0_10, %c0_11] : memref<16x128xf32, #tpu.memory_space<vmem>>, vector<16x128xf32>
      %c0_12 = arith.constant 0 : index
      %c0_13 = arith.constant 0 : index
      %13 = vector.load %arg5[%c0_12, %c0_13] : memref<1x128xf32, #tpu.memory_space<vmem>>, vector<1x128xf32>
      %14 = vector.broadcast %13 : vector<1x128xf32> to vector<16x128xf32>
      %15 = arith.addf %12, %14 : vector<16x128xf32>
      %cst_14 = arith.constant 0.000000e+00 : f32
      %16 = vector.broadcast %cst_14 : f32 to vector<16x128xf32>
      %17 = arith.maximumf %15, %16 : vector<16x128xf32>
      %18 = arith.truncf %17 : vector<16x128xf32> to vector<16x128xbf16>
      %c0_15 = arith.constant 0 : index
      %c0_16 = arith.constant 0 : index
      %19 = vector.load %arg6[%c0_15, %c0_16] : memref<16x128xbf16, #tpu.memory_space<vmem>>, vector<16x128xbf16>
      tpu.vector_store %arg6[%c0_15, %c0_16], %18 {strides = array<i32>} : memref<16x128xbf16, #tpu.memory_space<vmem>>, vector<16x128xbf16>,
    } else {
    }
    return
  }
  func.func @transform_0(%arg0: i32, %arg1: i32, %arg2: i32) -> (i32, i32) {
    %c0_i32 = arith.constant 0 : i32
    return %arg0, %arg2 : i32, i32
  }
  func.func @transform_1(%arg0: i32, %arg1: i32, %arg2: i32) -> (i32, i32) {
    %c0_i32 = arith.constant 0 : i32
    return %arg2, %arg1 : i32, i32
  }
  func.func @transform_2(%arg0: i32, %arg1: i32, %arg2: i32) -> (i32, i32) {
    %c0_i32 = arith.constant 0 : i32
    %c0_i32_0 = arith.constant 0 : i32
    return %c0_i32, %arg1 : i32, i32
  }
  func.func @transform_3(%arg0: i32, %arg1: i32, %arg2: i32) -> (i32, i32) {
    %c0_i32 = arith.constant 0 : i32
    return %arg0, %arg1 : i32, i32
  }
}

module attributes {stable_mosaic.version = 11 : i64} {
  func.func @_matmul_epilogue_kernel(%arg0: i32, %arg1: i32, %arg2: i32, %arg3: memref<16x128xbf16, #tpu.memory_space<vmem>>, %arg4: memref<128x128xbf16, #tpu.memory_space<vmem>>, %arg5: memref<1x128xf32, #tpu.memory_space<vmem>>, %arg6: memref<16x128xbf16, #tpu.memory_space<vmem>>, %arg7: memref<16x128xf32, #tpu.memory_space<vmem>>) attributes {dimension_semantics = [#tpu.dimension_semantics<parallel>, #tpu.dimension_semantics<parallel>, #tpu.dimension_semantics<arbitrary>], iteration_bounds = array<i64: 1, 2, 1>, scalar_prefetch = 0 : i64, scratch_operands = 1 : i64, tpu.core_type = #tpu.core_type<tc>, window_params = [{transform_indices = @transform_0, window_bounds = array<i64: 16, 128>}, {transform_indices = @transform_1, window_bounds = array<i64: 128, 128>}, {transform_indices = @transform_2, window_bounds = array<i64: 1, 128>}, {transform_indices = @transform_3, window_bounds = array<i64: 16, 128>}]} {
    %c0_i32 = arith.constant 0 : i32
    %0 = arith.cmpi eq, %arg2, %c0_i32 : i32
    %1 = arith.extui %0 : i1 to i32
    %c0_i32_0 = arith.constant 0 : i32
    %2 = arith.cmpi ne, %1, %c0_i32_0 : i32
    scf.if %2 {
      %cst_10 = arith.constant 0.000000e+00 : f32
      %12 = vector.broadcast %cst_10 : f32 to vector<16x128xf32>
      %c0_11 = arith.constant 0 : index
      %c0_12 = arith.constant 0 : index
      %13 = vector.load %arg7[%c0_11, %c0_12] : memref<16x128xf32, #tpu.memory_space<vmem>>, vector<16x128xf32>
      tpu.vector_store %arg7[%c0_11, %c0_12], %12 {strides = array<i32>} : memref<16x128xf32, #tpu.memory_space<vmem>>, vector<16x128xf32>,
    } else {
    }
    %c0 = arith.constant 0 : index
    %c0_1 = arith.constant 0 : index
    %3 = vector.load %arg7[%c0, %c0_1] : memref<16x128xf32, #tpu.memory_space<vmem>>, vector<16x128xf32>
    %c0_2 = arith.constant 0 : index
    %c0_3 = arith.constant 0 : index
    %4 = vector.load %arg3[%c0_2, %c0_3] : memref<16x128xbf16, #tpu.memory_space<vmem>>, vector<16x128xbf16>
    %c0_4 = arith.constant 0 : index
    %c0_5 = arith.constant 0 : index
    %5 = vector.load %arg4[%c0_4, %c0_5] : memref<128x128xbf16, #tpu.memory_space<vmem>>, vector<128x128xbf16>
    %cst = arith.constant dense<0.000000e+00> : vector<16x128xf32>
    %6 = tpu.matmul %4, %5, %cst {dimension_numbers = #tpu.dot_dimension_numbers<[1], [0], [0], [1], [0, 0, 1, 1], [], []>} : vector<16x128xbf16>, vector<128x128xbf16>, vector<16x128xf32> -> vector<16x128xf32>
    %7 = arith.addf %3, %6 : vector<16x128xf32>
    %c0_6 = arith.constant 0 : index
    %c0_7 = arith.constant 0 : index
    %8 = vector.load %arg7[%c0_6, %c0_7] : memref<16x128xf32, #tpu.memory_space<vmem>>, vector<16x128xf32>
    tpu.vector_store %arg7[%c0_6, %c0_7], %7 {strides = array<i32>} : memref<16x128xf32, #tpu.memory_space<vmem>>, vector<16x128xf32>,
    %c0_i32_8 = arith.constant 0 : i32
    %9 = arith.cmpi eq, %arg2, %c0_i32_8 : i32
    %10 = arith.extui %9 : i1 to i32
    %c0_i32_9 = arith.constant 0 : i32
    %11 = arith.cmpi ne, %10, %c0_i32_9 : i32
    scf.if %11 {
      %c0_10 = arith.constant 0 : index
      %c0_11 = arith.constant 0 : index
      %12 = vector.load %arg7[%c0_10, %c0_11] : memref<16x128xf32, #tpu.memory_space<vmem>>, vector<16x128xf32>
      %c0_12 = arith.constant 0 : index
      %c0_13 = arith.constant 0 : index
      %13 = vector.load %arg5[%c0_12, %c0_13] : memref<1x128xf32, #tpu.memory_space<vmem>>, vector<1x128xf32>
      %14 = vector.broadcast %13 : vector<1x128xf32> to vector<16x128xf32>
      %15 = arith.addf %12, %14 : vector<16x128xf32>
      %16 = arith.truncf %15 : vector<16x128xf32> to vector<16x128xbf16>
      %c0_14 = arith.constant 0 : index
      %c0_15 = arith.constant 0 : index
      %17 = vector.load %arg6[%c0_14, %c0_15] : memref<16x128xbf16, #tpu.memory_space<vmem>>, vector<16x128xbf16>
      tpu.vector_store %arg6[%c0_14, %c0_15], %16 {strides = array<i32>} : memref<16x128xbf16, #tpu.memory_space<vmem>>, vector<16x128xbf16>,
    } else {
    }
    return
  }
  func.func @transform_0(%arg0: i32, %arg1: i32, %arg2: i32) -> (i32, i32) {
    %c0_i32 = arith.constant 0 : i32
    return %arg0, %arg2 : i32, i32
  }
  func.func @transform_1(%arg0: i32, %arg1: i32, %arg2: i32) -> (i32, i32) {
    %c0_i32 = arith.constant 0 : i32
    return %arg2, %arg1 : i32, i32
  }
  func.func @transform_2(%arg0: i32, %arg1: i32, %arg2: i32) -> (i32, i32) {
    %c0_i32 = arith.constant 0 : i32
    %c0_i32_0 = arith.constant 0 : i32
    return %c0_i32, %arg1 : i32, i32
  }
  func.func @transform_3(%arg0: i32, %arg1: i32, %arg2: i32) -> (i32, i32) {
    %c0_i32 = arith.constant 0 : i32
    return %arg0, %arg1 : i32, i32
  }
}

module attributes {stable_mosaic.version = 11 : i64} {
  func.func @_matmul_epilogue_kernel(%arg0: i32, %arg1: i32, %arg2: i32, %arg3: memref<16x512xbf16, #tpu.memory_space<vmem>>, %arg4: memref<512x128xbf16, #tpu.memory_space<vmem>>, %arg5: memref<1x128xf32, #tpu.memory_space<vmem>>, %arg6: memref<16x128xbf16, #tpu.memory_space<vmem>>, %arg7: memref<16x128xf32, #tpu.memory_space<vmem>>) attributes {dimension_semantics = [#tpu.dimension_semantics<parallel>, #tpu.dimension_semantics<parallel>, #tpu.dimension_semantics<arbitrary>], iteration_bounds = array<i64: 1, 1, 2>, scalar_prefetch = 0 : i64, scratch_operands = 1 : i64, tpu.core_type = #tpu.core_type<tc>, window_params = [{transform_indices = @transform_0, window_bounds = array<i64: 16, 512>}, {transform_indices = @transform_1, window_bounds = array<i64: 512, 128>}, {transform_indices = @transform_2, window_bounds = array<i64: 1, 128>}, {transform_indices = @transform_3, window_bounds = array<i64: 16, 128>}]} {
    %c0_i32 = arith.constant 0 : i32
    %0 = arith.cmpi eq, %arg2, %c0_i32 : i32
    %1 = arith.extui %0 : i1 to i32
    %c0_i32_0 = arith.constant 0 : i32
    %2 = arith.cmpi ne, %1, %c0_i32_0 : i32
    scf.if %2 {
      %cst_9 = arith.constant 0.000000e+00 : f32
      %12 = vector.broadcast %cst_9 : f32 to vector<16x128xf32>
      %c0_10 = arith.constant 0 : index
      %c0_11 = arith.constant 0 : index
      %13 = vector.load %arg7[%c0_10, %c0_11] : memref<16x128xf32, #tpu.memory_space<vmem>>, vector<16x128xf32>
      tpu.vector_store %arg7[%c0_10, %c0_11], %12 {strides = array<i32>} : memref<16x128xf32, #tpu.memory_space<vmem>>, vector<16x128xf32>,
    } else {
    }
    %c0 = arith.constant 0 : index
    %c0_1 = arith.constant 0 : index
    %3 = vector.load %arg7[%c0, %c0_1] : memref<16x128xf32, #tpu.memory_space<vmem>>, vector<16x128xf32>
    %c0_2 = arith.constant 0 : index
    %c0_3 = arith.constant 0 : index
    %4 = vector.load %arg3[%c0_2, %c0_3] : memref<16x512xbf16, #tpu.memory_space<vmem>>, vector<16x512xbf16>
    %c0_4 = arith.constant 0 : index
    %c0_5 = arith.constant 0 : index
    %5 = vector.load %arg4[%c0_4, %c0_5] : memref<512x128xbf16, #tpu.memory_space<vmem>>, vector<512x128xbf16>
    %cst = arith.constant dense<0.000000e+00> : vector<16x128xf32>
    %6 = tpu.matmul %4, %5, %cst {dimension_numbers = #tpu.dot_dimension_numbers<[1], [0], [0], [1], [0, 0, 1, 1], [], []>} : vector<16x512xbf16>, vector<512x128xbf16>, vector<16x128xf32> -> vector<16x128xf32>
    %7 = arith.addf %3, %6 : vector<16x128xf32>
    %c0_6 = arith.constant 0 : index
    %c0_7 = arith.constant 0 : index
    %8 = vector.load %arg7[%c0_6, %c0_7] : memref<16x128xf32, #tpu.memory_space<vmem>>, vector<16x128xf32>
    tpu.vector_store %arg7[%c0_6, %c0_7], %7 {strides = array<i32>} : memref<16x128xf32, #tpu.memory_space<vmem>>, vector<16x128xf32>,
    %c1_i32 = arith.constant 1 : i32
    %9 = arith.cmpi eq, %arg2, %c1_i32 : i32
    %10 = arith.extui %9 : i1 to i32
    %c0_i32_8 = arith.constant 0 : i32
    %11 = arith.cmpi ne, %10, %c0_i32_8 : i32
    scf.if %11 {
      %c0_9 = arith.constant 0 : index
      %c0_10 = arith.constant 0 : index
      %12 = vector.load %arg7[%c0_9, %c0_10] : memref<16x128xf32, #tpu.memory_space<vmem>>, vector<16x128xf32>
      %c0_11 = arith.constant 0 : index
      %c0_12 = arith.constant 0 : index
      %13 = vector.load %arg5[%c0_11, %c0_12] : memref<1x128xf32, #tpu.memory_space<vmem>>, vector<1x128xf32>
      %14 = vector.broadcast %13 : vector<1x128xf32> to vector<16x128xf32>
      %15 = arith.addf %12, %14 : vector<16x128xf32>
      %cst_13 = arith.constant 0.000000e+00 : f32
      %16 = vector.broadcast %cst_13 : f32 to vector<16x128xf32>
      %17 = arith.maximumf %15, %16 : vector<16x128xf32>
      %18 = arith.truncf %17 : vector<16x128xf32> to vector<16x128xbf16>
      %c0_14 = arith.constant 0 : index
      %c0_15 = arith.constant 0 : index
      %19 = vector.load %arg6[%c0_14, %c0_15] : memref<16x128xbf16, #tpu.memory_space<vmem>>, vector<16x128xbf16>
      tpu.vector_store %arg6[%c0_14, %c0_15], %18 {strides = array<i32>} : memref<16x128xbf16, #tpu.memory_space<vmem>>, vector<16x128xbf16>,
    } else {
    }
    return
  }
  func.func @transform_0(%arg0: i32, %arg1: i32, %arg2: i32) -> (i32, i32) {
    %c0_i32 = arith.constant 0 : i32
    return %arg0, %arg2 : i32, i32
  }
  func.func @transform_1(%arg0: i32, %arg1: i32, %arg2: i32) -> (i32, i32) {
    %c0_i32 = arith.constant 0 : i32
    return %arg2, %arg1 : i32, i32
  }
  func.func @transform_2(%arg0: i32, %arg1: i32, %arg2: i32) -> (i32, i32) {
    %c0_i32 = arith.constant 0 : i32
    %c0_i32_0 = arith.constant 0 : i32
    return %c0_i32, %arg1 : i32, i32
  }
  func.func @transform_3(%arg0: i32, %arg1: i32, %arg2: i32) -> (i32, i32) {
    %c0_i32 = arith.constant 0 : i32
    return %arg0, %arg1 : i32, i32
  }
}

module attributes {stable_mosaic.version = 11 : i64} {
  func.func @_matmul_epilogue_kernel(%arg0: i32, %arg1: i32, %arg2: i32, %arg3: memref<16x128xbf16, #tpu.memory_space<vmem>>, %arg4: memref<128x128xbf16, #tpu.memory_space<vmem>>, %arg5: memref<1x128xf32, #tpu.memory_space<vmem>>, %arg6: memref<16x128xbf16, #tpu.memory_space<vmem>>, %arg7: memref<16x128xbf16, #tpu.memory_space<vmem>>, %arg8: memref<16x128xf32, #tpu.memory_space<vmem>>) attributes {dimension_semantics = [#tpu.dimension_semantics<parallel>, #tpu.dimension_semantics<parallel>, #tpu.dimension_semantics<arbitrary>], iteration_bounds = array<i64: 1, 2, 1>, scalar_prefetch = 0 : i64, scratch_operands = 1 : i64, tpu.core_type = #tpu.core_type<tc>, window_params = [{transform_indices = @transform_0, window_bounds = array<i64: 16, 128>}, {transform_indices = @transform_1, window_bounds = array<i64: 128, 128>}, {transform_indices = @transform_2, window_bounds = array<i64: 1, 128>}, {transform_indices = @transform_3, window_bounds = array<i64: 16, 128>}, {transform_indices = @transform_4, window_bounds = array<i64: 16, 128>}]} {
    %c0_i32 = arith.constant 0 : i32
    %0 = arith.cmpi eq, %arg2, %c0_i32 : i32
    %1 = arith.extui %0 : i1 to i32
    %c0_i32_0 = arith.constant 0 : i32
    %2 = arith.cmpi ne, %1, %c0_i32_0 : i32
    scf.if %2 {
      %cst_10 = arith.constant 0.000000e+00 : f32
      %12 = vector.broadcast %cst_10 : f32 to vector<16x128xf32>
      %c0_11 = arith.constant 0 : index
      %c0_12 = arith.constant 0 : index
      %13 = vector.load %arg8[%c0_11, %c0_12] : memref<16x128xf32, #tpu.memory_space<vmem>>, vector<16x128xf32>
      tpu.vector_store %arg8[%c0_11, %c0_12], %12 {strides = array<i32>} : memref<16x128xf32, #tpu.memory_space<vmem>>, vector<16x128xf32>,
    } else {
    }
    %c0 = arith.constant 0 : index
    %c0_1 = arith.constant 0 : index
    %3 = vector.load %arg8[%c0, %c0_1] : memref<16x128xf32, #tpu.memory_space<vmem>>, vector<16x128xf32>
    %c0_2 = arith.constant 0 : index
    %c0_3 = arith.constant 0 : index
    %4 = vector.load %arg3[%c0_2, %c0_3] : memref<16x128xbf16, #tpu.memory_space<vmem>>, vector<16x128xbf16>
    %c0_4 = arith.constant 0 : index
    %c0_5 = arith.constant 0 : index
    %5 = vector.load %arg4[%c0_4, %c0_5] : memref<128x128xbf16, #tpu.memory_space<vmem>>, vector<128x128xbf16>
    %cst = arith.constant dense<0.000000e+00> : vector<16x128xf32>
    %6 = tpu.matmul %4, %5, %cst {dimension_numbers = #tpu.dot_dimension_numbers<[1], [0], [0], [1], [0, 0, 1, 1], [], []>} : vector<16x128xbf16>, vector<128x128xbf16>, vector<16x128xf32> -> vector<16x128xf32>
    %7 = arith.addf %3, %6 : vector<16x128xf32>
    %c0_6 = arith.constant 0 : index
    %c0_7 = arith.constant 0 : index
    %8 = vector.load %arg8[%c0_6, %c0_7] : memref<16x128xf32, #tpu.memory_space<vmem>>, vector<16x128xf32>
    tpu.vector_store %arg8[%c0_6, %c0_7], %7 {strides = array<i32>} : memref<16x128xf32, #tpu.memory_space<vmem>>, vector<16x128xf32>,
    %c0_i32_8 = arith.constant 0 : i32
    %9 = arith.cmpi eq, %arg2, %c0_i32_8 : i32
    %10 = arith.extui %9 : i1 to i32
    %c0_i32_9 = arith.constant 0 : i32
    %11 = arith.cmpi ne, %10, %c0_i32_9 : i32
    scf.if %11 {
      %c0_10 = arith.constant 0 : index
      %c0_11 = arith.constant 0 : index
      %12 = vector.load %arg8[%c0_10, %c0_11] : memref<16x128xf32, #tpu.memory_space<vmem>>, vector<16x128xf32>
      %c0_12 = arith.constant 0 : index
      %c0_13 = arith.constant 0 : index
      %13 = vector.load %arg5[%c0_12, %c0_13] : memref<1x128xf32, #tpu.memory_space<vmem>>, vector<1x128xf32>
      %14 = vector.broadcast %13 : vector<1x128xf32> to vector<16x128xf32>
      %15 = arith.addf %12, %14 : vector<16x128xf32>
      %c0_14 = arith.constant 0 : index
      %c0_15 = arith.constant 0 : index
      %16 = vector.load %arg6[%c0_14, %c0_15] : memref<16x128xbf16, #tpu.memory_space<vmem>>, vector<16x128xbf16>
      %17 = arith.extf %16 : vector<16x128xbf16> to vector<16x128xf32>
      %18 = arith.addf %15, %17 : vector<16x128xf32>
      %cst_16 = arith.constant 0.000000e+00 : f32
      %19 = vector.broadcast %cst_16 : f32 to vector<16x128xf32>
      %20 = arith.maximumf %18, %19 : vector<16x128xf32>
      %21 = arith.truncf %20 : vector<16x128xf32> to vector<16x128xbf16>
      %c0_17 = arith.constant 0 : index
      %c0_18 = arith.constant 0 : index
      %22 = vector.load %arg7[%c0_17, %c0_18] : memref<16x128xbf16, #tpu.memory_space<vmem>>, vector<16x128xbf16>
      tpu.vector_store %arg7[%c0_17, %c0_18], %21 {strides = array<i32>} : memref<16x128xbf16, #tpu.memory_space<vmem>>, vector<16x128xbf16>,
    } else {
    }
    return
  }
  func.func @transform_0(%arg0: i32, %arg1: i32, %arg2: i32) -> (i32, i32) {
    %c0_i32 = arith.constant 0 : i32
    return %arg0, %arg2 : i32, i32
  }
  func.func @transform_1(%arg0: i32, %arg1: i32, %arg2: i32) -> (i32, i32) {
    %c0_i32 = arith.constant 0 : i32
    return %arg2, %arg1 : i32, i32
  }
  func.func @transform_2(%arg0: i32, %arg1: i32, %arg2: i32) -> (i32, i32) {
    %c0_i32 = arith.constant 0 : i32
    %c0_i32_0 = arith.constant 0 : i32
    return %c0_i32, %arg1 : i32, i32
  }
  func.func @transform_3(%arg0: i32, %arg1: i32, %arg2: i32) -> (i32, i32) {
    %c0_i32 = arith.constant 0 : i32
    return %arg0, %arg1 : i32, i32
  }
  func.func @transform_4(%arg0: i32, %arg1: i32, %arg2: i32) -> (i32, i32) {
    %c0_i32 = arith.constant 0 : i32
    return %arg0, %arg1 : i32, i32
  }
}

module attributes {stable_mosaic.version = 11 : i64} {
  func.func @_mean_reduce_kernel(%arg0: i32, %arg1: memref<2x1x256xbf16, #tpu.memory_space<vmem>>, %arg2: memref<2x256xf32, #tpu.memory_space<vmem>>) attributes {dimension_semantics = [#tpu.dimension_semantics<arbitrary>], iteration_bounds = array<i64: 1>, scalar_prefetch = 0 : i64, scratch_operands = 0 : i64, tpu.core_type = #tpu.core_type<tc>, window_params = [{pipeline_mode = #tpu.pipeline_mode<synchronous>, transform_indices = @transform_0, window_bounds = array<i64: 2, 1, 256>}, {pipeline_mode = #tpu.pipeline_mode<synchronous>, transform_indices = @transform_1, window_bounds = array<i64: 2, 256>}]} {
    %c0 = arith.constant 0 : index
    %c0_0 = arith.constant 0 : index
    %c0_1 = arith.constant 0 : index
    %0 = vector.load %arg1[%c0, %c0_0, %c0_1] : memref<2x1x256xbf16, #tpu.memory_space<vmem>>, vector<2x1x256xbf16>
    %1 = arith.extf %0 : vector<2x1x256xbf16> to vector<2x1x256xf32>
    %cst = arith.constant dense<0.000000e+00> : vector<2x256xf32>
    %2 = vector.multi_reduction <add>, %1, %cst [1] : vector<2x1x256xf32> to vector<2x256xf32>
    %cst_2 = arith.constant 1.000000e+00 : f32
    %3 = vector.broadcast %cst_2 : f32 to vector<2x256xf32>
    %4 = arith.divf %2, %3 : vector<2x256xf32>
    %c0_3 = arith.constant 0 : index
    %c0_4 = arith.constant 0 : index
    %5 = vector.load %arg2[%c0_3, %c0_4] : memref<2x256xf32, #tpu.memory_space<vmem>>, vector<2x256xf32>
    tpu.vector_store %arg2[%c0_3, %c0_4], %4 {strides = array<i32>} : memref<2x256xf32, #tpu.memory_space<vmem>>, vector<2x256xf32>,
    return
  }
  func.func @transform_0(%arg0: i32) -> (i32, i32, i32) {
    %c0_i32 = arith.constant 0 : i32
    %c0_i32_0 = arith.constant 0 : i32
    %c0_i32_1 = arith.constant 0 : i32
    %c0_i32_2 = arith.constant 0 : i32
    return %c0_i32, %c0_i32_0, %c0_i32_1 : i32, i32, i32
  }
  func.func @transform_1(%arg0: i32) -> (i32, i32) {
    %c0_i32 = arith.constant 0 : i32
    %c0_i32_0 = arith.constant 0 : i32
    %c0_i32_1 = arith.constant 0 : i32
    return %c0_i32, %c0_i32_0 : i32, i32
  }
}

module attributes {stable_mosaic.version = 11 : i64} {
  func.func @_matmul_epilogue_kernel(%arg0: i32, %arg1: i32, %arg2: i32, %arg3: memref<16x256xbf16, #tpu.memory_space<vmem>>, %arg4: memref<256x128xbf16, #tpu.memory_space<vmem>>, %arg5: memref<1x128xf32, #tpu.memory_space<vmem>>, %arg6: memref<16x128xf32, #tpu.memory_space<vmem>>, %arg7: memref<16x128xf32, #tpu.memory_space<vmem>>) attributes {dimension_semantics = [#tpu.dimension_semantics<parallel>, #tpu.dimension_semantics<parallel>, #tpu.dimension_semantics<arbitrary>], iteration_bounds = array<i64: 1, 1, 1>, scalar_prefetch = 0 : i64, scratch_operands = 1 : i64, tpu.core_type = #tpu.core_type<tc>, window_params = [{transform_indices = @transform_0, window_bounds = array<i64: 16, 256>}, {transform_indices = @transform_1, window_bounds = array<i64: 256, 128>}, {transform_indices = @transform_2, window_bounds = array<i64: 1, 128>}, {transform_indices = @transform_3, window_bounds = array<i64: 16, 128>}]} {
    %c0_i32 = arith.constant 0 : i32
    %0 = arith.cmpi eq, %arg2, %c0_i32 : i32
    %1 = arith.extui %0 : i1 to i32
    %c0_i32_0 = arith.constant 0 : i32
    %2 = arith.cmpi ne, %1, %c0_i32_0 : i32
    scf.if %2 {
      %cst_10 = arith.constant 0.000000e+00 : f32
      %12 = vector.broadcast %cst_10 : f32 to vector<16x128xf32>
      %c0_11 = arith.constant 0 : index
      %c0_12 = arith.constant 0 : index
      %13 = vector.load %arg7[%c0_11, %c0_12] : memref<16x128xf32, #tpu.memory_space<vmem>>, vector<16x128xf32>
      tpu.vector_store %arg7[%c0_11, %c0_12], %12 {strides = array<i32>} : memref<16x128xf32, #tpu.memory_space<vmem>>, vector<16x128xf32>,
    } else {
    }
    %c0 = arith.constant 0 : index
    %c0_1 = arith.constant 0 : index
    %3 = vector.load %arg7[%c0, %c0_1] : memref<16x128xf32, #tpu.memory_space<vmem>>, vector<16x128xf32>
    %c0_2 = arith.constant 0 : index
    %c0_3 = arith.constant 0 : index
    %4 = vector.load %arg3[%c0_2, %c0_3] : memref<16x256xbf16, #tpu.memory_space<vmem>>, vector<16x256xbf16>
    %c0_4 = arith.constant 0 : index
    %c0_5 = arith.constant 0 : index
    %5 = vector.load %arg4[%c0_4, %c0_5] : memref<256x128xbf16, #tpu.memory_space<vmem>>, vector<256x128xbf16>
    %cst = arith.constant dense<0.000000e+00> : vector<16x128xf32>
    %6 = tpu.matmul %4, %5, %cst {dimension_numbers = #tpu.dot_dimension_numbers<[1], [0], [0], [1], [0, 0, 1, 1], [], []>} : vector<16x256xbf16>, vector<256x128xbf16>, vector<16x128xf32> -> vector<16x128xf32>
    %7 = arith.addf %3, %6 : vector<16x128xf32>
    %c0_6 = arith.constant 0 : index
    %c0_7 = arith.constant 0 : index
    %8 = vector.load %arg7[%c0_6, %c0_7] : memref<16x128xf32, #tpu.memory_space<vmem>>, vector<16x128xf32>
    tpu.vector_store %arg7[%c0_6, %c0_7], %7 {strides = array<i32>} : memref<16x128xf32, #tpu.memory_space<vmem>>, vector<16x128xf32>,
    %c0_i32_8 = arith.constant 0 : i32
    %9 = arith.cmpi eq, %arg2, %c0_i32_8 : i32
    %10 = arith.extui %9 : i1 to i32
    %c0_i32_9 = arith.constant 0 : i32
    %11 = arith.cmpi ne, %10, %c0_i32_9 : i32
    scf.if %11 {
      %c0_10 = arith.constant 0 : index
      %c0_11 = arith.constant 0 : index
      %12 = vector.load %arg7[%c0_10, %c0_11] : memref<16x128xf32, #tpu.memory_space<vmem>>, vector<16x128xf32>
      %c0_12 = arith.constant 0 : index
      %c0_13 = arith.constant 0 : index
      %13 = vector.load %arg5[%c0_12, %c0_13] : memref<1x128xf32, #tpu.memory_space<vmem>>, vector<1x128xf32>
      %14 = vector.broadcast %13 : vector<1x128xf32> to vector<16x128xf32>
      %15 = arith.addf %12, %14 : vector<16x128xf32>
      %c0_14 = arith.constant 0 : index
      %c0_15 = arith.constant 0 : index
      %16 = vector.load %arg6[%c0_14, %c0_15] : memref<16x128xf32, #tpu.memory_space<vmem>>, vector<16x128xf32>
      tpu.vector_store %arg6[%c0_14, %c0_15], %15 {strides = array<i32>} : memref<16x128xf32, #tpu.memory_space<vmem>>, vector<16x128xf32>,
    } else {
    }
    return
  }
  func.func @transform_0(%arg0: i32, %arg1: i32, %arg2: i32) -> (i32, i32) {
    %c0_i32 = arith.constant 0 : i32
    return %arg0, %arg2 : i32, i32
  }
  func.func @transform_1(%arg0: i32, %arg1: i32, %arg2: i32) -> (i32, i32) {
    %c0_i32 = arith.constant 0 : i32
    return %arg2, %arg1 : i32, i32
  }
  func.func @transform_2(%arg0: i32, %arg1: i32, %arg2: i32) -> (i32, i32) {
    %c0_i32 = arith.constant 0 : i32
    %c0_i32_0 = arith.constant 0 : i32
    return %c0_i32, %arg1 : i32, i32
  }
  func.func @transform_3(%arg0: i32, %arg1: i32, %arg2: i32) -> (i32, i32) {
    %c0_i32 = arith.constant 0 : i32
    return %arg0, %arg1 : i32, i32
  }
}

</mosaic_0001>

<bundles_post_ra>
// kernel: _lambda_.56
= control target key start
LH: loop header
LB: loop body
LE: loop exit
PB: predicated region body
PF: predicated region fallthrough
CT: control target
= control target key end

     0   :  { %s939_s1 = inlined_call_operand.vmem [shape: bf16[256,128], index: 1, kind: input, shape index: {}]   ;;  %s940_s0 = inlined_call_operand.vmem [shape: bf16[128,256], index: 0, kind: input, shape index: {}]   ;;  %s941_s2 = inlined_call_operand.vmem [shape: f32[1,128], index: 2, kind: input, shape index: {}]   ;;  %s942_s3 = inlined_call_operand.vmem [shape: bf16[128,128], index: 3, kind: output, shape index: {}]  }
   0x1   :  { %v738_v0 = vld [vmem:[%s939_s1 + $0x40] sm:$0xff]   ;;  %v740_v2 = vld [vmem:[%s939_s1 + $0x48] sm:$0xff]   ;;  %v742_v4 = vld [vmem:[%s939_s1 + $0x50] sm:$0xff]  }
   0x2   :  { %v739_v1 = vld [vmem:[%s939_s1] sm:$0xff]   ;;  %658 = vmatprep.subr.bf16.mxu0 %v738_v0  ;;  %722 = vmatprep.subr.bf16.mxu1 %v738_v0  ;;  %v741_v3 = vld [vmem:[%s939_s1 + $0x8] sm:$0xff]   ;;  %v743_v5 = vld [vmem:[%s939_s1 + $0x10] sm:$0xff]  }
   0x3   :  { %659 = vmatpush3.bf16.msra.mxu0 %v739_v1  ;;  %730 = vmatpush3.bf16.msra.mxu1 %v739_v1  ;;  %v744_v6 = vld [vmem:[%s939_s1 + $0x58] sm:$0xff]   ;;  %v746_v8 = vld [vmem:[%s939_s1 + $0x60] sm:$0xff]   ;;  %v748_v10 = vld [vmem:[%s939_s1 + $0x68] sm:$0xff]  }
   0x4   :  { %660 = vmatprep.subr.bf16.mxu0 %v740_v2  ;;  %723 = vmatprep.subr.bf16.mxu1 %v740_v2  ;;  %v745_v7 = vld [vmem:[%s939_s1 + $0x18] sm:$0xff]   ;;  %v747_v9 = vld [vmem:[%s939_s1 + $0x20] sm:$0xff]   ;;  %v749_v13 = vld [vmem:[%s939_s1 + $0x28] sm:$0xff]  }
   0x5   :  { %v756_v11 = vld [vmem:[%s940_s0 + $0x4] ss:$8 sps:$4 sm:$0xff]   ;;  %v750_v14 = vld [vmem:[%s939_s1 + $0x70] sm:$0xff]   ;;  %v752_v16 = vld [vmem:[%s939_s1 + $0x78] sm:$0xff]  }
   0x6   :  { %v759_v12 = vld [vmem:[%s940_s0 + $0x44] ss:$8 sps:$4 sm:$0xff]   ;;  %307 = vmatprep.mubr.bf16.mxu0 %v756_v11  ;;  %v751_v15 = vld [vmem:[%s939_s1 + $0x30] sm:$0xff]   ;;  %v753_v17 = vld [vmem:[%s939_s1 + $0x38] sm:$0xff]  }
   0x7   :  { %661 = vmatpush3.bf16.msra.mxu0 %v741_v3  ;;  %731 = vmatpush3.bf16.msra.mxu1 %v741_v3  ;;  %v754_v18 = vld [vmem:[%s940_s0] ss:$8 sps:$4 sm:$0xff]   ;;  %v760_v20 = vld [vmem:[%s940_s0 + $0x14] ss:$8 sps:$4 sm:$0xff]   ;;  %v764_v22 = vld [vmem:[%s940_s0 + $0x10] ss:$8 sps:$4 sm:$0xff]  }
   0x8   :  { %662 = vmatprep.subr.bf16.mxu0 %v742_v4  ;;  %724 = vmatprep.subr.bf16.mxu1 %v742_v4  ;;  %v757_v19 = vld [vmem:[%s940_s0 + $0x40] ss:$8 sps:$4 sm:$0xff]   ;;  %v762_v21 = vld [vmem:[%s940_s0 + $0x54] ss:$8 sps:$4 sm:$0xff]   ;;  %v765_v23 = vld [vmem:[%s940_s0 + $0x50] ss:$8 sps:$4 sm:$0xff]  }
   0x9   :  { %339 = vmatprep.mubr.bf16.mxu1 %v759_v12  ;;  %v766_v24 = vld [vmem:[%s940_s0 + $0x24] ss:$8 sps:$4 sm:$0xff]   ;;  %v770_v26 = vld [vmem:[%s940_s0 + $0x20] ss:$8 sps:$4 sm:$0xff]   ;;  %v772_v28 = vld [vmem:[%s940_s0 + $0x34] ss:$8 sps:$4 sm:$0xff]  }
   0xa   :  { %v768_v25 = vld [vmem:[%s940_s0 + $0x64] ss:$8 sps:$4 sm:$0xff]   ;;  %v771_v27 = vld [vmem:[%s940_s0 + $0x60] ss:$8 sps:$4 sm:$0xff]   ;;  %v774_v29 = vld [vmem:[%s940_s0 + $0x74] ss:$8 sps:$4 sm:$0xff]  }
   0xb   :  { %663 = vmatpush3.bf16.msra.mxu0 %v743_v5  ;;  %732 = vmatpush3.bf16.msra.mxu1 %v743_v5  ;;  %v776_v30 = vld [vmem:[%s940_s0 + $0x30] ss:$8 sps:$4 sm:$0xff]   ;;  %v897_v35 = vld [vmem:[%s941_s2] ss:$0 sm:$0xff] }
   0xc   :  { %664 = vmatprep.subr.bf16.mxu0 %v744_v6  ;;  %725 = vmatprep.subr.bf16.mxu1 %v744_v6  ;;  %v777_v31 = vld [vmem:[%s940_s0 + $0x70] ss:$8 sps:$4 sm:$0xff]  }
   0xf   :  { %665 = vmatpush3.bf16.msra.mxu0 %v745_v7  ;;  %733 = vmatpush3.bf16.msra.mxu1 %v745_v7 }
  0x10   :  { %666 = vmatprep.subr.bf16.mxu0 %v746_v8  ;;  %726 = vmatprep.subr.bf16.mxu1 %v746_v8 }
  0x13   :  { %667 = vmatpush3.bf16.msra.mxu0 %v747_v9  ;;  %734 = vmatpush3.bf16.msra.mxu1 %v747_v9 }
  0x14   :  { %668 = vmatprep.subr.bf16.mxu0 %v748_v10  ;;  %727 = vmatprep.subr.bf16.mxu1 %v748_v10 }
  0x17   :  { %669 = vmatpush3.bf16.msra.mxu0 %v749_v13  ;;  %735 = vmatpush3.bf16.msra.mxu1 %v749_v13 }
  0x18   :  { %670 = vmatprep.subr.bf16.mxu0 %v750_v14  ;;  %728 = vmatprep.subr.bf16.mxu1 %v750_v14 }
  0x1b   :  { %671 = vmatpush3.bf16.msra.mxu0 %v751_v15  ;;  %736 = vmatpush3.bf16.msra.mxu1 %v751_v15 }
  0x1c   :  { %672 = vmatprep.subr.bf16.mxu0 %v752_v16  ;;  %729 = vmatprep.subr.bf16.mxu1 %v752_v16 }
  0x1f   :  { %673 = vmatpush3.bf16.msra.mxu0 %v753_v17  ;;  %737 = vmatpush3.bf16.msra.mxu1 %v753_v17 }
  0x22   :  { %308 = vmatmul.mubr.bf16.vlgmr.msra.gmra.mrb[0].mxu0 %v754_v18  ;;  %340 = vmatmul.mubr.bf16.vlgmr.msra.gmra.mrb[0].mxu1 %v757_v19 }
  0x23   :  { %315 = vmatprep.mubr.bf16.mxu0 %v760_v20  ;;  %347 = vmatprep.mubr.bf16.mxu1 %v762_v21 }
  0x2a   :  { %316 = vmatmul.mubr.bf16.gmra.mrb[4].mxu0 %v764_v22  ;;  %348 = vmatmul.mubr.bf16.gmra.mrb[4].mxu1 %v765_v23 }
  0x2b   :  { %323 = vmatprep.mubr.bf16.mxu0 %v766_v24  ;;  %355 = vmatprep.mubr.bf16.mxu1 %v768_v25 }
  0x32   :  { %324 = vmatmul.mubr.bf16.gmra.mrb[8].mxu0 %v770_v26  ;;  %356 = vmatmul.mubr.bf16.gmra.mrb[8].mxu1 %v771_v27 }
  0x33   :  { %331 = vmatprep.mubr.bf16.mxu0 %v772_v28  ;;  %363 = vmatprep.mubr.bf16.mxu1 %v774_v29 }
  0x3a   :  { %332 = vmatmul.mubr.bf16.gmra.mrb[12].mxu0 %v776_v30  ;;  %364 = vmatmul.mubr.bf16.gmra.mrb[12].mxu1 %v777_v31 }
  0xf5   :  { %v674_v32 = vpop.f32.mrb[0].mxu0  ;;  %v698_v33 = vpop.f32.mrb[0].mxu1 }
  0xf6   :  { %v675_v34 = vpop.f32.mrb[1].mxu0  ;;  %v699_v36 = vpop.f32.mrb[1].mxu1 }
  0xf7   :  { %v676_v37 = vadd.f32 %v675_v34, %v674_v32  ;;  %v700_v38 = vadd.f32 %v699_v36, %v698_v33  ;;  %v677_v39 = vpop.f32.mrb[2].mxu0  ;;  %v701_v40 = vpop.f32.mrb[2].mxu1 }
  0xf8   :  { %v678_v41 = vpop.f32.mrb[3].mxu0  ;;  %v702_v42 = vpop.f32.mrb[3].mxu1 }
  0xf9   :  { %v430_v43 = vadd.f32 %v676_v37, %v897_v35  ;;  %v438_v44 = vadd.f32 %v700_v38, %v897_v35  ;;  %v679_v45 = vadd.f32 %v678_v41, %v677_v39  ;;  %v703_v46 = vadd.f32 %v702_v42, %v701_v40 }
  0xfb   :  { %v431_v47 = vadd.f32 %v679_v45, %v897_v35  ;;  %v439_v48 = vadd.f32 %v703_v46, %v897_v35  ;;  %v446_v49 = vmax.f32 %v430_v43, 0.0  ;;  %v454_v50 = vmax.f32 %v438_v44, 0.0 }
  0xfd   :  { %v447_v51 = vmax.f32 %v431_v47, 0.0  ;;  %v455_v52 = vmax.f32 %v439_v48, 0.0  ;;  %v680_v53 = vpop.f32.mrb[4].mxu0  ;;  %v704_v54 = vpop.f32.mrb[4].mxu1 }
  0xfe   :  { %v681_v55 = vpop.f32.mrb[5].mxu0  ;;  %v705_v56 = vpop.f32.mrb[5].mxu1 }
  0xff   :  { %v614_v57 = vpack.c.bf16 %v447_v51, %v446_v49  ;;  %v634_v58 = vpack.c.bf16 %v455_v52, %v454_v50  ;;  %v682_v59 = vadd.f32 %v681_v55, %v680_v53  ;;  %v706_v60 = vadd.f32 %v705_v56, %v704_v54  ;;  %v683_v61 = vpop.f32.mrb[6].mxu0  ;;  %v707_v62 = vpop.f32.mrb[6].mxu1 }
 0x100   :  { %v684_v63 = vpop.f32.mrb[7].mxu0  ;;  %v708_v0 = vpop.f32.mrb[7].mxu1 }
 0x101   :  { %615 = vst [vmem:[%s942_s3] sm:$0xff] %v614_v57   ;;  %654 = vst [vmem:[%s942_s3 + $0x20] sm:$0xff] %v634_v58   ;;  %v432_v1 = vadd.f32 %v682_v59, %v897_v35  ;;  %v440_v2 = vadd.f32 %v706_v60, %v897_v35  ;;  %v685_v3 = vadd.f32 %v684_v63, %v683_v61 }
 0x102   :  { %v709_v4 = vadd.f32 %v708_v0, %v707_v62 }
 0x103   :  { %v433_v5 = vadd.f32 %v685_v3, %v897_v35  ;;  %v448_v7 = vmax.f32 %v432_v1, 0.0  ;;  %v456_v8 = vmax.f32 %v440_v2, 0.0 }
 0x104   :  { %v441_v6 = vadd.f32 %v709_v4, %v897_v35 }
 0x105   :  { %v449_v9 = vmax.f32 %v433_v5, 0.0  ;;  %v686_v11 = vpop.f32.mrb[8].mxu0  ;;  %v710_v12 = vpop.f32.mrb[8].mxu1 }
 0x106   :  { %v457_v10 = vmax.f32 %v441_v6, 0.0  ;;  %v687_v13 = vpop.f32.mrb[9].mxu0  ;;  %v711_v14 = vpop.f32.mrb[9].mxu1 }
 0x107   :  { %v619_v15 = vpack.c.bf16 %v449_v9, %v448_v7  ;;  %v688_v17 = vadd.f32 %v687_v13, %v686_v11  ;;  %v712_v18 = vadd.f32 %v711_v14, %v710_v12  ;;  %v689_v19 = vpop.f32.mrb[10].mxu0  ;;  %v713_v20 = vpop.f32.mrb[10].mxu1 }
 0x108   :  { %v639_v16 = vpack.c.bf16 %v457_v10, %v456_v8  ;;  %v690_v21 = vpop.f32.mrb[11].mxu0  ;;  %v714_v22 = vpop.f32.mrb[11].mxu1 }
 0x109   :  { %651 = vst [vmem:[%s942_s3 + $0x8] sm:$0xff] %v619_v15   ;;  %v434_v23 = vadd.f32 %v688_v17, %v897_v35  ;;  %v442_v24 = vadd.f32 %v712_v18, %v897_v35  ;;  %v691_v25 = vadd.f32 %v690_v21, %v689_v19  ;;  %v715_v26 = vadd.f32 %v714_v22, %v713_v20 }
 0x10a   :  { %655 = vst [vmem:[%s942_s3 + $0x28] sm:$0xff] %v639_v16  }
 0x10b   :  { %v435_v27 = vadd.f32 %v691_v25, %v897_v35  ;;  %v443_v28 = vadd.f32 %v715_v26, %v897_v35  ;;  %v450_v29 = vmax.f32 %v434_v23, 0.0  ;;  %v458_v30 = vmax.f32 %v442_v24, 0.0 }
 0x10d   :  { %v451_v31 = vmax.f32 %v435_v27, 0.0  ;;  %v459_v32 = vmax.f32 %v443_v28, 0.0  ;;  %v692_v33 = vpop.f32.mrb[12].mxu0  ;;  %v716_v34 = vpop.f32.mrb[12].mxu1 }
 0x10e   :  { %v693_v36 = vpop.f32.mrb[13].mxu0  ;;  %v717_v37 = vpop.f32.mrb[13].mxu1 }
 0x10f   :  { %v624_v38 = vpack.c.bf16 %v451_v31, %v450_v29  ;;  %v644_v39 = vpack.c.bf16 %v459_v32, %v458_v30  ;;  %v694_v40 = vadd.f32 %v693_v36, %v692_v33  ;;  %v718_v41 = vadd.f32 %v717_v37, %v716_v34  ;;  %v695_v42 = vpop.f32.mrb[14].mxu0  ;;  %v719_v43 = vpop.f32.mrb[14].mxu1 }
 0x110   :  { %v696_v44 = vpop.f32.mrb[15].mxu0  ;;  %v720_v45 = vpop.f32.mrb[15].mxu1 }
 0x111   :  { %652 = vst [vmem:[%s942_s3 + $0x10] sm:$0xff] %v624_v38   ;;  %656 = vst [vmem:[%s942_s3 + $0x30] sm:$0xff] %v644_v39   ;;  %v436_v46 = vadd.f32 %v694_v40, %v897_v35  ;;  %v444_v47 = vadd.f32 %v718_v41, %v897_v35  ;;  %v697_v48 = vadd.f32 %v696_v44, %v695_v42 }
 0x112   :  { %v721_v49 = vadd.f32 %v720_v45, %v719_v43 }
 0x113   :  { %v437_v50 = vadd.f32 %v697_v48, %v897_v35  ;;  %v452_v52 = vmax.f32 %v436_v46, 0.0  ;;  %v460_v53 = vmax.f32 %v444_v47, 0.0 }
 0x114   :  { %v445_v51 = vadd.f32 %v721_v49, %v897_v35 }
 0x115   :  { %v453_v54 = vmax.f32 %v437_v50, 0.0 }
 0x116   :  { %v461_v55 = vmax.f32 %v445_v51, 0.0 }
 0x117   :  { %v629_v56 = vpack.c.bf16 %v453_v54, %v452_v52 }
 0x118   :  { %v649_v57 = vpack.c.bf16 %v461_v55, %v460_v53 }
 0x119   :  { %653 = vst [vmem:[%s942_s3 + $0x18] sm:$0xff] %v629_v56  }
 0x11a   :  { %657 = vst [vmem:[%s942_s3 + $0x38] sm:$0xff] %v649_v57  }

// kernel: _lambda_.59
= control target key start
LH: loop header
LB: loop body
LE: loop exit
PB: predicated region body
PF: predicated region fallthrough
CT: control target
= control target key end

     0   :  { %s339_s1 = inlined_call_operand.vmem [shape: bf16[128,128], index: 1, kind: input, shape index: {}]   ;;  %s340_s0 = inlined_call_operand.vmem [shape: bf16[32,128], index: 0, kind: input, shape index: {}]   ;;  %s341_s2 = inlined_call_operand.vmem [shape: f32[1,128], index: 2, kind: input, shape index: {}]   ;;  %s342_s3 = inlined_call_operand.vmem [shape: bf16[32,128], index: 3, kind: output, shape index: {}]  }
   0x1   :  { %v270_v0 = vld [vmem:[%s339_s1] sm:$0xff]   ;;  %v271_v1 = vld [vmem:[%s339_s1 + $0x8] sm:$0xff]   ;;  %v272_v2 = vld [vmem:[%s339_s1 + $0x10] sm:$0xff]  }
   0x2   :  { %250 = vmatprep.subr.bf16.mxu0 %v270_v0  ;;  %v273_v3 = vld [vmem:[%s339_s1 + $0x18] sm:$0xff]   ;;  %v278_v4 = vld [vmem:[%s340_s0] sm:$0xff]   ;;  %v275_v6 = vld [vmem:[%s339_s1 + $0x28] sm:$0xff]  }
   0x3   :  { %251 = vmatpush3.bf16.msra.mxu0 %v270_v0  ;;  %266 = vmatprep.mubr.bf16.mxu0 %v278_v4  ;;  %v274_v5 = vld [vmem:[%s339_s1 + $0x20] sm:$0xff]   ;;  %v276_v7 = vld [vmem:[%s339_s1 + $0x30] sm:$0xff]   ;;  %v277_v8 = vld [vmem:[%s339_s1 + $0x38] sm:$0xff]  }
   0x4   :  { %252 = vmatprep.subr.bf16.mxu0 %v271_v1  ;;  %v279_v9 = vld [vmem:[%s340_s0 + $0x8] sm:$0xff]   ;;  %v220_v10 = vld [vmem:[%s341_s2] ss:$0 sm:$0xff] }
   0x7   :  { %253 = vmatpush3.bf16.msra.mxu0 %v271_v1 }
   0x8   :  { %254 = vmatprep.subr.bf16.mxu0 %v272_v2 }
   0xb   :  { %255 = vmatpush3.bf16.msra.mxu0 %v272_v2 }
   0xc   :  { %256 = vmatprep.subr.bf16.mxu0 %v273_v3 }
   0xf   :  { %257 = vmatpush3.bf16.msra.mxu0 %v273_v3 }
  0x10   :  { %258 = vmatprep.subr.bf16.mxu0 %v274_v5 }
  0x13   :  { %259 = vmatpush3.bf16.msra.mxu0 %v274_v5 }
  0x14   :  { %260 = vmatprep.subr.bf16.mxu0 %v275_v6 }
  0x17   :  { %261 = vmatpush3.bf16.msra.mxu0 %v275_v6 }
  0x18   :  { %262 = vmatprep.subr.bf16.mxu0 %v276_v7 }
  0x1b   :  { %263 = vmatpush3.bf16.msra.mxu0 %v276_v7 }
  0x1c   :  { %264 = vmatprep.subr.bf16.mxu0 %v277_v8 }
  0x1f   :  { %265 = vmatpush3.bf16.msra.mxu0 %v277_v8 }
  0x22   :  { %267 = vmatmul.mubr.bf16.vlgmr.msra.gmra.mrb[0].mxu0 %v279_v9 }
  0xf5   :  { %v268_v11 = vpop.f32.mrb[0].mxu0 }
  0xf6   :  { %v180_v12 = vadd.f32 %v268_v11, %v220_v10  ;;  %v141_v13 = vpop.f32.mrb[1].mxu0 }
  0xf7   :  { %v178_v14 = vadd.f32 %v220_v10, %v141_v13  ;;  %v269_v15 = vpop.f32.mrb[2].mxu0 }
  0xf8   :  { %v181_v16 = vadd.f32 %v269_v15, %v220_v10  ;;  %v144_v17 = vpop.f32.mrb[3].mxu0  ;;  %v184_v19 = vmax.f32 %v180_v12, 0.0 }
  0xf9   :  { %v179_v18 = vadd.f32 %v220_v10, %v144_v17  ;;  %v182_v21 = vmax.f32 %v178_v14, 0.0 }
  0xfa   :  { %v185_v20 = vmax.f32 %v181_v16, 0.0 }
  0xfb   :  { %v183_v22 = vmax.f32 %v179_v18, 0.0 }
  0xfc   :  { %v237_v23 = vpack.c.bf16 %v185_v20, %v184_v19 }
  0xfd   :  { %v232_v24 = vpack.c.bf16 %v183_v22, %v182_v21 }
  0xfe   :  { %239 = vst [vmem:[%s342_s3 + $0x8] sm:$0xff] %v237_v23  }
  0xff   :  { %233 = vst [vmem:[%s342_s3] sm:$0xff] %v232_v24  }

// kernel: _lambda_.57
= control target key start
LH: loop header
LB: loop body
LE: loop exit
PB: predicated region body
PF: predicated region fallthrough
CT: control target
= control target key end

     0   :  { %vm100_vm0 = vcmask 60416   ;;  %s283_s0 = inlined_call_operand.vmem [shape: bf16[32,8], index: 0, kind: input, shape index: {}]   ;;  %s284_s1 = inlined_call_operand.vmem [shape: bf16[32,8], index: 1, kind: input, shape index: {}]   ;;  %s285_s2 = inlined_call_operand.vmem [shape: bf16[32,8], index: 2, kind: input, shape index: {}]   ;;  %s286_s3 = inlined_call_operand.vmem [shape: bf16[32,8], index: 3, kind: input, shape index: {}]   ;;  %s287_s4 = inlined_call_operand.vmem [shape: bf16[32,8], index: 4, kind: input, shape index: {}]   ;;  %s288_s5 = inlined_call_operand.vmem [shape: bf16[32,8], index: 5, kind: input, shape index: {}]   ;;  %s289_s6 = inlined_call_operand.vmem [shape: bf16[32,8], index: 6, kind: input, shape index: {}]   ;;  %s290_s7 = inlined_call_operand.vmem [shape: bf16[32,8], index: 7, kind: input, shape index: {}]   ;;  %s291_s8 = inlined_call_operand.vmem [shape: bf16[32,8], index: 8, kind: input, shape index: {}]   ;;  %s292_s9 = inlined_call_operand.vmem [shape: bf16[32,8], index: 9, kind: output, shape index: {}]  }
   0x1   :  { %v32_v0 = vld [vmem:[%s283_s0] sm:$0xf]  ;;  %v33_v6 = vld [vmem:[%s283_s0 + $0x4] sm:$0xf]  ;;  %v34_v15 = vld [vmem:[%s283_s0 + $0x8] sm:$0xf] }
   0x2   :  { %v36_v1 = vld [vmem:[%s284_s1] sm:$0xf]  ;;  %v37_v7 = vld [vmem:[%s284_s1 + $0x4] sm:$0xf]  ;;  %v38_v16 = vld [vmem:[%s284_s1 + $0x8] sm:$0xf] }
   0x3   :  { %v44_v2 = vld [vmem:[%s285_s2] sm:$0xf]  ;;  %v40_v3 = vmax.bf16 %v36_v1, %v32_v0  ;;  %v45_v8 = vld [vmem:[%s285_s2 + $0x4] sm:$0xf]  ;;  %v41_v10 = vmax.bf16 %v37_v7, %v33_v6  ;;  %v46_v17 = vld [vmem:[%s285_s2 + $0x8] sm:$0xf]  ;;  %v42_v20 = vmax.bf16 %v38_v16, %v34_v15 }
   0x4   :  { %v52_v4 = vld [vmem:[%s286_s3] sm:$0xf]  ;;  %v53_v13 = vld [vmem:[%s286_s3 + $0x4] sm:$0xf]  ;;  %v54_v24 = vld [vmem:[%s286_s3 + $0x8] sm:$0xf] }
   0x5   :  { %v48_v5 = vmax.bf16 %v44_v2, %v40_v3  ;;  %v60_v9 = vld [vmem:[%s287_s4] sm:$0xf]  ;;  %v49_v14 = vmax.bf16 %v45_v8, %v41_v10  ;;  %v61_v19 = vld [vmem:[%s287_s4 + $0x4] sm:$0xf]  ;;  %v50_v26 = vmax.bf16 %v46_v17, %v42_v20  ;;  %v35_v27 = vld [vmem:[%s283_s0 + $0xc] sm:$0xf] }
   0x6   :  { %v68_v12 = vld [vmem:[%s288_s5] sm:$0xf]  ;;  %v69_v23 = vld [vmem:[%s288_s5 + $0x4] sm:$0xf]  ;;  %v39_v28 = vld [vmem:[%s284_s1 + $0xc] sm:$0xf] }
   0x7   :  { %v56_v11 = vmax.bf16 %v52_v4, %v48_v5  ;;  %v76_v21 = vld [vmem:[%s289_s6] sm:$0xf]  ;;  %v57_v22 = vmax.bf16 %v53_v13, %v49_v14  ;;  %v47_v29 = vld [vmem:[%s285_s2 + $0xc] sm:$0xf]  ;;  %v62_v32 = vld [vmem:[%s287_s4 + $0x8] sm:$0xf]  ;;  %v43_v33 = vmax.bf16 %v39_v28, %v35_v27  ;;  %v58_v36 = vmax.bf16 %v54_v24, %v50_v26 }
   0x8   :  { %v84_v30 = vld [vmem:[%s290_s7] sm:$0xf]  ;;  %v77_v35 = vld [vmem:[%s289_s6 + $0x4] sm:$0xf]  ;;  %v55_v37 = vld [vmem:[%s286_s3 + $0xc] sm:$0xf] }
   0x9   :  { %v64_v18 = vmax.bf16 %v60_v9, %v56_v11  ;;  %v65_v31 = vmax.bf16 %v61_v19, %v57_v22  ;;  %v92_v38 = vld [vmem:[%s291_s8] sm:$0xf]  ;;  %v70_v40 = vld [vmem:[%s288_s5 + $0x8] sm:$0xf]  ;;  %v51_v41 = vmax.bf16 %v47_v29, %v43_v33  ;;  %v85_v43 = vld [vmem:[%s290_s7 + $0x4] sm:$0xf]  ;;  %v66_v44 = vmax.bf16 %v62_v32, %v58_v36 }
   0xa   :  { %v63_v45 = vld [vmem:[%s287_s4 + $0xc] sm:$0xf]  ;;  %v78_v47 = vld [vmem:[%s289_s6 + $0x8] sm:$0xf]  ;;  %v93_v50 = vld [vmem:[%s291_s8 + $0x4] sm:$0xf] }
   0xb   :  { %v72_v25 = vmax.bf16 %v68_v12, %v64_v18  ;;  %v73_v39 = vmax.bf16 %v69_v23, %v65_v31  ;;  %v59_v48 = vmax.bf16 %v55_v37, %v51_v41  ;;  %v74_v51 = vmax.bf16 %v70_v40, %v66_v44  ;;  %v71_v52 = vld [vmem:[%s288_s5 + $0xc] sm:$0xf]  ;;  %v86_v54 = vld [vmem:[%s290_s7 + $0x8] sm:$0xf] }
   0xc   :  { %v79_v57 = vld [vmem:[%s289_s6 + $0xc] sm:$0xf]  ;;  %v94_v59 = vld [vmem:[%s291_s8 + $0x8] sm:$0xf] }
   0xd   :  { %v80_v34 = vmax.bf16 %v76_v21, %v72_v25  ;;  %v81_v46 = vmax.bf16 %v77_v35, %v73_v39  ;;  %v67_v55 = vmax.bf16 %v63_v45, %v59_v48  ;;  %v82_v56 = vmax.bf16 %v78_v47, %v74_v51  ;;  %v87_v62 = vld [vmem:[%s290_s7 + $0xc] sm:$0xf] }
   0xe   :  { %v95_v1 = vld [vmem:[%s291_s8 + $0xc] sm:$0xf] }
   0xf   :  { %v88_v42 = vmax.bf16 %v84_v30, %v80_v34  ;;  %v89_v53 = vmax.bf16 %v85_v43, %v81_v46  ;;  %v75_v60 = vmax.bf16 %v71_v52, %v67_v55  ;;  %v90_v61 = vmax.bf16 %v86_v54, %v82_v56 }
  0x11   :  { %v96_v49 = vmax.bf16 %v92_v38, %v88_v42  ;;  %v97_v58 = vmax.bf16 %v93_v50, %v89_v53  ;;  %v83_v63 = vmax.bf16 %v79_v57, %v75_v60  ;;  %v98_v0 = vmax.bf16 %v94_v59, %v90_v61 }
  0x13   :  { %101 = vst.msk [vmem:[%s292_s9] sm:$0xf] %vm100_vm0, %v96_v49  ;;  %102 = vst.msk [vmem:[%s292_s9 + $0x4] sm:$0xf] %vm100_vm0, %v97_v58  ;;  %v91_v2 = vmax.bf16 %v87_v62, %v83_v63 }
  0x14   :  { %103 = vst.msk [vmem:[%s292_s9 + $0x8] sm:$0xf] %vm100_vm0, %v98_v0 }
  0x15   :  { %v99_v3 = vmax.bf16 %v95_v1, %v91_v2 }
  0x17   :  { %104 = vst.msk [vmem:[%s292_s9 + $0xc] sm:$0xf] %vm100_vm0, %v99_v3 }

// kernel: _lambda_.58
= control target key start
LH: loop header
LB: loop body
LE: loop exit
PB: predicated region body
PF: predicated region fallthrough
CT: control target
= control target key end

     0   :  { %s335_s1 = inlined_call_operand.vmem [shape: bf16[128,128], index: 1, kind: input, shape index: {}]   ;;  %s336_s0 = inlined_call_operand.vmem [shape: bf16[32,128], index: 0, kind: input, shape index: {}]   ;;  %s337_s2 = inlined_call_operand.vmem [shape: f32[1,128], index: 2, kind: input, shape index: {}]   ;;  %s338_s3 = inlined_call_operand.vmem [shape: bf16[32,128], index: 3, kind: output, shape index: {}]  }
   0x1   :  { %v266_v0 = vld [vmem:[%s335_s1] sm:$0xff]   ;;  %v267_v1 = vld [vmem:[%s335_s1 + $0x8] sm:$0xff]   ;;  %v268_v2 = vld [vmem:[%s335_s1 + $0x10] sm:$0xff]  }
   0x2   :  { %246 = vmatprep.subr.bf16.mxu0 %v266_v0  ;;  %v269_v3 = vld [vmem:[%s335_s1 + $0x18] sm:$0xff]   ;;  %v274_v4 = vld [vmem:[%s336_s0] sm:$0xff]   ;;  %v271_v6 = vld [vmem:[%s335_s1 + $0x28] sm:$0xff]  }
   0x3   :  { %247 = vmatpush3.bf16.msra.mxu0 %v266_v0  ;;  %262 = vmatprep.mubr.bf16.mxu0 %v274_v4  ;;  %v270_v5 = vld [vmem:[%s335_s1 + $0x20] sm:$0xff]   ;;  %v272_v7 = vld [vmem:[%s335_s1 + $0x30] sm:$0xff]   ;;  %v273_v8 = vld [vmem:[%s335_s1 + $0x38] sm:$0xff]  }
   0x4   :  { %248 = vmatprep.subr.bf16.mxu0 %v267_v1  ;;  %v275_v9 = vld [vmem:[%s336_s0 + $0x8] sm:$0xff]   ;;  %v216_v11 = vld [vmem:[%s337_s2] ss:$0 sm:$0xff] }
   0x7   :  { %249 = vmatpush3.bf16.msra.mxu0 %v267_v1 }
   0x8   :  { %250 = vmatprep.subr.bf16.mxu0 %v268_v2 }
   0xb   :  { %251 = vmatpush3.bf16.msra.mxu0 %v268_v2 }
   0xc   :  { %252 = vmatprep.subr.bf16.mxu0 %v269_v3 }
   0xf   :  { %253 = vmatpush3.bf16.msra.mxu0 %v269_v3 }
  0x10   :  { %254 = vmatprep.subr.bf16.mxu0 %v270_v5 }
  0x13   :  { %255 = vmatpush3.bf16.msra.mxu0 %v270_v5 }
  0x14   :  { %256 = vmatprep.subr.bf16.mxu0 %v271_v6 }
  0x17   :  { %257 = vmatpush3.bf16.msra.mxu0 %v271_v6 }
  0x18   :  { %258 = vmatprep.subr.bf16.mxu0 %v272_v7 }
  0x1b   :  { %259 = vmatpush3.bf16.msra.mxu0 %v272_v7 }
  0x1c   :  { %260 = vmatprep.subr.bf16.mxu0 %v273_v8 }
  0x1f   :  { %261 = vmatpush3.bf16.msra.mxu0 %v273_v8 }
  0x22   :  { %263 = vmatmul.mubr.bf16.vlgmr.msra.gmra.mrb[0].mxu0 %v275_v9 }
  0xf5   :  { %v264_v10 = vpop.f32.mrb[0].mxu0 }
  0xf6   :  { %v141_v12 = vpop.f32.mrb[1].mxu0  ;;  %v180_v14 = vadd.f32 %v264_v10, %v216_v11 }
  0xf7   :  { %v265_v13 = vpop.f32.mrb[2].mxu0  ;;  %v178_v17 = vadd.f32 %v216_v11, %v141_v12 }
  0xf8   :  { %v181_v15 = vadd.f32 %v265_v13, %v216_v11  ;;  %v144_v16 = vpop.f32.mrb[3].mxu0 }
  0xf9   :  { %v179_v18 = vadd.f32 %v216_v11, %v144_v16 }
  0xfa   :  { %v233_v19 = vpack.c.bf16 %v181_v15, %v180_v14 }
  0xfb   :  { %v228_v20 = vpack.c.bf16 %v179_v18, %v178_v17 }
  0xfc   :  { %235 = vst [vmem:[%s338_s3 + $0x8] sm:$0xff] %v233_v19  }
  0xfd   :  { %229 = vst [vmem:[%s338_s3] sm:$0xff] %v228_v20  }

// kernel: _lambda_.61
= control target key start
LH: loop header
LB: loop body
LE: loop exit
PB: predicated region body
PF: predicated region fallthrough
CT: control target
= control target key end

     0   :  { %s374_s1 = inlined_call_operand.vmem [shape: bf16[128,128], index: 1, kind: input, shape index: {}]   ;;  %s375_s0 = inlined_call_operand.vmem [shape: bf16[32,128], index: 0, kind: input, shape index: {}]   ;;  %s376_s3 = inlined_call_operand.vmem [shape: bf16[32,128], index: 3, kind: input, shape index: {}]   ;;  %s377_s2 = inlined_call_operand.vmem [shape: f32[1,128], index: 2, kind: input, shape index: {}]   ;;  %s378_s4 = inlined_call_operand.vmem [shape: bf16[32,128], index: 4, kind: output, shape index: {}]  }
   0x1   :  { %v294_v0 = vld [vmem:[%s374_s1] sm:$0xff]   ;;  %v295_v1 = vld [vmem:[%s374_s1 + $0x8] sm:$0xff]   ;;  %v296_v2 = vld [vmem:[%s374_s1 + $0x10] sm:$0xff]  }
   0x2   :  { %274 = vmatprep.subr.bf16.mxu0 %v294_v0  ;;  %v297_v3 = vld [vmem:[%s374_s1 + $0x18] sm:$0xff]   ;;  %v302_v4 = vld [vmem:[%s375_s0] sm:$0xff]   ;;  %v299_v6 = vld [vmem:[%s374_s1 + $0x28] sm:$0xff]  }
   0x3   :  { %275 = vmatpush3.bf16.msra.mxu0 %v294_v0  ;;  %290 = vmatprep.mubr.bf16.mxu0 %v302_v4  ;;  %v298_v5 = vld [vmem:[%s374_s1 + $0x20] sm:$0xff]   ;;  %v300_v7 = vld [vmem:[%s374_s1 + $0x30] sm:$0xff]   ;;  %v301_v8 = vld [vmem:[%s374_s1 + $0x38] sm:$0xff]  }
   0x4   :  { %276 = vmatprep.subr.bf16.mxu0 %v295_v1  ;;  %v303_v9 = vld [vmem:[%s375_s0 + $0x8] sm:$0xff]   ;;  %v245_v11 = vld [vmem:[%s376_s3] sm:$0xff]  }
   0x5   :  { %v262_v10 = vld [vmem:[%s376_s3 + $0x8] sm:$0xff]   ;;  %v235_v12 = vld [vmem:[%s377_s2] ss:$0 sm:$0xff]  ;;  %v246_v15 = vunpack.c.l.bf16 %v245_v11  ;;  %v247_v21 = vunpack.c.h.bf16 %v245_v11 }
   0x6   :  { %v250_v13 = vunpack.c.l.bf16 %v262_v10  ;;  %v251_v18 = vunpack.c.h.bf16 %v262_v10 }
   0x7   :  { %277 = vmatpush3.bf16.msra.mxu0 %v295_v1 }
   0x8   :  { %278 = vmatprep.subr.bf16.mxu0 %v296_v2 }
   0xb   :  { %279 = vmatpush3.bf16.msra.mxu0 %v296_v2 }
   0xc   :  { %280 = vmatprep.subr.bf16.mxu0 %v297_v3 }
   0xf   :  { %281 = vmatpush3.bf16.msra.mxu0 %v297_v3 }
  0x10   :  { %282 = vmatprep.subr.bf16.mxu0 %v298_v5 }
  0x13   :  { %283 = vmatpush3.bf16.msra.mxu0 %v298_v5 }
  0x14   :  { %284 = vmatprep.subr.bf16.mxu0 %v299_v6 }
  0x17   :  { %285 = vmatpush3.bf16.msra.mxu0 %v299_v6 }
  0x18   :  { %286 = vmatprep.subr.bf16.mxu0 %v300_v7 }
  0x1b   :  { %287 = vmatpush3.bf16.msra.mxu0 %v300_v7 }
  0x1c   :  { %288 = vmatprep.subr.bf16.mxu0 %v301_v8 }
  0x1f   :  { %289 = vmatpush3.bf16.msra.mxu0 %v301_v8 }
  0x22   :  { %291 = vmatmul.mubr.bf16.vlgmr.msra.gmra.mrb[0].mxu0 %v303_v9 }
  0xf5   :  { %v292_v14 = vpop.f32.mrb[0].mxu0 }
  0xf6   :  { %v183_v16 = vadd.f32 %v292_v14, %v235_v12  ;;  %v144_v17 = vpop.f32.mrb[1].mxu0 }
  0xf7   :  { %v181_v19 = vadd.f32 %v235_v12, %v144_v17  ;;  %v293_v20 = vpop.f32.mrb[2].mxu0 }
  0xf8   :  { %v195_v22 = vadd.f32 %v250_v13, %v183_v16  ;;  %v184_v23 = vadd.f32 %v293_v20, %v235_v12  ;;  %v147_v24 = vpop.f32.mrb[3].mxu0 }
  0xf9   :  { %v193_v25 = vadd.f32 %v246_v15, %v181_v19  ;;  %v182_v26 = vadd.f32 %v235_v12, %v147_v24 }
  0xfa   :  { %v196_v27 = vadd.f32 %v251_v18, %v184_v23  ;;  %v199_v29 = vmax.f32 %v195_v22, 0.0 }
  0xfb   :  { %v194_v28 = vadd.f32 %v247_v21, %v182_v26  ;;  %v197_v31 = vmax.f32 %v193_v25, 0.0 }
  0xfc   :  { %v200_v30 = vmax.f32 %v196_v27, 0.0 }
  0xfd   :  { %v198_v32 = vmax.f32 %v194_v28, 0.0 }
  0xfe   :  { %v260_v33 = vpack.c.bf16 %v200_v30, %v199_v29 }
  0xff   :  { %v255_v34 = vpack.c.bf16 %v198_v32, %v197_v31 }
 0x100   :  { %263 = vst [vmem:[%s378_s4 + $0x8] sm:$0xff] %v260_v33  }
 0x101   :  { %256 = vst [vmem:[%s378_s4] sm:$0xff] %v255_v34  }

// kernel: _lambda_.70
= control target key start
LH: loop header
LB: loop body
LE: loop exit
PB: predicated region body
PF: predicated region fallthrough
CT: control target
= control target key end

     0   :  { %s387_s1 = inlined_call_operand.vmem [shape: bf16[256,128], index: 1, kind: input, shape index: {}]   ;;  %s388_s0 = inlined_call_operand.vmem [shape: bf16[16,256], index: 0, kind: input, shape index: {}]   ;;  %s389_s2 = inlined_call_operand.vmem [shape: f32[1,128], index: 2, kind: input, shape index: {}]   ;;  %s390_s3 = inlined_call_operand.vmem [shape: bf16[16,128], index: 3, kind: output, shape index: {}]  }
   0x1   :  { %v288_v0 = vld [vmem:[%s387_s1 + $0x40] sm:$0xff]   ;;  %v290_v2 = vld [vmem:[%s387_s1 + $0x48] sm:$0xff]   ;;  %v292_v4 = vld [vmem:[%s387_s1 + $0x50] sm:$0xff]  }
   0x2   :  { %v289_v1 = vld [vmem:[%s387_s1] sm:$0xff]   ;;  %266 = vmatprep.subr.bf16.mxu0 %v288_v0  ;;  %v291_v3 = vld [vmem:[%s387_s1 + $0x8] sm:$0xff]   ;;  %v293_v5 = vld [vmem:[%s387_s1 + $0x10] sm:$0xff]  }
   0x3   :  { %267 = vmatpush3.bf16.msra.mxu0 %v289_v1  ;;  %v294_v6 = vld [vmem:[%s387_s1 + $0x58] sm:$0xff]   ;;  %v296_v8 = vld [vmem:[%s387_s1 + $0x60] sm:$0xff]   ;;  %v298_v10 = vld [vmem:[%s387_s1 + $0x68] sm:$0xff]  }
   0x4   :  { %268 = vmatprep.subr.bf16.mxu0 %v290_v2  ;;  %v295_v7 = vld [vmem:[%s387_s1 + $0x18] sm:$0xff]   ;;  %v297_v9 = vld [vmem:[%s387_s1 + $0x20] sm:$0xff]   ;;  %v299_v12 = vld [vmem:[%s387_s1 + $0x28] sm:$0xff]  }
   0x5   :  { %v306_v11 = vld [vmem:[%s388_s0 + $0x4] ss:$8 sps:$4 sm:$0xff]   ;;  %v300_v13 = vld [vmem:[%s387_s1 + $0x70] sm:$0xff]   ;;  %v302_v15 = vld [vmem:[%s387_s1 + $0x78] sm:$0xff]  }
   0x6   :  { %195 = vmatprep.mubr.bf16.mxu0 %v306_v11  ;;  %v301_v14 = vld [vmem:[%s387_s1 + $0x30] sm:$0xff]   ;;  %v303_v16 = vld [vmem:[%s387_s1 + $0x38] sm:$0xff]   ;;  %v304_v17 = vld [vmem:[%s388_s0] ss:$8 sps:$4 sm:$0xff]  }
   0x7   :  { %269 = vmatpush3.bf16.msra.mxu0 %v291_v3  ;;  %v256_v20 = vld [vmem:[%s389_s2] ss:$0 sm:$0xff] }
   0x8   :  { %270 = vmatprep.subr.bf16.mxu0 %v292_v4 }
   0xb   :  { %271 = vmatpush3.bf16.msra.mxu0 %v293_v5 }
   0xc   :  { %272 = vmatprep.subr.bf16.mxu0 %v294_v6 }
   0xf   :  { %273 = vmatpush3.bf16.msra.mxu0 %v295_v7 }
  0x10   :  { %274 = vmatprep.subr.bf16.mxu0 %v296_v8 }
  0x13   :  { %275 = vmatpush3.bf16.msra.mxu0 %v297_v9 }
  0x14   :  { %276 = vmatprep.subr.bf16.mxu0 %v298_v10 }
  0x17   :  { %277 = vmatpush3.bf16.msra.mxu0 %v299_v12 }
  0x18   :  { %278 = vmatprep.subr.bf16.mxu0 %v300_v13 }
  0x1b   :  { %279 = vmatpush3.bf16.msra.mxu0 %v301_v14 }
  0x1c   :  { %280 = vmatprep.subr.bf16.mxu0 %v302_v15 }
  0x1f   :  { %281 = vmatpush3.bf16.msra.mxu0 %v303_v16 }
  0x22   :  { %196 = vmatmul.mubr.bf16.vlgmr.msra.gmra.mrb[0].mxu0 %v304_v17 }
  0xf5   :  { %v282_v18 = vpop.f32.mrb[0].mxu0 }
  0xf6   :  { %v283_v19 = vpop.f32.mrb[1].mxu0 }
  0xf7   :  { %v284_v21 = vadd.f32 %v283_v19, %v282_v18  ;;  %v285_v22 = vpop.f32.mrb[2].mxu0 }
  0xf8   :  { %v286_v23 = vpop.f32.mrb[3].mxu0 }
  0xf9   :  { %v220_v24 = vadd.f32 %v284_v21, %v256_v20  ;;  %v287_v25 = vadd.f32 %v286_v23, %v285_v22 }
  0xfb   :  { %v221_v26 = vadd.f32 %v287_v25, %v256_v20  ;;  %v222_v27 = vmax.f32 %v220_v24, 0.0 }
  0xfd   :  { %v223_v28 = vmax.f32 %v221_v26, 0.0 }
  0xff   :  { %v264_v29 = vpack.c.bf16 %v223_v28, %v222_v27 }
 0x101   :  { %265 = vst [vmem:[%s390_s3] sm:$0xff] %v264_v29  }

// kernel: _lambda_.71
= control target key start
LH: loop header
LB: loop body
LE: loop exit
PB: predicated region body
PF: predicated region fallthrough
CT: control target
= control target key end

     0   :  { %v242_v0 = vmov 0.0   ;;  %vm243_vm0 = vmmov 0   ;;  %s305_s1 = inlined_call_operand.vmem [shape: bf16[128,128], index: 1, kind: input, shape index: {}]   ;;  %s306_s0 = inlined_call_operand.vmem [shape: bf16[16,128], index: 0, kind: input, shape index: {}]   ;;  %s307_s3 = inlined_call_operand.vmem [shape: bf16[16,128], index: 3, kind: input, shape index: {}]   ;;  %s308_s2 = inlined_call_operand.vmem [shape: f32[1,128], index: 2, kind: input, shape index: {}]   ;;  %s309_s4 = inlined_call_operand.vmem [shape: bf16[16,128], index: 4, kind: output, shape index: {}]  }
   0x1   :  { %211 = vmatprep.subr.bf16.mxu0 %v242_v0  ;;  %v233_v1 = vld [vmem:[%s305_s1] sm:$0xff]   ;;  %227 = vmatprep.mubr.msk.bf16.mxu0 %vm243_vm0, %v242_v0  ;;  %v234_v2 = vld [vmem:[%s305_s1 + $0x8] sm:$0xff]   ;;  %v235_v3 = vld [vmem:[%s305_s1 + $0x10] sm:$0xff]  }
   0x2   :  { %212 = vmatpush3.bf16.msra.mxu0 %v233_v1  ;;  %v236_v4 = vld [vmem:[%s305_s1 + $0x18] sm:$0xff]   ;;  %v237_v5 = vld [vmem:[%s305_s1 + $0x20] sm:$0xff]   ;;  %v238_v6 = vld [vmem:[%s305_s1 + $0x28] sm:$0xff]  }
   0x3   :  { %213 = vmatprep.subr.bf16.mxu0 %v242_v0  ;;  %v239_v7 = vld [vmem:[%s305_s1 + $0x30] sm:$0xff]   ;;  %v240_v8 = vld [vmem:[%s305_s1 + $0x38] sm:$0xff]   ;;  %v241_v9 = vld [vmem:[%s306_s0] sm:$0xff]  }
   0x4   :  { %v194_v10 = vld [vmem:[%s307_s3] sm:$0xff]  }
   0x5   :  { %v188_v11 = vld [vmem:[%s308_s2] ss:$0 sm:$0xff]  ;;  %v195_v12 = vunpack.c.l.bf16 %v194_v10  ;;  %v196_v16 = vunpack.c.h.bf16 %v194_v10 }
   0x6   :  { %214 = vmatpush3.bf16.msra.mxu0 %v234_v2 }
   0x7   :  { %215 = vmatprep.subr.bf16.mxu0 %v242_v0 }
   0xa   :  { %216 = vmatpush3.bf16.msra.mxu0 %v235_v3 }
   0xb   :  { %217 = vmatprep.subr.bf16.mxu0 %v242_v0 }
   0xe   :  { %218 = vmatpush3.bf16.msra.mxu0 %v236_v4 }
   0xf   :  { %219 = vmatprep.subr.bf16.mxu0 %v242_v0 }
  0x12   :  { %220 = vmatpush3.bf16.msra.mxu0 %v237_v5 }
  0x13   :  { %221 = vmatprep.subr.bf16.mxu0 %v242_v0 }
  0x16   :  { %222 = vmatpush3.bf16.msra.mxu0 %v238_v6 }
  0x17   :  { %223 = vmatprep.subr.bf16.mxu0 %v242_v0 }
  0x1a   :  { %224 = vmatpush3.bf16.msra.mxu0 %v239_v7 }
  0x1b   :  { %225 = vmatprep.subr.bf16.mxu0 %v242_v0 }
  0x1e   :  { %226 = vmatpush3.bf16.msra.mxu0 %v240_v8 }
  0x21   :  { %228 = vmatmul.mubr.bf16.vlgmr.msra.gmra.mrb[0].mxu0 %v241_v9 }
  0xf4   :  { %v132_v13 = vpop.f32.mrb[0].mxu0 }
  0xf5   :  { %v155_v14 = vadd.f32 %v188_v11, %v132_v13  ;;  %v229_v15 = vpop.f32.mrb[1].mxu0 }
  0xf6   :  { %v135_v17 = vpop.f32.mrb[2].mxu0 }
  0xf7   :  { %v161_v18 = vadd.f32 %v195_v12, %v155_v14  ;;  %v156_v19 = vadd.f32 %v188_v11, %v135_v17  ;;  %v230_v20 = vpop.f32.mrb[3].mxu0 }
  0xf9   :  { %v162_v21 = vadd.f32 %v196_v16, %v156_v19  ;;  %v163_v22 = vmax.f32 %v161_v18, 0.0 }
  0xfb   :  { %v164_v23 = vmax.f32 %v162_v21, 0.0 }
  0xfd   :  { %v200_v24 = vpack.c.bf16 %v164_v23, %v163_v22 }
  0xff   :  { %201 = vst [vmem:[%s309_s4] sm:$0xff] %v200_v24  }

// kernel: _lambda_.68
= control target key start
LH: loop header
LB: loop body
LE: loop exit
PB: predicated region body
PF: predicated region fallthrough
CT: control target
= control target key end

     0   :  { %v227_v0 = vmov 0.0   ;;  %vm228_vm0 = vmmov 0   ;;  %s282_s1 = inlined_call_operand.vmem [shape: bf16[128,128], index: 1, kind: input, shape index: {}]   ;;  %s283_s0 = inlined_call_operand.vmem [shape: bf16[16,128], index: 0, kind: input, shape index: {}]   ;;  %s284_s2 = inlined_call_operand.vmem [shape: f32[1,128], index: 2, kind: input, shape index: {}]   ;;  %s285_s3 = inlined_call_operand.vmem [shape: bf16[16,128], index: 3, kind: output, shape index: {}]  }
   0x1   :  { %196 = vmatprep.subr.bf16.mxu0 %v227_v0  ;;  %v218_v1 = vld [vmem:[%s282_s1] sm:$0xff]   ;;  %212 = vmatprep.mubr.msk.bf16.mxu0 %vm228_vm0, %v227_v0  ;;  %v219_v2 = vld [vmem:[%s282_s1 + $0x8] sm:$0xff]   ;;  %v220_v3 = vld [vmem:[%s282_s1 + $0x10] sm:$0xff]  }
   0x2   :  { %197 = vmatpush3.bf16.msra.mxu0 %v218_v1  ;;  %v221_v4 = vld [vmem:[%s282_s1 + $0x18] sm:$0xff]   ;;  %v222_v5 = vld [vmem:[%s282_s1 + $0x20] sm:$0xff]   ;;  %v223_v6 = vld [vmem:[%s282_s1 + $0x28] sm:$0xff]  }
   0x3   :  { %198 = vmatprep.subr.bf16.mxu0 %v227_v0  ;;  %v224_v7 = vld [vmem:[%s282_s1 + $0x30] sm:$0xff]   ;;  %v225_v8 = vld [vmem:[%s282_s1 + $0x38] sm:$0xff]   ;;  %v226_v9 = vld [vmem:[%s283_s0] sm:$0xff]  }
   0x4   :  { %v177_v11 = vld [vmem:[%s284_s2] ss:$0 sm:$0xff] }
   0x6   :  { %199 = vmatpush3.bf16.msra.mxu0 %v219_v2 }
   0x7   :  { %200 = vmatprep.subr.bf16.mxu0 %v227_v0 }
   0xa   :  { %201 = vmatpush3.bf16.msra.mxu0 %v220_v3 }
   0xb   :  { %202 = vmatprep.subr.bf16.mxu0 %v227_v0 }
   0xe   :  { %203 = vmatpush3.bf16.msra.mxu0 %v221_v4 }
   0xf   :  { %204 = vmatprep.subr.bf16.mxu0 %v227_v0 }
  0x12   :  { %205 = vmatpush3.bf16.msra.mxu0 %v222_v5 }
  0x13   :  { %206 = vmatprep.subr.bf16.mxu0 %v227_v0 }
  0x16   :  { %207 = vmatpush3.bf16.msra.mxu0 %v223_v6 }
  0x17   :  { %208 = vmatprep.subr.bf16.mxu0 %v227_v0 }
  0x1a   :  { %209 = vmatpush3.bf16.msra.mxu0 %v224_v7 }
  0x1b   :  { %210 = vmatprep.subr.bf16.mxu0 %v227_v0 }
  0x1e   :  { %211 = vmatpush3.bf16.msra.mxu0 %v225_v8 }
  0x21   :  { %213 = vmatmul.mubr.bf16.vlgmr.msra.gmra.mrb[0].mxu0 %v226_v9 }
  0xf4   :  { %v129_v10 = vpop.f32.mrb[0].mxu0 }
  0xf5   :  { %v214_v12 = vpop.f32.mrb[1].mxu0  ;;  %v152_v14 = vadd.f32 %v177_v11, %v129_v10 }
  0xf6   :  { %v132_v13 = vpop.f32.mrb[2].mxu0 }
  0xf7   :  { %v153_v15 = vadd.f32 %v177_v11, %v132_v13  ;;  %v215_v16 = vpop.f32.mrb[3].mxu0 }
  0xf9   :  { %v185_v17 = vpack.c.bf16 %v153_v15, %v152_v14 }
  0xfb   :  { %186 = vst [vmem:[%s285_s3] sm:$0xff] %v185_v17  }

// kernel: _lambda_.72
= control target key start
LH: loop header
LB: loop body
LE: loop exit
PB: predicated region body
PF: predicated region fallthrough
CT: control target
= control target key end

     0   :  { %v229_v0 = vmov 0.0   ;;  %vm230_vm0 = vmmov 0   ;;  %s284_s1 = inlined_call_operand.vmem [shape: bf16[128,128], index: 1, kind: input, shape index: {}]   ;;  %s285_s0 = inlined_call_operand.vmem [shape: bf16[16,128], index: 0, kind: input, shape index: {}]   ;;  %s286_s2 = inlined_call_operand.vmem [shape: f32[1,128], index: 2, kind: input, shape index: {}]   ;;  %s287_s3 = inlined_call_operand.vmem [shape: bf16[16,128], index: 3, kind: output, shape index: {}]  }
   0x1   :  { %198 = vmatprep.subr.bf16.mxu0 %v229_v0  ;;  %v220_v1 = vld [vmem:[%s284_s1] sm:$0xff]   ;;  %214 = vmatprep.mubr.msk.bf16.mxu0 %vm230_vm0, %v229_v0  ;;  %v221_v2 = vld [vmem:[%s284_s1 + $0x8] sm:$0xff]   ;;  %v222_v3 = vld [vmem:[%s284_s1 + $0x10] sm:$0xff]  }
   0x2   :  { %199 = vmatpush3.bf16.msra.mxu0 %v220_v1  ;;  %v223_v4 = vld [vmem:[%s284_s1 + $0x18] sm:$0xff]   ;;  %v224_v5 = vld [vmem:[%s284_s1 + $0x20] sm:$0xff]   ;;  %v225_v6 = vld [vmem:[%s284_s1 + $0x28] sm:$0xff]  }
   0x3   :  { %200 = vmatprep.subr.bf16.mxu0 %v229_v0  ;;  %v226_v7 = vld [vmem:[%s284_s1 + $0x30] sm:$0xff]   ;;  %v227_v8 = vld [vmem:[%s284_s1 + $0x38] sm:$0xff]   ;;  %v228_v9 = vld [vmem:[%s285_s0] sm:$0xff]  }
   0x4   :  { %v179_v10 = vld [vmem:[%s286_s2] ss:$0 sm:$0xff] }
   0x6   :  { %201 = vmatpush3.bf16.msra.mxu0 %v221_v2 }
   0x7   :  { %202 = vmatprep.subr.bf16.mxu0 %v229_v0 }
   0xa   :  { %203 = vmatpush3.bf16.msra.mxu0 %v222_v3 }
   0xb   :  { %204 = vmatprep.subr.bf16.mxu0 %v229_v0 }
   0xe   :  { %205 = vmatpush3.bf16.msra.mxu0 %v223_v4 }
   0xf   :  { %206 = vmatprep.subr.bf16.mxu0 %v229_v0 }
  0x12   :  { %207 = vmatpush3.bf16.msra.mxu0 %v224_v5 }
  0x13   :  { %208 = vmatprep.subr.bf16.mxu0 %v229_v0 }
  0x16   :  { %209 = vmatpush3.bf16.msra.mxu0 %v225_v6 }
  0x17   :  { %210 = vmatprep.subr.bf16.mxu0 %v229_v0 }
  0x1a   :  { %211 = vmatpush3.bf16.msra.mxu0 %v226_v7 }
  0x1b   :  { %212 = vmatprep.subr.bf16.mxu0 %v229_v0 }
  0x1e   :  { %213 = vmatpush3.bf16.msra.mxu0 %v227_v8 }
  0x21   :  { %215 = vmatmul.mubr.bf16.vlgmr.msra.gmra.mrb[0].mxu0 %v228_v9 }
  0xf4   :  { %v129_v11 = vpop.f32.mrb[0].mxu0 }
  0xf5   :  { %v152_v12 = vadd.f32 %v179_v10, %v129_v11  ;;  %v216_v13 = vpop.f32.mrb[1].mxu0 }
  0xf6   :  { %v132_v14 = vpop.f32.mrb[2].mxu0 }
  0xf7   :  { %v153_v15 = vadd.f32 %v179_v10, %v132_v14  ;;  %v217_v16 = vpop.f32.mrb[3].mxu0  ;;  %v154_v17 = vmax.f32 %v152_v12, 0.0 }
  0xf9   :  { %v155_v18 = vmax.f32 %v153_v15, 0.0 }
  0xfb   :  { %v187_v19 = vpack.c.bf16 %v155_v18, %v154_v17 }
  0xfd   :  { %188 = vst [vmem:[%s287_s3] sm:$0xff] %v187_v19  }

// kernel: _lambda_.83
= control target key start
LH: loop header
LB: loop body
LE: loop exit
PB: predicated region body
PF: predicated region fallthrough
CT: control target
= control target key end

     0   :  { %v469_v1 = vmov 0.0   ;;  %vm470_vm0 = vmmov 0   ;;  %s578_s1 = inlined_call_operand.vmem [shape: bf16[384,128], index: 1, kind: input, shape index: {}]   ;;  %s579_s0 = inlined_call_operand.vmem [shape: bf16[16,384], index: 0, kind: input, shape index: {}]   ;;  %s580_s2 = inlined_call_operand.vmem [shape: f32[1,128], index: 2, kind: input, shape index: {}]   ;;  %s581_s3 = inlined_call_operand.vmem [shape: bf16[16,128], index: 3, kind: output, shape index: {}]  }
   0x1   :  { %v441_v0 = vld [vmem:[%s578_s1 + $0x40] sm:$0xff]   ;;  %419 = vmatprep.subr.bf16.mxu1 %v469_v1  ;;  %435 = vmatprep.mubr.msk.bf16.mxu1 %vm470_vm0, %v469_v1  ;;  %v444_v4 = vld [vmem:[%s578_s1 + $0x48] sm:$0xff]   ;;  %v447_v7 = vld [vmem:[%s578_s1 + $0x50] sm:$0xff]  }
   0x2   :  { %v442_v2 = vld [vmem:[%s578_s1] sm:$0xff]   ;;  %388 = vmatprep.subr.bf16.mxu0 %v441_v0  ;;  %v445_v5 = vld [vmem:[%s578_s1 + $0x8] sm:$0xff]   ;;  %v448_v8 = vld [vmem:[%s578_s1 + $0x10] sm:$0xff]  }
   0x3   :  { %v443_v3 = vld [vmem:[%s578_s1 + $0x80] sm:$0xff]   ;;  %389 = vmatpush3.bf16.msra.mxu0 %v442_v2  ;;  %v446_v6 = vld [vmem:[%s578_s1 + $0x88] sm:$0xff]   ;;  %v449_v9 = vld [vmem:[%s578_s1 + $0x90] sm:$0xff]  }
   0x4   :  { %420 = vmatpush3.bf16.msra.mxu1 %v443_v3  ;;  %390 = vmatprep.subr.bf16.mxu0 %v444_v4  ;;  %v450_v10 = vld [vmem:[%s578_s1 + $0x58] sm:$0xff]   ;;  %v453_v13 = vld [vmem:[%s578_s1 + $0x60] sm:$0xff]   ;;  %v456_v16 = vld [vmem:[%s578_s1 + $0x68] sm:$0xff]  }
   0x5   :  { %421 = vmatprep.subr.bf16.mxu1 %v469_v1  ;;  %v451_v11 = vld [vmem:[%s578_s1 + $0x18] sm:$0xff]   ;;  %v454_v14 = vld [vmem:[%s578_s1 + $0x20] sm:$0xff]   ;;  %v457_v17 = vld [vmem:[%s578_s1 + $0x28] sm:$0xff]  }
   0x6   :  { %v452_v12 = vld [vmem:[%s578_s1 + $0x98] sm:$0xff]   ;;  %v455_v15 = vld [vmem:[%s578_s1 + $0xa0] sm:$0xff]   ;;  %v458_v18 = vld [vmem:[%s578_s1 + $0xa8] sm:$0xff]  }
   0x7   :  { %391 = vmatpush3.bf16.msra.mxu0 %v445_v5  ;;  %v459_v19 = vld [vmem:[%s578_s1 + $0x70] sm:$0xff]   ;;  %v462_v22 = vld [vmem:[%s578_s1 + $0x78] sm:$0xff]   ;;  %v465_v26 = vld [vmem:[%s579_s0] ss:$12 sps:$4 sm:$0xff]  }
   0x8   :  { %422 = vmatpush3.bf16.msra.mxu1 %v446_v6  ;;  %392 = vmatprep.subr.bf16.mxu0 %v447_v7  ;;  %v460_v20 = vld [vmem:[%s578_s1 + $0x30] sm:$0xff]   ;;  %v463_v24 = vld [vmem:[%s578_s1 + $0x38] sm:$0xff]   ;;  %v378_v34 = vld [vmem:[%s580_s2] ss:$0 sm:$0xff] }
   0x9   :  { %423 = vmatprep.subr.bf16.mxu1 %v469_v1  ;;  %v461_v21 = vld [vmem:[%s578_s1 + $0xb0] sm:$0xff]   ;;  %v464_v25 = vld [vmem:[%s578_s1 + $0xb8] sm:$0xff]  }
   0xa   :  { %v467_v23 = vld [vmem:[%s579_s0 + $0x4] ss:$12 sps:$4 sm:$0xff]   ;;  %v468_v27 = vld [vmem:[%s579_s0 + $0x8] ss:$12 sps:$4 sm:$0xff]  }
   0xb   :  { %393 = vmatpush3.bf16.msra.mxu0 %v448_v8  ;;  %267 = vmatprep.mubr.bf16.mxu0 %v467_v23 }
   0xc   :  { %424 = vmatpush3.bf16.msra.mxu1 %v449_v9  ;;  %394 = vmatprep.subr.bf16.mxu0 %v450_v10 }
   0xd   :  { %425 = vmatprep.subr.bf16.mxu1 %v469_v1 }
   0xf   :  { %395 = vmatpush3.bf16.msra.mxu0 %v451_v11 }
  0x10   :  { %426 = vmatpush3.bf16.msra.mxu1 %v452_v12  ;;  %396 = vmatprep.subr.bf16.mxu0 %v453_v13 }
  0x11   :  { %427 = vmatprep.subr.bf16.mxu1 %v469_v1 }
  0x13   :  { %397 = vmatpush3.bf16.msra.mxu0 %v454_v14 }
  0x14   :  { %428 = vmatpush3.bf16.msra.mxu1 %v455_v15  ;;  %398 = vmatprep.subr.bf16.mxu0 %v456_v16 }
  0x15   :  { %429 = vmatprep.subr.bf16.mxu1 %v469_v1 }
  0x17   :  { %399 = vmatpush3.bf16.msra.mxu0 %v457_v17 }
  0x18   :  { %430 = vmatpush3.bf16.msra.mxu1 %v458_v18  ;;  %400 = vmatprep.subr.bf16.mxu0 %v459_v19 }
  0x19   :  { %431 = vmatprep.subr.bf16.mxu1 %v469_v1 }
  0x1b   :  { %401 = vmatpush3.bf16.msra.mxu0 %v460_v20 }
  0x1c   :  { %432 = vmatpush3.bf16.msra.mxu1 %v461_v21  ;;  %402 = vmatprep.subr.bf16.mxu0 %v462_v22 }
  0x1d   :  { %433 = vmatprep.subr.bf16.mxu1 %v469_v1 }
  0x1f   :  { %403 = vmatpush3.bf16.msra.mxu0 %v463_v24 }
  0x20   :  { %434 = vmatpush3.bf16.msra.mxu1 %v464_v25 }
  0x22   :  { %268 = vmatmul.mubr.bf16.vlgmr.msra.gmra.mrb[0].mxu0 %v465_v26 }
  0x23   :  { %436 = vmatmul.mubr.bf16.vlgmr.msra.gmra.mrb[0].mxu1 %v468_v27 }
  0xf5   :  { %v404_v28 = vpop.f32.mrb[0].mxu0 }
  0xf6   :  { %v310_v29 = vpop.f32.mrb[0].mxu1  ;;  %v405_v30 = vpop.f32.mrb[1].mxu0 }
  0xf7   :  { %v406_v31 = vadd.f32 %v405_v30, %v404_v28  ;;  %v437_v32 = vpop.f32.mrb[1].mxu1  ;;  %v407_v33 = vpop.f32.mrb[2].mxu0 }
  0xf8   :  { %v313_v35 = vpop.f32.mrb[2].mxu1  ;;  %v408_v36 = vpop.f32.mrb[3].mxu0 }
  0xf9   :  { %v311_v37 = vadd.f32 %v406_v31, %v310_v29  ;;  %v409_v38 = vadd.f32 %v408_v36, %v407_v33  ;;  %v438_v39 = vpop.f32.mrb[3].mxu1 }
  0xfb   :  { %v333_v40 = vadd.f32 %v378_v34, %v311_v37  ;;  %v314_v41 = vadd.f32 %v409_v38, %v313_v35 }
  0xfd   :  { %v334_v42 = vadd.f32 %v378_v34, %v314_v41  ;;  %v335_v43 = vmax.f32 %v333_v40, 0.0 }
  0xff   :  { %v336_v44 = vmax.f32 %v334_v42, 0.0 }
 0x101   :  { %v386_v45 = vpack.c.bf16 %v336_v44, %v335_v43 }
 0x103   :  { %387 = vst [vmem:[%s581_s3] sm:$0xff] %v386_v45  }

// kernel: _lambda_.100
= control target key start
LH: loop header
LB: loop body
LE: loop exit
PB: predicated region body
PF: predicated region fallthrough
CT: control target
= control target key end

     0   :  { %s820_s12 = smov 0   ;;  %s822_s13 = smov 0   ;;  %s922_s0 = inlined_call_operand.vmem [shape: bf16[16,128], index: 0, kind: input, shape index: {}]   ;;  %s923_s1 = inlined_call_operand.vmem [shape: bf16[128,256], index: 1, kind: input, shape index: {}]   ;;  %s924_s2 = inlined_call_operand.vmem [shape: f32[1,256], index: 2, kind: input, shape index: {}]   ;;  %s925_s3 = inlined_call_operand.vmem [shape: bf16[16,256], index: 3, kind: output, shape index: {}]  }
   0x1   :  { %s824_s14 = smov 0   ;;  %s826_s15 = smov 0  }
   0x2   :  { %s828_s16 = smov 0  }
   0x3 LB: > { %s28_s17 = sadd.s32 1, %s792_s15  ;;  %s645_s18 = sadd.s32 4294967295, %s796_s16   ;;  %s796_s16 = sphi %s828_s16, %s13_s16   ;;  %s792_s15 = sphi %s826_s15, %s930_s15   ;;  %s788_s14 = sphi %s824_s14, %s929_s14   ;;  %s784_s13 = sphi %s822_s13, %s928_s13   ;;  %s780_s12 = sphi %s820_s12, %s927_s12  }
   0x4   : > { %p30_p0 = scmp.ge.s32.totalorder %s28_s17, 2  ;;  %p76_p1 = scmp.ne.s32.totalorder %s784_s13, %s780_s12 }
   0x5   : > { %p77_p2 = scmp.eq.s32.totalorder %s796_s16, 0  ;;  %p134_p4 = scmp.eq.s32.totalorder %s645_s18, 1 }
   0x6   : > { %s932_s17 = smov (%p30_p0, %s28_s17), 0  ;;  %s69_s20 = sadd.s32 1, %s784_s13 }
   0x7   : > { %p78_p3 = por %p77_p2, %p76_p1  ;;  %s65_s19 = ssub.s32 %s792_s15, %s932_s17 }
   0x8   : > { %p67_p5 = scmp.eq.s32.totalorder %s65_s19, 0  ;;  %p855_p6 = por %p134_p4, %p76_p1 }
   0x9   : > { %p649_p7 = scmp.ge.s32.totalorder %s796_s16, 2 }
   0xa   : > { %s860_s22 = scalar_select %p67_p5, %s784_s13, %s69_s20  }
   0xb   : > { %168 = sbr.rel (%p649_p7) target bundleno = 32 (0x20), region = 20 }
  0x12   : > { %171 = sbr.rel (!%p78_p3) target bundleno = 32 (0x20), region = 24  ;;  %s173_s23 = sand.u32 (%p78_p3), 1, %s784_s13  }
  0x13   : > { %s651_s24 = sshll.u32 (%p78_p3), %s792_s15, 2  ;;  %s650_s25 = sshll.u32 (%p78_p3), %s173_s23, 6 }
  0x14   : > { %s868_s28 = scalar_lea.vmem (%p78_p3), %s923_s1, %s651_s24  ;;  %s175_s29 = scalar_lea.vmem (%p78_p3), [#allocation3], %s650_s25 }
  0x15   : > { %v196_v0 = vld [vmem:[%s868_s28] sm:$0xf] (%p78_p3)  ;;  %v198_v1 = vld [vmem:[%s868_s28 + $0x8] sm:$0xf] (%p78_p3)  ;;  %v200_v2 = vld [vmem:[%s868_s28 + $0x10] sm:$0xf] (%p78_p3) }
  0x16   : > { %197 = vst [vmem:[%s175_s29] sm:$0xf] (%p78_p3), %v196_v0  ;;  %199 = vst [vmem:[%s175_s29 + $0x4] sm:$0xf] (%p78_p3), %v198_v1  ;;  %v202_v3 = vld [vmem:[%s868_s28 + $0x18] sm:$0xf] (%p78_p3) }
  0x17   : > { %v204_v4 = vld [vmem:[%s868_s28 + $0x20] sm:$0xf] (%p78_p3)  ;;  %201 = vst [vmem:[%s175_s29 + $0x8] sm:$0xf] (%p78_p3), %v200_v2  ;;  %203 = vst [vmem:[%s175_s29 + $0xc] sm:$0xf] (%p78_p3), %v202_v3 }
  0x18   : > { %205 = vst [vmem:[%s175_s29 + $0x10] sm:$0xf] (%p78_p3), %v204_v4  ;;  %v206_v5 = vld [vmem:[%s868_s28 + $0x28] sm:$0xf] (%p78_p3)  ;;  %v208_v6 = vld [vmem:[%s868_s28 + $0x30] sm:$0xf] (%p78_p3) }
  0x19   : > { %v210_v7 = vld [vmem:[%s868_s28 + $0x38] sm:$0xf]  ;;  %207 = vst [vmem:[%s175_s29 + $0x14] sm:$0xf] %v206_v5  ;;  %209 = vst [vmem:[%s175_s29 + $0x18] sm:$0xf] %v208_v6 }
  0x1a   : > { %211 = vst [vmem:[%s175_s29 + $0x1c] sm:$0xf] %v210_v7  ;;  %v212_v8 = vld [vmem:[%s868_s28 + $0x40] sm:$0xf]  ;;  %v214_v9 = vld [vmem:[%s868_s28 + $0x48] sm:$0xf] }
  0x1b   : > { %v216_v10 = vld [vmem:[%s868_s28 + $0x50] sm:$0xf]  ;;  %213 = vst [vmem:[%s175_s29 + $0x20] sm:$0xf] %v212_v8  ;;  %215 = vst [vmem:[%s175_s29 + $0x24] sm:$0xf] %v214_v9 }
  0x1c   : > { %217 = vst [vmem:[%s175_s29 + $0x28] sm:$0xf] %v216_v10  ;;  %v218_v11 = vld [vmem:[%s868_s28 + $0x58] sm:$0xf]  ;;  %v220_v12 = vld [vmem:[%s868_s28 + $0x60] sm:$0xf] }
  0x1d   : > { %v222_v13 = vld [vmem:[%s868_s28 + $0x68] sm:$0xf]  ;;  %219 = vst [vmem:[%s175_s29 + $0x2c] sm:$0xf] %v218_v11  ;;  %221 = vst [vmem:[%s175_s29 + $0x30] sm:$0xf] %v220_v12 }
  0x1e   : > { %223 = vst [vmem:[%s175_s29 + $0x34] sm:$0xf] %v222_v13  ;;  %v224_v14 = vld [vmem:[%s868_s28 + $0x70] sm:$0xf]  ;;  %v226_v15 = vld [vmem:[%s868_s28 + $0x78] sm:$0xf] }
  0x1f   : > { %225 = vst [vmem:[%s175_s29 + $0x38] sm:$0xf] %v224_v14  ;;  %227 = vst [vmem:[%s175_s29 + $0x3c] sm:$0xf] %v226_v15 }
  0x20 PF: > { %p652_p8 = scmp.ge.s32.totalorder %s796_s16, 1  ;;  %p287_p9 = scmp.lt.s32.totalorder %s796_s16, 3 }
  0x22   : > { %p288_p10 = pnand %p652_p8, %p287_p9 }
  0x23   : > { %s294_s30 = sand.u32 (!%p288_p10), 1, %s780_s12   ;;  %v798_v16 = vmov (!%p288_p10), 0.0   ;;  %vm799_vm0 = vmmov (!%p288_p10), 0   ;;  %v757_v25 = vld [vmem:[%s922_s0] sm:$0xff] (!%p288_p10)   ;;  %p337_p11 = scmp.lt.s32.totalorder (!%p288_p10), %s788_s14, 1 }
  0x24   : > { %291 = sbr.rel (%p288_p10) target bundleno = 297 (0x129), region = 69  ;;  %687 = vmatprep.subr.bf16.mxu0 (!%p288_p10), %v798_v16  ;;  %s653_s4 = sshll.u32 (!%p288_p10), %s294_s30, 6  ;;  %703 = vmatprep.mubr.msk.bf16.mxu0 (!%p288_p10), %vm799_vm0, %v798_v16 }
  0x25   : > { %s296_s5 = scalar_lea.vmem (!%p288_p10), [#allocation3], %s653_s4  ;;  %s654_s18 = sshll.u32 (!%p288_p10), %s294_s30, 3 }
  0x26   : > { %v749_v17 = vld [vmem:[%s296_s5] sm:$0xff] (!%p288_p10)   ;;  %v750_v18 = vld [vmem:[%s296_s5 + $0x8] sm:$0xff] (!%p288_p10)   ;;  %v751_v19 = vld [vmem:[%s296_s5 + $0x10] sm:$0xff] (!%p288_p10)   ;;  %s326_s19 = scalar_lea.vmem (!%p288_p10), [#allocation4], %s654_s18 }
  0x27   : > { %688 = vmatpush3.bf16.msra.mxu0 (!%p288_p10), %v749_v17  ;;  %v752_v20 = vld [vmem:[%s296_s5 + $0x18] sm:$0xff] (!%p288_p10)   ;;  %v753_v21 = vld [vmem:[%s296_s5 + $0x20] sm:$0xff] (!%p288_p10)   ;;  %v754_v22 = vld [vmem:[%s296_s5 + $0x28] sm:$0xff] (!%p288_p10)  }
  0x28   : > { %689 = vmatprep.subr.bf16.mxu0 (!%p288_p10), %v798_v16  ;;  %v755_v23 = vld [vmem:[%s296_s5 + $0x30] sm:$0xff] (!%p288_p10)   ;;  %v756_v24 = vld [vmem:[%s296_s5 + $0x38] sm:$0xff] (!%p288_p10)  }
  0x2b   : > { %690 = vmatpush3.bf16.msra.mxu0 %v750_v18  ;;  %s338_s8 = scalar_select %p337_p11, %s788_s14, 1 }
  0x2c   : > { %691 = vmatprep.subr.bf16.mxu0 %v798_v16  ;;  %s668_s20 = sshll.u32 (%p855_p6), %s788_s14, 2 }
  0x2d   : > { %s339_s11 = scalar_lea.vmem %s924_s2, %s338_s8  ;;  %s502_s25 = scalar_lea.vmem (%p855_p6), %s925_s3, %s668_s20 }
  0x2e   : > { %v664_v27 = vld [vmem:[%s339_s11] ss:$0 sm:$0xff] }
  0x2f   : > { %692 = vmatpush3.bf16.msra.mxu0 %v751_v19 }
  0x30   : > { %693 = vmatprep.subr.bf16.mxu0 %v798_v16 }
  0x33   : > { %694 = vmatpush3.bf16.msra.mxu0 %v752_v20 }
  0x34   : > { %695 = vmatprep.subr.bf16.mxu0 %v798_v16 }
  0x37   : > { %696 = vmatpush3.bf16.msra.mxu0 %v753_v21 }
  0x38   : > { %697 = vmatprep.subr.bf16.mxu0 %v798_v16 }
  0x3b   : > { %698 = vmatpush3.bf16.msra.mxu0 %v754_v22 }
  0x3c   : > { %699 = vmatprep.subr.bf16.mxu0 %v798_v16 }
  0x3f   : > { %700 = vmatpush3.bf16.msra.mxu0 %v755_v23 }
  0x40   : > { %701 = vmatprep.subr.bf16.mxu0 %v798_v16 }
  0x43   : > { %702 = vmatpush3.bf16.msra.mxu0 %v756_v24 }
  0x46   : > { %704 = vmatmul.mubr.bf16.vlgmr.msra.gmra.mrb[0].mxu0 %v757_v25 }
 0x119   : > { %v456_v26 = vpop.f32.mrb[0].mxu0 }
 0x11a   : > { %v705_v28 = vpop.f32.mrb[1].mxu0  ;;  %v479_v30 = vadd.f32 %v664_v27, %v456_v26  ;;  %497 = sbr.rel (!%p855_p6) target bundleno = 297 (0x129), region = 85 }
 0x11b   : > { %v459_v29 = vpop.f32.mrb[2].mxu0 }
 0x11c   : > { %v480_v31 = vadd.f32 %v664_v27, %v459_v29  ;;  %v706_v32 = vpop.f32.mrb[3].mxu0 }
 0x11e   : > { %v676_v33 = vpack.c.bf16 %v480_v31, %v479_v30 }
 0x120   : > { %677 = vst [vmem:[%s326_s19] sm:$0xff] %v676_v33  }
 0x127   : > { %v518_v34 = vld [vmem:[%s326_s19] sm:$0xf]  ;;  %v520_v35 = vld [vmem:[%s326_s19 + $0x4] sm:$0xf] }
 0x128   : > { %519 = vst [vmem:[%s502_s25] sm:$0xf] %v518_v34  ;;  %521 = vst [vmem:[%s502_s25 + $0x8] sm:$0xf] %v520_v35 }
 0x129 PF: > { %s13_s16 = sadd.s32 1, %s796_s16   ;;  %s927_s12 = smov %s784_s13 }
 0x12a   : > { %p10_p12 = scmp.ge.s32.totalorder %s13_s16, 4   ;;  %s928_s13 = smov %s860_s22 }
 0x12b   : > { %s929_s14 = smov %s792_s15  ;;  %s930_s15 = smov %s932_s17 }
 0x12c   :  { %12 = sbr.rel (!%p10_p12) target bundleno = 3 (0x3), region = 163 }

// kernel: _lambda_.103
= control target key start
LH: loop header
LB: loop body
LE: loop exit
PB: predicated region body
PF: predicated region fallthrough
CT: control target
= control target key end

     0   :  { %s958_s15 = smov 0   ;;  %s960_s16 = smov 0   ;;  %s1073_s0 = inlined_call_operand.vmem [shape: bf16[16,128], index: 0, kind: input, shape index: {}]   ;;  %s1074_s1 = inlined_call_operand.vmem [shape: bf16[128,256], index: 1, kind: input, shape index: {}]   ;;  %s1075_s2 = inlined_call_operand.vmem [shape: f32[1,256], index: 2, kind: input, shape index: {}]   ;;  %s1076_s3 = inlined_call_operand.vmem [shape: bf16[16,256], index: 3, kind: input, shape index: {}]   ;;  %s1077_s4 = inlined_call_operand.vmem [shape: bf16[16,256], index: 4, kind: output, shape index: {}]  }
   0x1   :  { %s962_s17 = smov 0   ;;  %s964_s18 = smov 0  }
   0x2   :  { %s966_s19 = smov 0  }
   0x3 LB: > { %s29_s20 = sadd.s32 1, %s925_s18  ;;  %s771_s21 = sadd.s32 4294967295, %s929_s19   ;;  %s929_s19 = sphi %s966_s19, %s14_s19   ;;  %s925_s18 = sphi %s964_s18, %s1083_s18   ;;  %s921_s17 = sphi %s962_s17, %s1082_s17   ;;  %s917_s16 = sphi %s960_s16, %s1081_s16   ;;  %s913_s15 = sphi %s958_s15, %s1080_s15  }
   0x4   : > { %p31_p0 = scmp.ge.s32.totalorder %s29_s20, 2  ;;  %p77_p1 = scmp.ne.s32.totalorder %s917_s16, %s913_s15 }
   0x5   : > { %p78_p2 = scmp.eq.s32.totalorder %s929_s19, 0  ;;  %p163_p4 = scmp.eq.s32.totalorder %s771_s21, 1 }
   0x6   : > { %s1085_s20 = smov (%p31_p0, %s29_s20), 0  ;;  %s70_s24 = sadd.s32 1, %s917_s16 }
   0x7   : > { %p990_p3 = por %p78_p2, %p77_p1  ;;  %s66_s23 = ssub.s32 %s925_s18, %s1085_s20 }
   0x8   : > { %p68_p5 = scmp.eq.s32.totalorder %s66_s23, 0  ;;  %p997_p6 = por %p163_p4, %p77_p1 }
   0x9   : > { %p775_p7 = scmp.ge.s32.totalorder %s929_s19, 2 }
   0xa   : > { %s1002_s26 = scalar_select %p68_p5, %s917_s16, %s70_s24  }
   0xb   : > { %197 = sbr.rel (%p775_p7) target bundleno = 39 (0x27), region = 20 }
  0x12   : > { %200 = sbr.rel (!%p990_p3) target bundleno = 32 (0x20), region = 24  ;;  %s202_s27 = sand.u32 (%p990_p3), 1, %s917_s16  }
  0x13   : > { %s777_s28 = sshll.u32 (%p990_p3), %s925_s18, 2  ;;  %s776_s29 = sshll.u32 (%p990_p3), %s202_s27, 6 }
  0x14   : > { %s1012_s6 = scalar_lea.vmem (%p990_p3), %s1074_s1, %s777_s28  ;;  %s204_s7 = scalar_lea.vmem (%p990_p3), [#allocation3], %s776_s29 }
  0x15   : > { %v225_v0 = vld [vmem:[%s1012_s6] sm:$0xf] (%p990_p3)  ;;  %v227_v1 = vld [vmem:[%s1012_s6 + $0x8] sm:$0xf] (%p990_p3)  ;;  %v229_v2 = vld [vmem:[%s1012_s6 + $0x10] sm:$0xf] (%p990_p3) }
  0x16   : > { %226 = vst [vmem:[%s204_s7] sm:$0xf] (%p990_p3), %v225_v0  ;;  %228 = vst [vmem:[%s204_s7 + $0x4] sm:$0xf] (%p990_p3), %v227_v1  ;;  %v231_v3 = vld [vmem:[%s1012_s6 + $0x18] sm:$0xf] (%p990_p3) }
  0x17   : > { %v233_v4 = vld [vmem:[%s1012_s6 + $0x20] sm:$0xf] (%p990_p3)  ;;  %230 = vst [vmem:[%s204_s7 + $0x8] sm:$0xf] (%p990_p3), %v229_v2  ;;  %232 = vst [vmem:[%s204_s7 + $0xc] sm:$0xf] (%p990_p3), %v231_v3 }
  0x18   : > { %234 = vst [vmem:[%s204_s7 + $0x10] sm:$0xf] (%p990_p3), %v233_v4  ;;  %v235_v5 = vld [vmem:[%s1012_s6 + $0x28] sm:$0xf] (%p990_p3)  ;;  %v237_v6 = vld [vmem:[%s1012_s6 + $0x30] sm:$0xf] (%p990_p3) }
  0x19   : > { %v239_v7 = vld [vmem:[%s1012_s6 + $0x38] sm:$0xf]  ;;  %236 = vst [vmem:[%s204_s7 + $0x14] sm:$0xf] %v235_v5  ;;  %238 = vst [vmem:[%s204_s7 + $0x18] sm:$0xf] %v237_v6 }
  0x1a   : > { %240 = vst [vmem:[%s204_s7 + $0x1c] sm:$0xf] %v239_v7  ;;  %v241_v8 = vld [vmem:[%s1012_s6 + $0x40] sm:$0xf]  ;;  %v243_v9 = vld [vmem:[%s1012_s6 + $0x48] sm:$0xf] }
  0x1b   : > { %v245_v10 = vld [vmem:[%s1012_s6 + $0x50] sm:$0xf]  ;;  %242 = vst [vmem:[%s204_s7 + $0x20] sm:$0xf] %v241_v8  ;;  %244 = vst [vmem:[%s204_s7 + $0x24] sm:$0xf] %v243_v9 }
  0x1c   : > { %246 = vst [vmem:[%s204_s7 + $0x28] sm:$0xf] %v245_v10  ;;  %v247_v11 = vld [vmem:[%s1012_s6 + $0x58] sm:$0xf]  ;;  %v249_v12 = vld [vmem:[%s1012_s6 + $0x60] sm:$0xf] }
  0x1d   : > { %v251_v13 = vld [vmem:[%s1012_s6 + $0x68] sm:$0xf]  ;;  %248 = vst [vmem:[%s204_s7 + $0x2c] sm:$0xf] %v247_v11  ;;  %250 = vst [vmem:[%s204_s7 + $0x30] sm:$0xf] %v249_v12 }
  0x1e   : > { %252 = vst [vmem:[%s204_s7 + $0x34] sm:$0xf] %v251_v13  ;;  %v253_v14 = vld [vmem:[%s1012_s6 + $0x70] sm:$0xf]  ;;  %v255_v15 = vld [vmem:[%s1012_s6 + $0x78] sm:$0xf] }
  0x1f   : > { %254 = vst [vmem:[%s204_s7 + $0x38] sm:$0xf] %v253_v14  ;;  %256 = vst [vmem:[%s204_s7 + $0x3c] sm:$0xf] %v255_v15 }
  0x20 PF: > { %317 = sbr.rel (!%p990_p3) target bundleno = 39 (0x27), region = 69  ;;  %s319_s8 = sand.u32 (%p990_p3), 1, %s917_s16  }
  0x21   : > { %s779_s9 = sshll.u32 (%p990_p3), %s925_s18, 2  ;;  %s778_s10 = sshll.u32 (%p990_p3), %s319_s8, 3 }
  0x22   : > { %s326_s13 = scalar_lea.vmem (%p990_p3), %s1076_s3, %s779_s9  ;;  %s321_s14 = scalar_lea.vmem (%p990_p3), [#allocation4], %s778_s10 }
  0x23   : > { %v342_v16 = vld [vmem:[%s326_s13] sm:$0xf] (%p990_p3)  ;;  %v344_v17 = vld [vmem:[%s326_s13 + $0x8] sm:$0xf] (%p990_p3) }
  0x24   : > { %343 = vst [vmem:[%s321_s14] sm:$0xf] (%p990_p3), %v342_v16  ;;  %345 = vst [vmem:[%s321_s14 + $0x4] sm:$0xf] (%p990_p3), %v344_v17 }
  0x27 PF: > { %p780_p8 = scmp.ge.s32.totalorder %s929_s19, 1  ;;  %p371_p9 = scmp.lt.s32.totalorder %s929_s19, 3 }
  0x29   : > { %p372_p10 = pnand %p780_p8, %p371_p9 }
  0x2a   : > { %s378_s21 = sand.u32 (!%p372_p10), 1, %s913_s15   ;;  %v931_v18 = vmov (!%p372_p10), 0.0   ;;  %vm932_vm0 = vmmov (!%p372_p10), 0   ;;  %v890_v27 = vld [vmem:[%s1073_s0] sm:$0xff] (!%p372_p10)   ;;  %p434_p11 = scmp.lt.s32.totalorder (!%p372_p10), %s921_s17, 1 }
  0x2b   : > { %375 = sbr.rel (%p372_p10) target bundleno = 308 (0x134), region = 110  ;;  %820 = vmatprep.subr.bf16.mxu0 (!%p372_p10), %v931_v18  ;;  %s781_s22 = sshll.u32 (!%p372_p10), %s378_s21, 6  ;;  %836 = vmatprep.mubr.msk.bf16.mxu0 (!%p372_p10), %vm932_vm0, %v931_v18 }
  0x2c   : > { %s380_s23 = scalar_lea.vmem (!%p372_p10), [#allocation3], %s781_s22  ;;  %s782_s28 = sshll.u32 (!%p372_p10), %s378_s21, 3 }
  0x2d   : > { %v882_v19 = vld [vmem:[%s380_s23] sm:$0xff] (!%p372_p10)   ;;  %v883_v20 = vld [vmem:[%s380_s23 + $0x8] sm:$0xff] (!%p372_p10)   ;;  %v884_v21 = vld [vmem:[%s380_s23 + $0x10] sm:$0xff] (!%p372_p10)   ;;  %s387_s7 = scalar_lea.vmem (!%p372_p10), [#allocation4], %s782_s28  ;;  %s423_s15 = scalar_lea.vmem (!%p372_p10), [#allocation5], %s782_s28 }
  0x2e   : > { %821 = vmatpush3.bf16.msra.mxu0 (!%p372_p10), %v882_v19  ;;  %v885_v22 = vld [vmem:[%s380_s23 + $0x18] sm:$0xff] (!%p372_p10)   ;;  %v886_v23 = vld [vmem:[%s380_s23 + $0x20] sm:$0xff] (!%p372_p10)   ;;  %v887_v24 = vld [vmem:[%s380_s23 + $0x28] sm:$0xff] (!%p372_p10)  }
  0x2f   : > { %822 = vmatprep.subr.bf16.mxu0 (!%p372_p10), %v931_v18  ;;  %v888_v25 = vld [vmem:[%s380_s23 + $0x30] sm:$0xff] (!%p372_p10)   ;;  %v889_v26 = vld [vmem:[%s380_s23 + $0x38] sm:$0xff] (!%p372_p10)   ;;  %v803_v28 = vld [vmem:[%s387_s7] sm:$0xff] (!%p372_p10)  }
  0x30   : > { %v804_v30 = vunpack.c.l.bf16 (!%p372_p10), %v803_v28  ;;  %v805_v34 = vunpack.c.h.bf16 (!%p372_p10), %v803_v28 }
  0x32   : > { %823 = vmatpush3.bf16.msra.mxu0 %v883_v20  ;;  %s435_s29 = scalar_select %p434_p11, %s921_s17, 1 }
  0x33   : > { %824 = vmatprep.subr.bf16.mxu0 %v931_v18  ;;  %s797_s8 = sshll.u32 (%p997_p6), %s921_s17, 2 }
  0x34   : > { %s436_s6 = scalar_lea.vmem %s1075_s2, %s435_s29  ;;  %s608_s11 = scalar_lea.vmem (%p997_p6), %s1077_s4, %s797_s8 }
  0x35   : > { %v793_v29 = vld [vmem:[%s436_s6] ss:$0 sm:$0xff] }
  0x36   : > { %825 = vmatpush3.bf16.msra.mxu0 %v884_v21 }
  0x37   : > { %826 = vmatprep.subr.bf16.mxu0 %v931_v18 }
  0x3a   : > { %827 = vmatpush3.bf16.msra.mxu0 %v885_v22 }
  0x3b   : > { %828 = vmatprep.subr.bf16.mxu0 %v931_v18 }
  0x3e   : > { %829 = vmatpush3.bf16.msra.mxu0 %v886_v23 }
  0x3f   : > { %830 = vmatprep.subr.bf16.mxu0 %v931_v18 }
  0x42   : > { %831 = vmatpush3.bf16.msra.mxu0 %v887_v24 }
  0x43   : > { %832 = vmatprep.subr.bf16.mxu0 %v931_v18 }
  0x46   : > { %833 = vmatpush3.bf16.msra.mxu0 %v888_v25 }
  0x47   : > { %834 = vmatprep.subr.bf16.mxu0 %v931_v18 }
  0x4a   : > { %835 = vmatpush3.bf16.msra.mxu0 %v889_v26 }
  0x4d   : > { %837 = vmatmul.mubr.bf16.vlgmr.msra.gmra.mrb[0].mxu0 %v890_v27 }
 0x120   : > { %v554_v31 = vpop.f32.mrb[0].mxu0 }
 0x121   : > { %v577_v32 = vadd.f32 %v793_v29, %v554_v31  ;;  %v838_v33 = vpop.f32.mrb[1].mxu0 }
 0x122   : > { %v557_v35 = vpop.f32.mrb[2].mxu0 }
 0x123   : > { %v583_v36 = vadd.f32 %v804_v30, %v577_v32  ;;  %v578_v37 = vadd.f32 %v793_v29, %v557_v35  ;;  %v839_v38 = vpop.f32.mrb[3].mxu0 }
 0x125   : > { %v584_v39 = vadd.f32 %v805_v34, %v578_v37  ;;  %v585_v40 = vmax.f32 %v583_v36, 0.0  ;;  %603 = sbr.rel (!%p997_p6) target bundleno = 308 (0x134), region = 130 }
 0x127   : > { %v586_v41 = vmax.f32 %v584_v39, 0.0 }
 0x129   : > { %v809_v42 = vpack.c.bf16 %v586_v41, %v585_v40 }
 0x12b   : > { %810 = vst [vmem:[%s423_s15] sm:$0xff] %v809_v42  }
 0x132   : > { %v624_v43 = vld [vmem:[%s423_s15] sm:$0xf]  ;;  %v626_v44 = vld [vmem:[%s423_s15 + $0x4] sm:$0xf] }
 0x133   : > { %625 = vst [vmem:[%s608_s11] sm:$0xf] %v624_v43  ;;  %627 = vst [vmem:[%s608_s11 + $0x8] sm:$0xf] %v626_v44 }
 0x134 PF: > { %s14_s19 = sadd.s32 1, %s929_s19   ;;  %s1080_s15 = smov %s917_s16 }
 0x135   : > { %p11_p12 = scmp.ge.s32.totalorder %s14_s19, 4   ;;  %s1081_s16 = smov %s1002_s26 }
 0x136   : > { %s1082_s17 = smov %s925_s18  ;;  %s1083_s18 = smov %s1085_s20 }
 0x137   :  { %13 = sbr.rel (!%p11_p12) target bundleno = 3 (0x3), region = 216 }

// kernel: _lambda_.110
= control target key start
LH: loop header
LB: loop body
LE: loop exit
PB: predicated region body
PF: predicated region fallthrough
CT: control target
= control target key end

     0   :  { %vm21_vm0 = vcmask 1041409   ;;  %vm23_vm1 = vcmask 1043459   ;;  %vm25_vm2 = vcmask 1045509   ;;  %vm27_vm3 = vcmask 1047559   ;;  %s54_s0 = inlined_call_operand.vmem [shape: bf16[2,1,256], index: 0, kind: input, shape index: {}]   ;;  %s55_s1 = inlined_call_operand.vmem [shape: f32[2,256], index: 1, kind: output, shape index: {}]  }
   0x1   :  { %v8_v0 = vld [vmem:[%s54_s0] sm:$0x3]  ;;  %v9_v1 = vld [vmem:[%s54_s0 + $0x2] sm:$0x3] }
   0x2   :  { %v10_v2 = vunpack.c.l.bf16 %v8_v0  ;;  %v11_v3 = vunpack.c.l.bf16 %v9_v1 }
   0x4   :  { %v20_v4 = vrot.slane %v11_v3, 7 }
   0x6   :  { %v22_v5 = vsel %vm21_vm0, %v20_v4, %v10_v2 }
   0x7   :  { %v24_v6 = vsel %vm23_vm1, %v20_v4, %v22_v5 }
   0x8   :  { %v26_v7 = vsel %vm25_vm2, %v20_v4, %v24_v6 }
   0x9   :  { %v28_v8 = vsel %vm27_vm3, %v20_v4, %v26_v7 }
   0xa   :  { %30 = vst [vmem:[%s55_s1] sm:$0xf] %v28_v8 }

// kernel: _lambda_.102
= control target key start
LH: loop header
LB: loop body
LE: loop exit
PB: predicated region body
PF: predicated region fallthrough
CT: control target
= control target key end

     0   :  { %s1040_s12 = smov 0   ;;  %s1042_s13 = smov 0   ;;  %s1153_s0 = inlined_call_operand.vmem [shape: bf16[16,1024], index: 0, kind: input, shape index: {}]   ;;  %s1154_s1 = inlined_call_operand.vmem [shape: bf16[1024,128], index: 1, kind: input, shape index: {}]   ;;  %s1155_s2 = inlined_call_operand.vmem [shape: f32[1,128], index: 2, kind: input, shape index: {}]   ;;  %s1156_s3 = inlined_call_operand.vmem [shape: bf16[16,128], index: 3, kind: output, shape index: {}]  }
   0x1   :  { %s1044_s14 = smov 0   ;;  %s1046_s15 = smov 0  }
   0x2   :  { %s1048_s16 = smov 0  }
   0x3 LB: > { %s25_s17 = sadd.s32 1, %s1013_s15  ;;  %p48_p1 = scmp.ne.s32.totalorder %s1005_s13, %s1001_s12  ;;  %s1017_s16 = sphi %s1048_s16, %s13_s16   ;;  %s1013_s15 = sphi %s1046_s15, %s1160_s15   ;;  %s1009_s14 = sphi %s1044_s14, %s1159_s14   ;;  %s1005_s13 = sphi %s1042_s13, %s1158_s13   ;;  %s1001_s12 = sphi %s1040_s12, %s1157_s12  }
   0x4   : > { %p26_p0 = scmp.ge.s32.totalorder %s25_s17, 2  ;;  %p49_p2 = scmp.eq.s32.totalorder %s1017_s16, 0 }
   0x5   : > { %s41_s19 = sadd.s32 1, %s1005_s13  ;;  %p795_p5 = scmp.ge.s32.totalorder %s1017_s16, 2 }
   0x6   : > { %s1162_s17 = smov (%p26_p0, %s25_s17), 0  ;;  %p50_p3 = por %p49_p2, %p48_p1 }
   0x7   : > { %s37_s18 = ssub.s32 %s1013_s15, %s1162_s17  ;;  %162 = sbr.rel (%p795_p5) target bundleno = 21 (0x15), region = 20 }
   0x8   : > { %p39_p4 = scmp.eq.s32.totalorder %s37_s18, 0 }
   0xa   : > { %s1075_s20 = scalar_select %p39_p4, %s1005_s13, %s41_s19  }
   0xe   : > { %165 = sbr.rel (!%p50_p3) target bundleno = 21 (0x15), region = 24  ;;  %s167_s21 = sand.u32 (%p50_p3), 1, %s1005_s13  }
   0xf   : > { %s848_s22 = sshll.u32 (%p50_p3), %s1013_s15, 4  ;;  %s796_s23 = sshll.u32 (%p50_p3), %s167_s21, 5 }
  0x10   : > { %s175_s26 = scalar_lea.vmem (%p50_p3), %s1153_s0, %s848_s22  ;;  %s169_s27 = scalar_lea.vmem (%p50_p3), [#allocation3], %s796_s23 }
  0x11   : > { %v188_v0 = vld [vmem:[%s175_s26] sm:$0xff] (%p50_p3)  ;;  %v190_v1 = vld [vmem:[%s175_s26 + $0x8] sm:$0xff] (%p50_p3) }
  0x12   : > { %v192_v2 = vld [vmem:[%s175_s26 + $0x20] sm:$0xff] (%p50_p3)  ;;  %189 = vst [vmem:[%s169_s27] sm:$0xff] (%p50_p3), %v188_v0  ;;  %191 = vst [vmem:[%s169_s27 + $0x8] sm:$0xff] (%p50_p3), %v190_v1  ;;  %v194_v3 = vld [vmem:[%s175_s26 + $0x28] sm:$0xff] (%p50_p3) }
  0x13   : > { %193 = vst [vmem:[%s169_s27 + $0x10] sm:$0xff] (%p50_p3), %v192_v2  ;;  %195 = vst [vmem:[%s169_s27 + $0x18] sm:$0xff] (%p50_p3), %v194_v3 }
  0x15 PF: > { %p799_p6 = scmp.ge.s32.totalorder %s1017_s16, 1  ;;  %p212_p7 = scmp.lt.s32.totalorder %s1017_s16, 3 }
  0x17   : > { %p213_p8 = pnand %p799_p6, %p212_p7 }
  0x18   : > { %s219_s28 = sand.u32 (!%p213_p8), 1, %s1001_s12   ;;  %s801_s29 = sshll.u32 (!%p213_p8), %s1009_s14, 6 }
  0x19   : > { %216 = sbr.rel (%p213_p8) target bundleno = 310 (0x136), region = 51  ;;  %s800_s30 = sshll.u32 (!%p213_p8), %s219_s28, 5 }
  0x1a   : > { %p259_p9 = scmp.lt.s32.totalorder (!%p213_p8), %s801_s29, 127  ;;  %s1092_s8 = scalar_lea.vmem (!%p213_p8), [#allocation3], %s800_s30 }
  0x1b   : > { %p803_p10 = scmp.ne.s32.totalorder (!%p213_p8), %s1009_s14, 0 }
  0x20   : > { %s1164_s29 = smov (!%p259_p9, %s801_s29), 127  ;;  %283 = sbr.rel (%p803_p10) target bundleno = 39 (0x27), region = 59 }
  0x21   : > { %s802_s4 = sshll.u32 %s1164_s29, 2  ;;  %v1019_v4 = vmov (!%p803_p10), 0.0  }
  0x22   : > { %s1090_s7 = scalar_lea.vmem %s1154_s1, %s802_s4  ;;  %284 = vst [vmem:[#allocation2] sm:$0xff] (!%p803_p10), %v1019_v4  ;;  %285 = vst [vmem:[#allocation2 + $0x8] sm:$0xff] (!%p803_p10), %v1019_v4 }
  0x27 PF: > { %v941_v5 = vld [vmem:[%s1090_s7 + $0x40] sm:$0xff]   ;;  %v945_v9 = vld [vmem:[%s1090_s7 + $0x48] sm:$0xff]   ;;  %v949_v13 = vld [vmem:[%s1090_s7 + $0x50] sm:$0xff]   ;;  %p840_p11 = scmp.ne.s32.totalorder %s1009_s14, 1 }
  0x28   : > { %v942_v6 = vld [vmem:[%s1090_s7 + $0xc0] sm:$0xff]   ;;  %856 = vmatprep.subr.bf16.mxu0 %v941_v5  ;;  %v946_v10 = vld [vmem:[%s1090_s7 + $0xc8] sm:$0xff]   ;;  %v950_v14 = vld [vmem:[%s1090_s7 + $0xd0] sm:$0xff]  }
  0x29   : > { %v943_v7 = vld [vmem:[%s1090_s7] sm:$0xff]   ;;  %878 = vmatprep.subr.bf16.mxu1 %v942_v6  ;;  %v947_v11 = vld [vmem:[%s1090_s7 + $0x8] sm:$0xff]   ;;  %v951_v15 = vld [vmem:[%s1090_s7 + $0x10] sm:$0xff]  }
  0x2a   : > { %v944_v8 = vld [vmem:[%s1090_s7 + $0x80] sm:$0xff]   ;;  %857 = vmatpush3.bf16.msra.mxu0 %v943_v7  ;;  %v948_v12 = vld [vmem:[%s1090_s7 + $0x88] sm:$0xff]   ;;  %v952_v16 = vld [vmem:[%s1090_s7 + $0x90] sm:$0xff]  }
  0x2b   : > { %879 = vmatpush3.bf16.msra.mxu1 %v944_v8  ;;  %858 = vmatprep.subr.bf16.mxu0 %v945_v9  ;;  %v953_v17 = vld [vmem:[%s1090_s7 + $0x58] sm:$0xff]   ;;  %v957_v21 = vld [vmem:[%s1090_s7 + $0x60] sm:$0xff]   ;;  %v961_v25 = vld [vmem:[%s1090_s7 + $0x68] sm:$0xff]  }
  0x2c   : > { %880 = vmatprep.subr.bf16.mxu1 %v946_v10  ;;  %v954_v18 = vld [vmem:[%s1090_s7 + $0xd8] sm:$0xff]   ;;  %v958_v22 = vld [vmem:[%s1090_s7 + $0xe0] sm:$0xff]   ;;  %v962_v26 = vld [vmem:[%s1090_s7 + $0xe8] sm:$0xff]  }
  0x2d   : > { %v955_v19 = vld [vmem:[%s1090_s7 + $0x18] sm:$0xff]   ;;  %v959_v23 = vld [vmem:[%s1090_s7 + $0x20] sm:$0xff]   ;;  %v963_v27 = vld [vmem:[%s1090_s7 + $0x28] sm:$0xff]  }
  0x2e   : > { %859 = vmatpush3.bf16.msra.mxu0 %v947_v11  ;;  %v956_v20 = vld [vmem:[%s1090_s7 + $0x98] sm:$0xff]   ;;  %v960_v24 = vld [vmem:[%s1090_s7 + $0xa0] sm:$0xff]   ;;  %v964_v28 = vld [vmem:[%s1090_s7 + $0xa8] sm:$0xff]  }
  0x2f   : > { %881 = vmatpush3.bf16.msra.mxu1 %v948_v12  ;;  %860 = vmatprep.subr.bf16.mxu0 %v949_v13  ;;  %v965_v29 = vld [vmem:[%s1090_s7 + $0x70] sm:$0xff]   ;;  %v969_v33 = vld [vmem:[%s1090_s7 + $0x78] sm:$0xff]   ;;  %v286_v50 = vld [vmem:[#allocation2] sm:$0xff] }
  0x30   : > { %882 = vmatprep.subr.bf16.mxu1 %v950_v14  ;;  %v966_v30 = vld [vmem:[%s1090_s7 + $0xf0] sm:$0xff]   ;;  %v970_v34 = vld [vmem:[%s1090_s7 + $0xf8] sm:$0xff]   ;;  %v287_v55 = vld [vmem:[#allocation2 + $0x8] sm:$0xff] }
  0x31   : > { %v967_v31 = vld [vmem:[%s1090_s7 + $0x30] sm:$0xff]   ;;  %v971_v35 = vld [vmem:[%s1090_s7 + $0x38] sm:$0xff]   ;;  %v841_v61 = vld [vmem:[%s1155_s2] ss:$0 sm:$0xff] (!%p840_p11) }
  0x32   : > { %861 = vmatpush3.bf16.msra.mxu0 %v951_v15  ;;  %v968_v32 = vld [vmem:[%s1090_s7 + $0xb0] sm:$0xff]   ;;  %v972_v36 = vld [vmem:[%s1090_s7 + $0xb8] sm:$0xff]  }
  0x33   : > { %883 = vmatpush3.bf16.msra.mxu1 %v952_v16  ;;  %862 = vmatprep.subr.bf16.mxu0 %v953_v17  ;;  %v973_v37 = vld [vmem:[%s1092_s8] ss:$16 sps:$4 sm:$0xff]   ;;  %v975_v38 = vld [vmem:[%s1092_s8 + $0x4] ss:$16 sps:$4 sm:$0xff]   ;;  %v976_v39 = vld [vmem:[%s1092_s8 + $0x8] ss:$16 sps:$4 sm:$0xff]  }
  0x34   : > { %884 = vmatprep.subr.bf16.mxu1 %v954_v18  ;;  %v978_v40 = vld [vmem:[%s1092_s8 + $0xc] ss:$16 sps:$4 sm:$0xff]   ;;  %600 = vmatprep.mubr.bf16.mxu0 %v975_v38 }
  0x35   : > { %641 = vmatprep.mubr.bf16.mxu1 %v978_v40 }
  0x36   : > { %863 = vmatpush3.bf16.msra.mxu0 %v955_v19 }
  0x37   : > { %885 = vmatpush3.bf16.msra.mxu1 %v956_v20  ;;  %864 = vmatprep.subr.bf16.mxu0 %v957_v21 }
  0x38   : > { %886 = vmatprep.subr.bf16.mxu1 %v958_v22 }
  0x3a   : > { %865 = vmatpush3.bf16.msra.mxu0 %v959_v23 }
  0x3b   : > { %887 = vmatpush3.bf16.msra.mxu1 %v960_v24  ;;  %866 = vmatprep.subr.bf16.mxu0 %v961_v25 }
  0x3c   : > { %888 = vmatprep.subr.bf16.mxu1 %v962_v26 }
  0x3e   : > { %867 = vmatpush3.bf16.msra.mxu0 %v963_v27 }
  0x3f   : > { %889 = vmatpush3.bf16.msra.mxu1 %v964_v28  ;;  %868 = vmatprep.subr.bf16.mxu0 %v965_v29 }
  0x40   : > { %890 = vmatprep.subr.bf16.mxu1 %v966_v30 }
  0x42   : > { %869 = vmatpush3.bf16.msra.mxu0 %v967_v31 }
  0x43   : > { %891 = vmatpush3.bf16.msra.mxu1 %v968_v32  ;;  %870 = vmatprep.subr.bf16.mxu0 %v969_v33 }
  0x44   : > { %892 = vmatprep.subr.bf16.mxu1 %v970_v34 }
  0x46   : > { %871 = vmatpush3.bf16.msra.mxu0 %v971_v35 }
  0x47   : > { %893 = vmatpush3.bf16.msra.mxu1 %v972_v36 }
  0x49   : > { %601 = vmatmul.mubr.bf16.vlgmr.msra.gmra.mrb[0].mxu0 %v973_v37 }
  0x4a   : > { %642 = vmatmul.mubr.bf16.vlgmr.msra.gmra.mrb[0].mxu1 %v976_v39 }
 0x11c   : > { %v872_v41 = vpop.f32.mrb[0].mxu0 }
 0x11d   : > { %v894_v42 = vpop.f32.mrb[0].mxu1  ;;  %v873_v43 = vpop.f32.mrb[1].mxu0 }
 0x11e   : > { %v874_v44 = vadd.f32 %v873_v43, %v872_v41  ;;  %v895_v45 = vpop.f32.mrb[1].mxu1  ;;  %v875_v46 = vpop.f32.mrb[2].mxu0 }
 0x11f   : > { %v896_v47 = vadd.f32 %v895_v45, %v894_v42  ;;  %v897_v48 = vpop.f32.mrb[2].mxu1  ;;  %v876_v49 = vpop.f32.mrb[3].mxu0 }
 0x120   : > { %v877_v51 = vadd.f32 %v876_v49, %v875_v46  ;;  %v898_v52 = vpop.f32.mrb[3].mxu1 }
 0x121   : > { %v644_v53 = vadd.f32 %v896_v47, %v874_v44  ;;  %v899_v54 = vadd.f32 %v898_v52, %v897_v48  ;;  %657 = sbr.rel (%p840_p11) target bundleno = 310 (0x136), region = 63 }
 0x123   : > { %v650_v56 = vadd.f32 %v644_v53, %v286_v50  ;;  %v647_v57 = vadd.f32 %v899_v54, %v877_v51 }
 0x125   : > { %652 = vst [vmem:[#allocation2] sm:$0xff] %v650_v56  ;;  %v651_v58 = vadd.f32 %v647_v57, %v287_v55 }
 0x127   : > { %653 = vst [vmem:[#allocation2 + $0x8] sm:$0xff] %v651_v58 }
 0x12c   : > { %v658_v59 = vld [vmem:[#allocation2] sm:$0xff] }
 0x12d   : > { %v667_v62 = vadd.f32 %v841_v61, %v658_v59 }
 0x12e   : > { %v659_v60 = vld [vmem:[#allocation2 + $0x8] sm:$0xff] }
 0x12f   : > { %v668_v63 = vadd.f32 %v841_v61, %v659_v60  ;;  %v669_v0 = vmax.f32 %v667_v62, 0.0 }
 0x131   : > { %v670_v1 = vmax.f32 %v668_v63, 0.0 }
 0x133   : > { %v854_v2 = vpack.c.bf16 %v670_v1, %v669_v0 }
 0x135   : > { %855 = vst [vmem:[%s1156_s3] sm:$0xff] %v854_v2  }
 0x136 PF: > { %s13_s16 = sadd.s32 1, %s1017_s16   ;;  %s1157_s12 = smov %s1005_s13 }
 0x137   : > { %p10_p12 = scmp.ge.s32.totalorder %s13_s16, 4   ;;  %s1158_s13 = smov %s1075_s20 }
 0x138   : > { %s1159_s14 = smov %s1013_s15  ;;  %s1160_s15 = smov %s1162_s17 }
 0x139   :  { %12 = sbr.rel (!%p10_p12) target bundleno = 3 (0x3), region = 104 }

// kernel: _lambda_.111
= control target key start
LH: loop header
LB: loop body
LE: loop exit
PB: predicated region body
PF: predicated region fallthrough
CT: control target
= control target key end

     0   :  { %s371_s1 = inlined_call_operand.vmem [shape: bf16[256,128], index: 1, kind: input, shape index: {}]   ;;  %s372_s0 = inlined_call_operand.vmem [shape: bf16[16,256], index: 0, kind: input, shape index: {}]   ;;  %s373_s2 = inlined_call_operand.vmem [shape: f32[1,128], index: 2, kind: input, shape index: {}]   ;;  %s374_s3 = inlined_call_operand.vmem [shape: f32[16,128], index: 3, kind: output, shape index: {}]  }
   0x1   :  { %v269_v0 = vld [vmem:[%s371_s1 + $0x40] sm:$0xff]   ;;  %v271_v2 = vld [vmem:[%s371_s1 + $0x48] sm:$0xff]   ;;  %v273_v4 = vld [vmem:[%s371_s1 + $0x50] sm:$0xff]  }
   0x2   :  { %v270_v1 = vld [vmem:[%s371_s1] sm:$0xff]   ;;  %247 = vmatprep.subr.bf16.mxu0 %v269_v0  ;;  %v272_v3 = vld [vmem:[%s371_s1 + $0x8] sm:$0xff]   ;;  %v274_v5 = vld [vmem:[%s371_s1 + $0x10] sm:$0xff]  }
   0x3   :  { %248 = vmatpush3.bf16.msra.mxu0 %v270_v1  ;;  %v275_v6 = vld [vmem:[%s371_s1 + $0x58] sm:$0xff]   ;;  %v277_v8 = vld [vmem:[%s371_s1 + $0x60] sm:$0xff]   ;;  %v279_v10 = vld [vmem:[%s371_s1 + $0x68] sm:$0xff]  }
   0x4   :  { %249 = vmatprep.subr.bf16.mxu0 %v271_v2  ;;  %v276_v7 = vld [vmem:[%s371_s1 + $0x18] sm:$0xff]   ;;  %v278_v9 = vld [vmem:[%s371_s1 + $0x20] sm:$0xff]   ;;  %v280_v12 = vld [vmem:[%s371_s1 + $0x28] sm:$0xff]  }
   0x5   :  { %v287_v11 = vld [vmem:[%s372_s0 + $0x4] ss:$8 sps:$4 sm:$0xff]   ;;  %v281_v13 = vld [vmem:[%s371_s1 + $0x70] sm:$0xff]   ;;  %v283_v15 = vld [vmem:[%s371_s1 + $0x78] sm:$0xff]  }
   0x6   :  { %195 = vmatprep.mubr.bf16.mxu0 %v287_v11  ;;  %v282_v14 = vld [vmem:[%s371_s1 + $0x30] sm:$0xff]   ;;  %v284_v16 = vld [vmem:[%s371_s1 + $0x38] sm:$0xff]   ;;  %v285_v17 = vld [vmem:[%s372_s0] ss:$8 sps:$4 sm:$0xff]  }
   0x7   :  { %250 = vmatpush3.bf16.msra.mxu0 %v272_v3  ;;  %v246_v20 = vld [vmem:[%s373_s2] ss:$0 sm:$0xff] }
   0x8   :  { %251 = vmatprep.subr.bf16.mxu0 %v273_v4 }
   0xb   :  { %252 = vmatpush3.bf16.msra.mxu0 %v274_v5 }
   0xc   :  { %253 = vmatprep.subr.bf16.mxu0 %v275_v6 }
   0xf   :  { %254 = vmatpush3.bf16.msra.mxu0 %v276_v7 }
  0x10   :  { %255 = vmatprep.subr.bf16.mxu0 %v277_v8 }
  0x13   :  { %256 = vmatpush3.bf16.msra.mxu0 %v278_v9 }
  0x14   :  { %257 = vmatprep.subr.bf16.mxu0 %v279_v10 }
  0x17   :  { %258 = vmatpush3.bf16.msra.mxu0 %v280_v12 }
  0x18   :  { %259 = vmatprep.subr.bf16.mxu0 %v281_v13 }
  0x1b   :  { %260 = vmatpush3.bf16.msra.mxu0 %v282_v14 }
  0x1c   :  { %261 = vmatprep.subr.bf16.mxu0 %v283_v15 }
  0x1f   :  { %262 = vmatpush3.bf16.msra.mxu0 %v284_v16 }
  0x22   :  { %196 = vmatmul.mubr.bf16.vlgmr.msra.gmra.mrb[0].mxu0 %v285_v17 }
  0xf5   :  { %v263_v18 = vpop.f32.mrb[0].mxu0 }
  0xf6   :  { %v264_v19 = vpop.f32.mrb[1].mxu0 }
  0xf7   :  { %v265_v21 = vadd.f32 %v264_v19, %v263_v18  ;;  %v266_v22 = vpop.f32.mrb[2].mxu0 }
  0xf8   :  { %v267_v23 = vpop.f32.mrb[3].mxu0 }
  0xf9   :  { %v220_v24 = vadd.f32 %v265_v21, %v246_v20  ;;  %v268_v25 = vadd.f32 %v267_v23, %v266_v22 }
  0xfb   :  { %222 = vst [vmem:[%s374_s3] sm:$0xff] %v220_v24  ;;  %v221_v26 = vadd.f32 %v268_v25, %v246_v20 }
  0xfd   :  { %223 = vst [vmem:[%s374_s3 + $0x8] sm:$0xff] %v221_v26 }

</bundles_post_ra>
